<compile_context>
chip_gen: v7x
topology: tpu7x:2x2x1
jax: 0.10.0
libtpu: 0.0.40
codegen_flags: <defaults>
</compile_context>

<pallas_src>
import functools

import jax
import jax.numpy as jnp
import numpy as np
from jax.experimental import pallas as pl
from jax.experimental.pallas import tpu as pltpu

BN_EPS = 1e-5
LANES = 128


def _round_up(x, m):
    return ((x + m - 1) // m) * m


def _pick_row_tile(h2, w2, target_rows=512):
    """Largest divisor TH of h2 with TH*w2 <= target_rows and (TH*w2) % 8 == 0."""
    for th in range(h2, 0, -1):
        if h2 % th == 0 and th * w2 <= target_rows and (th * w2) % 8 == 0:
            return th
    return h2


# ------------- pass 1: conv as 9 shifted MXU matmuls + partial BN stats -------

def _conv_stats_kernel(xp_ref, w_ref, y_ref, ssum_ref, ssq_ref, *, th, w2, cin):
    # xp_ref  : (Hp, Wp, Cin)  f32  padded upsampled NHWC image of batch n
    # w_ref   : (9, Cin, Cp)   bf16 conv weights, one (Cin, Cp) slab per tap
    # y_ref   : (th*w2, Cp)    f32  un-normalized conv output tile
    # ssum/ssq: (1, Cp)        f32  per-tile partial sum / sum-of-squares
    t = pl.program_id(1)
    base_h = t * th
    for k in range(9):                                   # static unroll, 9 taps
        kh, kw = divmod(k, 3)
        patch = xp_ref[pl.ds(base_h + kh, th), pl.ds(kw, w2), :]   # (th, w2, Cin)
        lhs = patch.reshape(th * w2, cin).astype(jnp.bfloat16)
        contrib = jnp.dot(lhs, w_ref[k], preferred_element_type=jnp.float32)
        if k == 0:
            y_ref[...] = contrib
        else:
            y_ref[...] += contrib
    yv = y_ref[...]
    # one-pass moments (f32): per-channel partial sum and sum-of-squares
    ssum_ref[...] = jnp.sum(yv, axis=0, keepdims=True)
    ssq_ref[...] = jnp.sum(yv * yv, axis=0, keepdims=True)


# ------------- pass 2: fused BatchNorm (batch statistics) + ReLU --------------

def _bn_relu_kernel(y_ref, ssum_ref, ssq_ref, gamma_ref, beta_ref, o_ref, *,
                    inv_count, eps):
    mean = ssum_ref[...] * inv_count                      # (1, Cp)
    ex2 = ssq_ref[...] * inv_count
    var = jnp.maximum(ex2 - mean * mean, 0.0)             # biased var, f32 accum
    scale = gamma_ref[...] * jax.lax.rsqrt(var + eps)
    shift = beta_ref[...] - mean * scale
    o_ref[...] = jnp.maximum(y_ref[...] * scale + shift, 0.0)


def up_conv_forward(x_nchw, w_hwio, bias, gamma, beta):
    # Conv bias is cancelled exactly by training-mode BatchNorm mean subtraction.
    del bias
    N, C_in, H, W = x_nchw.shape
    C_out = w_hwio.shape[-1]
    H2, W2 = 2 * H, 2 * W
    Hp, Wp = H2 + 2, W2 + 2
    Cp = _round_up(C_out, LANES)                  # lane-dense output channels

    TH = _pick_row_tile(H2, W2)                   # output rows per grid step
    assert H2 % TH == 0 and (TH * W2) % 8 == 0, (H2, W2, TH)
    H_tiles = H2 // TH
    TM = TH * W2                                  # rows per tile (~512 target)
    M = N * H2 * W2

    # Glue (pure data movement, ~4x input bytes): NCHW -> NHWC, nearest x2, pad 1.
    x = jnp.transpose(x_nchw, (0, 2, 3, 1)).astype(jnp.float32)
    x = jnp.repeat(jnp.repeat(x, 2, axis=1), 2, axis=2)
    xp = jnp.pad(x, ((0, 0), (1, 1), (1, 1), (0, 0)))
    # TODO(synk): for very large images, tile xp row-bands with an explicit halo
    # DMA (pl.ANY + make_async_copy) instead of keeping a full image per block.

    w = w_hwio.reshape(9, C_in, C_out)
    w = jnp.pad(w, ((0, 0), (0, 0), (0, Cp - C_out))).astype(jnp.bfloat16)
    gamma_p = jnp.pad(gamma.astype(jnp.float32), (0, Cp - C_out)).reshape(1, Cp)
    beta_p = jnp.pad(beta.astype(jnp.float32), (0, Cp - C_out)).reshape(1, Cp)

    conv_kernel = functools.partial(_conv_stats_kernel, th=TH, w2=W2, cin=C_in)
    y_unnorm, ssum_part, ssq_part = pl.pallas_call(
        conv_kernel,
        out_shape=(
            jax.ShapeDtypeStruct((M, Cp), jnp.float32),
            jax.ShapeDtypeStruct((N * H_tiles, 1, Cp), jnp.float32),
            jax.ShapeDtypeStruct((N * H_tiles, 1, Cp), jnp.float32),
        ),
        grid=(N, H_tiles),
        in_specs=[
            # full padded image of batch n; block index constant over t so the
            # buffer stays resident across the inner row-band loop.
            pl.BlockSpec((None, Hp, Wp, C_in), lambda n, t: (n, 0, 0, 0)),
            pl.BlockSpec((9, C_in, Cp), lambda n, t: (0, 0, 0)),
        ],
        out_specs=(
            pl.BlockSpec((TM, Cp), lambda n, t: (n * H_tiles + t, 0)),
            pl.BlockSpec((None, 1, Cp), lambda n, t: (n * H_tiles + t, 0, 0)),
            pl.BlockSpec((None, 1, Cp), lambda n, t: (n * H_tiles + t, 0, 0)),
        ),
        compiler_params=pltpu.CompilerParams(
            dimension_semantics=("parallel", "arbitrary"),
            vmem_limit_bytes=32 * 1024 * 1024),
    )(xp, w)

    # Cross-tile reduction of the partial stats (tiny: N*H_tiles x Cp).
    ssum = jnp.sum(ssum_part, axis=0)             # (1, Cp)
    ssq = jnp.sum(ssq_part, axis=0)               # (1, Cp)

    bn_kernel = functools.partial(_bn_relu_kernel, inv_count=1.0 / M, eps=BN_EPS)
    out2d = pl.pallas_call(
        bn_kernel,
        out_shape=jax.ShapeDtypeStruct((M, Cp), jnp.float32),
        grid=(M // TM,),
        in_specs=[
            pl.BlockSpec((TM, Cp), lambda i: (i, 0)),
            pl.BlockSpec((1, Cp), lambda i: (0, 0)),
            pl.BlockSpec((1, Cp), lambda i: (0, 0)),
            pl.BlockSpec((1, Cp), lambda i: (0, 0)),
            pl.BlockSpec((1, Cp), lambda i: (0, 0)),
        ],
        out_specs=pl.BlockSpec((TM, Cp), lambda i: (i, 0)),
        compiler_params=pltpu.CompilerParams(
            dimension_semantics=("parallel",)),
    )(y_unnorm, ssum, ssq, gamma_p, beta_p)

    y = out2d.reshape(N, H2, W2, Cp)[:, :, :, :C_out]
    # Keep NCHW to match the PyTorch module; drop this transpose if downstream
    # accepts channels-last (NHWC is the lane-dense layout the kernel produces).
    return jnp.transpose(y, (0, 3, 1, 2))


def up_conv_reference(x_nchw, w_hwio, bias, gamma, beta):
    # Pure-JAX f32 reference matching the PyTorch module's forward.
    x = jnp.transpose(x_nchw, (0, 2, 3, 1))
    x = jnp.repeat(jnp.repeat(x, 2, axis=1), 2, axis=2)
    y = jax.lax.conv_general_dilated(
        x, w_hwio, window_strides=(1, 1), padding="SAME",
        dimension_numbers=("NHWC", "HWIO", "NHWC"))
    y = y + bias
    mean = jnp.mean(y, axis=(0, 1, 2), keepdims=True)
    var = jnp.mean((y - mean) ** 2, axis=(0, 1, 2), keepdims=True)
    y = (y - mean) * jax.lax.rsqrt(var + BN_EPS) * gamma + beta
    y = jnp.maximum(y, 0.0)
    return jnp.transpose(y, (0, 3, 1, 2))


if __name__ == "__main__":
    key = jax.random.PRNGKey(0)
    k_x, k_w, k_b, k_g, k_be = jax.random.split(key, 5)

    N, C_in, H, W = 2, 4, 16, 16
    C_out = 8

    x = jax.random.normal(k_x, (N, C_in, H, W), dtype=jnp.float32)
    # Conv weight in HWIO layout (3, 3, C_in, C_out); deterministic small init.
    w = 0.1 * jax.random.normal(k_w, (3, 3, C_in, C_out), dtype=jnp.float32)
    b = 0.01 * jax.random.normal(k_b, (C_out,), dtype=jnp.float32)
    gamma = 1.0 + 0.1 * jax.random.normal(k_g, (C_out,), dtype=jnp.float32)
    beta = 0.1 * jax.random.normal(k_be, (C_out,), dtype=jnp.float32)

    fwd = jax.jit(up_conv_forward)
    out = jax.block_until_ready(fwd(x, w, b, gamma, beta))
    ref = jax.block_until_ready(up_conv_reference(x, w, b, gamma, beta))

    assert out.shape == (N, C_out, 2 * H, 2 * W), out.shape
    out_np = np.asarray(out)
    ref_np = np.asarray(ref)
    # Matmul operands are bf16 in the kernel (f32 accumulation), so compare
    # against the pure-f32 reference with a loosened tolerance.
    max_err = float(np.max(np.abs(out_np - ref_np)))
    mean_err = float(np.mean(np.abs(out_np - ref_np)))
    assert np.allclose(out_np, ref_np, rtol=5e-2, atol=5e-2), (max_err, mean_err)
    assert mean_err < 1e-2, mean_err

    print("KERNEL_OK")
</pallas_src>

<mosaic_0001>
module attributes {stable_mosaic.version = 11 : i64} {
  func.func @_conv_stats_kernel(%arg0: i32, %arg1: i32, %arg2: memref<1x34x34x4xf32, #tpu.memory_space<vmem>>, %arg3: memref<9x4x128xbf16, #tpu.memory_space<vmem>>, %arg4: memref<512x128xf32, #tpu.memory_space<vmem>>, %arg5: memref<1x1x128xf32, #tpu.memory_space<vmem>>, %arg6: memref<1x1x128xf32, #tpu.memory_space<vmem>>) attributes {dimension_semantics = [#tpu.dimension_semantics<parallel>, #tpu.dimension_semantics<arbitrary>], iteration_bounds = array<i64: 2, 2>, scalar_prefetch = 0 : i64, scratch_operands = 0 : i64, tpu.core_type = #tpu.core_type<tc>, window_params = [{transform_indices = @transform_0, window_bounds = array<i64: 1, 34, 34, 4>}, {pipeline_mode = #tpu.pipeline_mode<synchronous>, transform_indices = @transform_1, window_bounds = array<i64: 9, 4, 128>}, {transform_indices = @transform_2, window_bounds = array<i64: 512, 128>}, {transform_indices = @transform_3, window_bounds = array<i64: 1, 1, 128>}, {transform_indices = @transform_4, window_bounds = array<i64: 1, 1, 128>}]} {
    %c16_i32 = arith.constant 16 : i32
    %0 = arith.muli %arg1, %c16_i32 : i32
    %c0_i32 = arith.constant 0 : i32
    %1 = arith.addi %0, %c0_i32 : i32
    %c0 = arith.constant 0 : index
    %2 = arith.index_cast %1 : i32 to index
    %c0_0 = arith.constant 0 : index
    %c0_1 = arith.constant 0 : index
    %3 = vector.load %arg2[%c0, %2, %c0_0, %c0_1] : memref<1x34x34x4xf32, #tpu.memory_space<vmem>>, vector<1x16x32x4xf32>
    %4 = vector.shape_cast %3 : vector<1x16x32x4xf32> to vector<16x32x4xf32>
    %5 = vector.shape_cast %4 : vector<16x32x4xf32> to vector<512x4xf32>
    %6 = arith.truncf %5 : vector<512x4xf32> to vector<512x4xbf16>
    %c0_2 = arith.constant 0 : index
    %c0_3 = arith.constant 0 : index
    %c0_4 = arith.constant 0 : index
    %7 = vector.load %arg3[%c0_2, %c0_3, %c0_4] : memref<9x4x128xbf16, #tpu.memory_space<vmem>>, vector<1x4x128xbf16>
    %8 = vector.shape_cast %7 : vector<1x4x128xbf16> to vector<4x128xbf16>
    %cst = arith.constant dense<0.000000e+00> : vector<512x128xf32>
    %9 = tpu.matmul %6, %8, %cst {dimension_numbers = #tpu.dot_dimension_numbers<[1], [0], [0], [1], [0, 0, 1, 1], [], []>} : vector<512x4xbf16>, vector<4x128xbf16>, vector<512x128xf32> -> vector<512x128xf32>
    %c0_5 = arith.constant 0 : index
    %c0_6 = arith.constant 0 : index
    %10 = vector.load %arg4[%c0_5, %c0_6] : memref<512x128xf32, #tpu.memory_space<vmem>>, vector<512x128xf32>
    tpu.vector_store %arg4[%c0_5, %c0_6], %9 {strides = array<i32>} : memref<512x128xf32, #tpu.memory_space<vmem>>, vector<512x128xf32>,
    %c0_i32_7 = arith.constant 0 : i32
    %11 = arith.addi %0, %c0_i32_7 : i32
    %c0_8 = arith.constant 0 : index
    %12 = arith.index_cast %11 : i32 to index
    %c1 = arith.constant 1 : index
    %c0_9 = arith.constant 0 : index
    %13 = vector.load %arg2[%c0_8, %12, %c1, %c0_9] : memref<1x34x34x4xf32, #tpu.memory_space<vmem>>, vector<1x16x32x4xf32>
    %14 = vector.shape_cast %13 : vector<1x16x32x4xf32> to vector<16x32x4xf32>
    %15 = vector.shape_cast %14 : vector<16x32x4xf32> to vector<512x4xf32>
    %16 = arith.truncf %15 : vector<512x4xf32> to vector<512x4xbf16>
    %c1_10 = arith.constant 1 : index
    %c0_11 = arith.constant 0 : index
    %c0_12 = arith.constant 0 : index
    %17 = vector.load %arg3[%c1_10, %c0_11, %c0_12] : memref<9x4x128xbf16, #tpu.memory_space<vmem>>, vector<1x4x128xbf16>
    %18 = vector.shape_cast %17 : vector<1x4x128xbf16> to vector<4x128xbf16>
    %cst_13 = arith.constant dense<0.000000e+00> : vector<512x128xf32>
    %19 = tpu.matmul %16, %18, %cst_13 {dimension_numbers = #tpu.dot_dimension_numbers<[1], [0], [0], [1], [0, 0, 1, 1], [], []>} : vector<512x4xbf16>, vector<4x128xbf16>, vector<512x128xf32> -> vector<512x128xf32>
    %c0_14 = arith.constant 0 : index
    %c0_15 = arith.constant 0 : index
    %20 = vector.load %arg4[%c0_14, %c0_15] : memref<512x128xf32, #tpu.memory_space<vmem>>, vector<512x128xf32>
    %21 = arith.addf %20, %19 : vector<512x128xf32>
    %c0_16 = arith.constant 0 : index
    %c0_17 = arith.constant 0 : index
    %22 = vector.load %arg4[%c0_16, %c0_17] : memref<512x128xf32, #tpu.memory_space<vmem>>, vector<512x128xf32>
    tpu.vector_store %arg4[%c0_16, %c0_17], %21 {strides = array<i32>} : memref<512x128xf32, #tpu.memory_space<vmem>>, vector<512x128xf32>,
    %c0_i32_18 = arith.constant 0 : i32
    %23 = arith.addi %0, %c0_i32_18 : i32
    %c0_19 = arith.constant 0 : index
    %24 = arith.index_cast %23 : i32 to index
    %c2 = arith.constant 2 : index
    %c0_20 = arith.constant 0 : index
    %25 = vector.load %arg2[%c0_19, %24, %c2, %c0_20] : memref<1x34x34x4xf32, #tpu.memory_space<vmem>>, vector<1x16x32x4xf32>
    %26 = vector.shape_cast %25 : vector<1x16x32x4xf32> to vector<16x32x4xf32>
    %27 = vector.shape_cast %26 : vector<16x32x4xf32> to vector<512x4xf32>
    %28 = arith.truncf %27 : vector<512x4xf32> to vector<512x4xbf16>
    %c2_21 = arith.constant 2 : index
    %c0_22 = arith.constant 0 : index
    %c0_23 = arith.constant 0 : index
    %29 = vector.load %arg3[%c2_21, %c0_22, %c0_23] : memref<9x4x128xbf16, #tpu.memory_space<vmem>>, vector<1x4x128xbf16>
    %30 = vector.shape_cast %29 : vector<1x4x128xbf16> to vector<4x128xbf16>
    %cst_24 = arith.constant dense<0.000000e+00> : vector<512x128xf32>
    %31 = tpu.matmul %28, %30, %cst_24 {dimension_numbers = #tpu.dot_dimension_numbers<[1], [0], [0], [1], [0, 0, 1, 1], [], []>} : vector<512x4xbf16>, vector<4x128xbf16>, vector<512x128xf32> -> vector<512x128xf32>
    %c0_25 = arith.constant 0 : index
    %c0_26 = arith.constant 0 : index
    %32 = vector.load %arg4[%c0_25, %c0_26] : memref<512x128xf32, #tpu.memory_space<vmem>>, vector<512x128xf32>
    %33 = arith.addf %32, %31 : vector<512x128xf32>
    %c0_27 = arith.constant 0 : index
    %c0_28 = arith.constant 0 : index
    %34 = vector.load %arg4[%c0_27, %c0_28] : memref<512x128xf32, #tpu.memory_space<vmem>>, vector<512x128xf32>
    tpu.vector_store %arg4[%c0_27, %c0_28], %33 {strides = array<i32>} : memref<512x128xf32, #tpu.memory_space<vmem>>, vector<512x128xf32>,
    %c1_i32 = arith.constant 1 : i32
    %35 = arith.addi %0, %c1_i32 : i32
    %c0_29 = arith.constant 0 : index
    %36 = arith.index_cast %35 : i32 to index
    %c0_30 = arith.constant 0 : index
    %c0_31 = arith.constant 0 : index
    %37 = vector.load %arg2[%c0_29, %36, %c0_30, %c0_31] : memref<1x34x34x4xf32, #tpu.memory_space<vmem>>, vector<1x16x32x4xf32>
    %38 = vector.shape_cast %37 : vector<1x16x32x4xf32> to vector<16x32x4xf32>
    %39 = vector.shape_cast %38 : vector<16x32x4xf32> to vector<512x4xf32>
    %40 = arith.truncf %39 : vector<512x4xf32> to vector<512x4xbf16>
    %c3 = arith.constant 3 : index
    %c0_32 = arith.constant 0 : index
    %c0_33 = arith.constant 0 : index
    %41 = vector.load %arg3[%c3, %c0_32, %c0_33] : memref<9x4x128xbf16, #tpu.memory_space<vmem>>, vector<1x4x128xbf16>
    %42 = vector.shape_cast %41 : vector<1x4x128xbf16> to vector<4x128xbf16>
    %cst_34 = arith.constant dense<0.000000e+00> : vector<512x128xf32>
    %43 = tpu.matmul %40, %42, %cst_34 {dimension_numbers = #tpu.dot_dimension_numbers<[1], [0], [0], [1], [0, 0, 1, 1], [], []>} : vector<512x4xbf16>, vector<4x128xbf16>, vector<512x128xf32> -> vector<512x128xf32>
    %c0_35 = arith.constant 0 : index
    %c0_36 = arith.constant 0 : index
    %44 = vector.load %arg4[%c0_35, %c0_36] : memref<512x128xf32, #tpu.memory_space<vmem>>, vector<512x128xf32>
    %45 = arith.addf %44, %43 : vector<512x128xf32>
    %c0_37 = arith.constant 0 : index
    %c0_38 = arith.constant 0 : index
    %46 = vector.load %arg4[%c0_37, %c0_38] : memref<512x128xf32, #tpu.memory_space<vmem>>, vector<512x128xf32>
    tpu.vector_store %arg4[%c0_37, %c0_38], %45 {strides = array<i32>} : memref<512x128xf32, #tpu.memory_space<vmem>>, vector<512x128xf32>,
    %c1_i32_39 = arith.constant 1 : i32
    %47 = arith.addi %0, %c1_i32_39 : i32
    %c0_40 = arith.constant 0 : index
    %48 = arith.index_cast %47 : i32 to index
    %c1_41 = arith.constant 1 : index
    %c0_42 = arith.constant 0 : index
    %49 = vector.load %arg2[%c0_40, %48, %c1_41, %c0_42] : memref<1x34x34x4xf32, #tpu.memory_space<vmem>>, vector<1x16x32x4xf32>
    %50 = vector.shape_cast %49 : vector<1x16x32x4xf32> to vector<16x32x4xf32>
    %51 = vector.shape_cast %50 : vector<16x32x4xf32> to vector<512x4xf32>
    %52 = arith.truncf %51 : vector<512x4xf32> to vector<512x4xbf16>
    %c4 = arith.constant 4 : index
    %c0_43 = arith.constant 0 : index
    %c0_44 = arith.constant 0 : index
    %53 = vector.load %arg3[%c4, %c0_43, %c0_44] : memref<9x4x128xbf16, #tpu.memory_space<vmem>>, vector<1x4x128xbf16>
    %54 = vector.shape_cast %53 : vector<1x4x128xbf16> to vector<4x128xbf16>
    %cst_45 = arith.constant dense<0.000000e+00> : vector<512x128xf32>
    %55 = tpu.matmul %52, %54, %cst_45 {dimension_numbers = #tpu.dot_dimension_numbers<[1], [0], [0], [1], [0, 0, 1, 1], [], []>} : vector<512x4xbf16>, vector<4x128xbf16>, vector<512x128xf32> -> vector<512x128xf32>
    %c0_46 = arith.constant 0 : index
    %c0_47 = arith.constant 0 : index
    %56 = vector.load %arg4[%c0_46, %c0_47] : memref<512x128xf32, #tpu.memory_space<vmem>>, vector<512x128xf32>
    %57 = arith.addf %56, %55 : vector<512x128xf32>
    %c0_48 = arith.constant 0 : index
    %c0_49 = arith.constant 0 : index
    %58 = vector.load %arg4[%c0_48, %c0_49] : memref<512x128xf32, #tpu.memory_space<vmem>>, vector<512x128xf32>
    tpu.vector_store %arg4[%c0_48, %c0_49], %57 {strides = array<i32>} : memref<512x128xf32, #tpu.memory_space<vmem>>, vector<512x128xf32>,
    %c1_i32_50 = arith.constant 1 : i32
    %59 = arith.addi %0, %c1_i32_50 : i32
    %c0_51 = arith.constant 0 : index
    %60 = arith.index_cast %59 : i32 to index
    %c2_52 = arith.constant 2 : index
    %c0_53 = arith.constant 0 : index
    %61 = vector.load %arg2[%c0_51, %60, %c2_52, %c0_53] : memref<1x34x34x4xf32, #tpu.memory_space<vmem>>, vector<1x16x32x4xf32>
    %62 = vector.shape_cast %61 : vector<1x16x32x4xf32> to vector<16x32x4xf32>
    %63 = vector.shape_cast %62 : vector<16x32x4xf32> to vector<512x4xf32>
    %64 = arith.truncf %63 : vector<512x4xf32> to vector<512x4xbf16>
    %c5 = arith.constant 5 : index
    %c0_54 = arith.constant 0 : index
    %c0_55 = arith.constant 0 : index
    %65 = vector.load %arg3[%c5, %c0_54, %c0_55] : memref<9x4x128xbf16, #tpu.memory_space<vmem>>, vector<1x4x128xbf16>
    %66 = vector.shape_cast %65 : vector<1x4x128xbf16> to vector<4x128xbf16>
    %cst_56 = arith.constant dense<0.000000e+00> : vector<512x128xf32>
    %67 = tpu.matmul %64, %66, %cst_56 {dimension_numbers = #tpu.dot_dimension_numbers<[1], [0], [0], [1], [0, 0, 1, 1], [], []>} : vector<512x4xbf16>, vector<4x128xbf16>, vector<512x128xf32> -> vector<512x128xf32>
    %c0_57 = arith.constant 0 : index
    %c0_58 = arith.constant 0 : index
    %68 = vector.load %arg4[%c0_57, %c0_58] : memref<512x128xf32, #tpu.memory_space<vmem>>, vector<512x128xf32>
    %69 = arith.addf %68, %67 : vector<512x128xf32>
    %c0_59 = arith.constant 0 : index
    %c0_60 = arith.constant 0 : index
    %70 = vector.load %arg4[%c0_59, %c0_60] : memref<512x128xf32, #tpu.memory_space<vmem>>, vector<512x128xf32>
    tpu.vector_store %arg4[%c0_59, %c0_60], %69 {strides = array<i32>} : memref<512x128xf32, #tpu.memory_space<vmem>>, vector<512x128xf32>,
    %c2_i32 = arith.constant 2 : i32
    %71 = arith.addi %0, %c2_i32 : i32
    %c0_61 = arith.constant 0 : index
    %72 = arith.index_cast %71 : i32 to index
    %c0_62 = arith.constant 0 : index
    %c0_63 = arith.constant 0 : index
    %73 = vector.load %arg2[%c0_61, %72, %c0_62, %c0_63] : memref<1x34x34x4xf32, #tpu.memory_space<vmem>>, vector<1x16x32x4xf32>
    %74 = vector.shape_cast %73 : vector<1x16x32x4xf32> to vector<16x32x4xf32>
    %75 = vector.shape_cast %74 : vector<16x32x4xf32> to vector<512x4xf32>
    %76 = arith.truncf %75 : vector<512x4xf32> to vector<512x4xbf16>
    %c6 = arith.constant 6 : index
    %c0_64 = arith.constant 0 : index
    %c0_65 = arith.constant 0 : index
    %77 = vector.load %arg3[%c6, %c0_64, %c0_65] : memref<9x4x128xbf16, #tpu.memory_space<vmem>>, vector<1x4x128xbf16>
    %78 = vector.shape_cast %77 : vector<1x4x128xbf16> to vector<4x128xbf16>
    %cst_66 = arith.constant dense<0.000000e+00> : vector<512x128xf32>
    %79 = tpu.matmul %76, %78, %cst_66 {dimension_numbers = #tpu.dot_dimension_numbers<[1], [0], [0], [1], [0, 0, 1, 1], [], []>} : vector<512x4xbf16>, vector<4x128xbf16>, vector<512x128xf32> -> vector<512x128xf32>
    %c0_67 = arith.constant 0 : index
    %c0_68 = arith.constant 0 : index
    %80 = vector.load %arg4[%c0_67, %c0_68] : memref<512x128xf32, #tpu.memory_space<vmem>>, vector<512x128xf32>
    %81 = arith.addf %80, %79 : vector<512x128xf32>
    %c0_69 = arith.constant 0 : index
    %c0_70 = arith.constant 0 : index
    %82 = vector.load %arg4[%c0_69, %c0_70] : memref<512x128xf32, #tpu.memory_space<vmem>>, vector<512x128xf32>
    tpu.vector_store %arg4[%c0_69, %c0_70], %81 {strides = array<i32>} : memref<512x128xf32, #tpu.memory_space<vmem>>, vector<512x128xf32>,
    %c2_i32_71 = arith.constant 2 : i32
    %83 = arith.addi %0, %c2_i32_71 : i32
    %c0_72 = arith.constant 0 : index
    %84 = arith.index_cast %83 : i32 to index
    %c1_73 = arith.constant 1 : index
    %c0_74 = arith.constant 0 : index
    %85 = vector.load %arg2[%c0_72, %84, %c1_73, %c0_74] : memref<1x34x34x4xf32, #tpu.memory_space<vmem>>, vector<1x16x32x4xf32>
    %86 = vector.shape_cast %85 : vector<1x16x32x4xf32> to vector<16x32x4xf32>
    %87 = vector.shape_cast %86 : vector<16x32x4xf32> to vector<512x4xf32>
    %88 = arith.truncf %87 : vector<512x4xf32> to vector<512x4xbf16>
    %c7 = arith.constant 7 : index
    %c0_75 = arith.constant 0 : index
    %c0_76 = arith.constant 0 : index
    %89 = vector.load %arg3[%c7, %c0_75, %c0_76] : memref<9x4x128xbf16, #tpu.memory_space<vmem>>, vector<1x4x128xbf16>
    %90 = vector.shape_cast %89 : vector<1x4x128xbf16> to vector<4x128xbf16>
    %cst_77 = arith.constant dense<0.000000e+00> : vector<512x128xf32>
    %91 = tpu.matmul %88, %90, %cst_77 {dimension_numbers = #tpu.dot_dimension_numbers<[1], [0], [0], [1], [0, 0, 1, 1], [], []>} : vector<512x4xbf16>, vector<4x128xbf16>, vector<512x128xf32> -> vector<512x128xf32>
    %c0_78 = arith.constant 0 : index
    %c0_79 = arith.constant 0 : index
    %92 = vector.load %arg4[%c0_78, %c0_79] : memref<512x128xf32, #tpu.memory_space<vmem>>, vector<512x128xf32>
    %93 = arith.addf %92, %91 : vector<512x128xf32>
    %c0_80 = arith.constant 0 : index
    %c0_81 = arith.constant 0 : index
    %94 = vector.load %arg4[%c0_80, %c0_81] : memref<512x128xf32, #tpu.memory_space<vmem>>, vector<512x128xf32>
    tpu.vector_store %arg4[%c0_80, %c0_81], %93 {strides = array<i32>} : memref<512x128xf32, #tpu.memory_space<vmem>>, vector<512x128xf32>,
    %c2_i32_82 = arith.constant 2 : i32
    %95 = arith.addi %0, %c2_i32_82 : i32
    %c0_83 = arith.constant 0 : index
    %96 = arith.index_cast %95 : i32 to index
    %c2_84 = arith.constant 2 : index
    %c0_85 = arith.constant 0 : index
    %97 = vector.load %arg2[%c0_83, %96, %c2_84, %c0_85] : memref<1x34x34x4xf32, #tpu.memory_space<vmem>>, vector<1x16x32x4xf32>
    %98 = vector.shape_cast %97 : vector<1x16x32x4xf32> to vector<16x32x4xf32>
    %99 = vector.shape_cast %98 : vector<16x32x4xf32> to vector<512x4xf32>
    %100 = arith.truncf %99 : vector<512x4xf32> to vector<512x4xbf16>
    %c8 = arith.constant 8 : index
    %c0_86 = arith.constant 0 : index
    %c0_87 = arith.constant 0 : index
    %101 = vector.load %arg3[%c8, %c0_86, %c0_87] : memref<9x4x128xbf16, #tpu.memory_space<vmem>>, vector<1x4x128xbf16>
    %102 = vector.shape_cast %101 : vector<1x4x128xbf16> to vector<4x128xbf16>
    %cst_88 = arith.constant dense<0.000000e+00> : vector<512x128xf32>
    %103 = tpu.matmul %100, %102, %cst_88 {dimension_numbers = #tpu.dot_dimension_numbers<[1], [0], [0], [1], [0, 0, 1, 1], [], []>} : vector<512x4xbf16>, vector<4x128xbf16>, vector<512x128xf32> -> vector<512x128xf32>
    %c0_89 = arith.constant 0 : index
    %c0_90 = arith.constant 0 : index
    %104 = vector.load %arg4[%c0_89, %c0_90] : memref<512x128xf32, #tpu.memory_space<vmem>>, vector<512x128xf32>
    %105 = arith.addf %104, %103 : vector<512x128xf32>
    %c0_91 = arith.constant 0 : index
    %c0_92 = arith.constant 0 : index
    %106 = vector.load %arg4[%c0_91, %c0_92] : memref<512x128xf32, #tpu.memory_space<vmem>>, vector<512x128xf32>
    tpu.vector_store %arg4[%c0_91, %c0_92], %105 {strides = array<i32>} : memref<512x128xf32, #tpu.memory_space<vmem>>, vector<512x128xf32>,
    %c0_93 = arith.constant 0 : index
    %c0_94 = arith.constant 0 : index
    %107 = vector.load %arg4[%c0_93, %c0_94] : memref<512x128xf32, #tpu.memory_space<vmem>>, vector<512x128xf32>
    %cst_95 = arith.constant dense<0.000000e+00> : vector<128xf32>
    %108 = vector.multi_reduction <add>, %107, %cst_95 [0] : vector<512x128xf32> to vector<128xf32>
    %109 = vector.shape_cast %108 : vector<128xf32> to vector<1x128xf32>
    %c0_96 = arith.constant 0 : index
    %c0_97 = arith.constant 0 : index
    %c0_98 = arith.constant 0 : index
    %110 = vector.load %arg5[%c0_96, %c0_97, %c0_98] : memref<1x1x128xf32, #tpu.memory_space<vmem>>, vector<1x1x128xf32>
    %111 = vector.shape_cast %110 : vector<1x1x128xf32> to vector<1x128xf32>
    %112 = vector.shape_cast %109 : vector<1x128xf32> to vector<1x1x128xf32>
    tpu.vector_store %arg5[%c0_96, %c0_97, %c0_98], %112 {strides = array<i32>} : memref<1x1x128xf32, #tpu.memory_space<vmem>>, vector<1x1x128xf32>,
    %113 = arith.mulf %107, %107 : vector<512x128xf32>
    %cst_99 = arith.constant dense<0.000000e+00> : vector<128xf32>
    %114 = vector.multi_reduction <add>, %113, %cst_99 [0] : vector<512x128xf32> to vector<128xf32>
    %115 = vector.shape_cast %114 : vector<128xf32> to vector<1x128xf32>
    %c0_100 = arith.constant 0 : index
    %c0_101 = arith.constant 0 : index
    %c0_102 = arith.constant 0 : index
    %116 = vector.load %arg6[%c0_100, %c0_101, %c0_102] : memref<1x1x128xf32, #tpu.memory_space<vmem>>, vector<1x1x128xf32>
    %117 = vector.shape_cast %116 : vector<1x1x128xf32> to vector<1x128xf32>
    %118 = vector.shape_cast %115 : vector<1x128xf32> to vector<1x1x128xf32>
    tpu.vector_store %arg6[%c0_100, %c0_101, %c0_102], %118 {strides = array<i32>} : memref<1x1x128xf32, #tpu.memory_space<vmem>>, vector<1x1x128xf32>,
    return
  }
  func.func @transform_0(%arg0: i32, %arg1: i32) -> (i32, i32, i32, i32) {
    %c0_i32 = arith.constant 0 : i32
    %c0_i32_0 = arith.constant 0 : i32
    %c0_i32_1 = arith.constant 0 : i32
    %c0_i32_2 = arith.constant 0 : i32
    return %arg0, %c0_i32, %c0_i32_0, %c0_i32_1 : i32, i32, i32, i32
  }
  func.func @transform_1(%arg0: i32, %arg1: i32) -> (i32, i32, i32) {
    %c0_i32 = arith.constant 0 : i32
    %c0_i32_0 = arith.constant 0 : i32
    %c0_i32_1 = arith.constant 0 : i32
    %c0_i32_2 = arith.constant 0 : i32
    return %c0_i32, %c0_i32_0, %c0_i32_1 : i32, i32, i32
  }
  func.func @transform_2(%arg0: i32, %arg1: i32) -> (i32, i32) {
    %c2_i32 = arith.constant 2 : i32
    %0 = arith.muli %arg0, %c2_i32 : i32
    %1 = arith.addi %0, %arg1 : i32
    %c0_i32 = arith.constant 0 : i32
    %c0_i32_0 = arith.constant 0 : i32
    return %1, %c0_i32 : i32, i32
  }
  func.func @transform_3(%arg0: i32, %arg1: i32) -> (i32, i32, i32) {
    %c2_i32 = arith.constant 2 : i32
    %0 = arith.muli %arg0, %c2_i32 : i32
    %1 = arith.addi %0, %arg1 : i32
    %c0_i32 = arith.constant 0 : i32
    %c0_i32_0 = arith.constant 0 : i32
    %c0_i32_1 = arith.constant 0 : i32
    return %1, %c0_i32, %c0_i32_0 : i32, i32, i32
  }
  func.func @transform_4(%arg0: i32, %arg1: i32) -> (i32, i32, i32) {
    %c2_i32 = arith.constant 2 : i32
    %0 = arith.muli %arg0, %c2_i32 : i32
    %1 = arith.addi %0, %arg1 : i32
    %c0_i32 = arith.constant 0 : i32
    %c0_i32_0 = arith.constant 0 : i32
    %c0_i32_1 = arith.constant 0 : i32
    return %1, %c0_i32, %c0_i32_0 : i32, i32, i32
  }
}

module attributes {stable_mosaic.version = 11 : i64} {
  func.func @_bn_relu_kernel(%arg0: i32, %arg1: memref<512x128xf32, #tpu.memory_space<vmem>>, %arg2: memref<1x128xf32, #tpu.memory_space<vmem>>, %arg3: memref<1x128xf32, #tpu.memory_space<vmem>>, %arg4: memref<1x128xf32, #tpu.memory_space<vmem>>, %arg5: memref<1x128xf32, #tpu.memory_space<vmem>>, %arg6: memref<512x128xf32, #tpu.memory_space<vmem>>) attributes {dimension_semantics = [#tpu.dimension_semantics<parallel>], iteration_bounds = array<i64: 4>, scalar_prefetch = 0 : i64, scratch_operands = 0 : i64, tpu.core_type = #tpu.core_type<tc>, window_params = [{transform_indices = @transform_0, window_bounds = array<i64: 512, 128>}, {pipeline_mode = #tpu.pipeline_mode<synchronous>, transform_indices = @transform_1, window_bounds = array<i64: 1, 128>}, {pipeline_mode = #tpu.pipeline_mode<synchronous>, transform_indices = @transform_2, window_bounds = array<i64: 1, 128>}, {pipeline_mode = #tpu.pipeline_mode<synchronous>, transform_indices = @transform_3, window_bounds = array<i64: 1, 128>}, {pipeline_mode = #tpu.pipeline_mode<synchronous>, transform_indices = @transform_4, window_bounds = array<i64: 1, 128>}, {transform_indices = @transform_5, window_bounds = array<i64: 512, 128>}]} {
    %c0 = arith.constant 0 : index
    %c0_0 = arith.constant 0 : index
    %0 = vector.load %arg2[%c0, %c0_0] : memref<1x128xf32, #tpu.memory_space<vmem>>, vector<1x128xf32>
    %cst = arith.constant 4.8828125E-4 : f32
    %1 = vector.broadcast %cst : f32 to vector<1x128xf32>
    %2 = arith.mulf %0, %1 : vector<1x128xf32>
    %c0_1 = arith.constant 0 : index
    %c0_2 = arith.constant 0 : index
    %3 = vector.load %arg3[%c0_1, %c0_2] : memref<1x128xf32, #tpu.memory_space<vmem>>, vector<1x128xf32>
    %cst_3 = arith.constant 4.8828125E-4 : f32
    %4 = vector.broadcast %cst_3 : f32 to vector<1x128xf32>
    %5 = arith.mulf %3, %4 : vector<1x128xf32>
    %6 = arith.mulf %2, %2 : vector<1x128xf32>
    %7 = arith.subf %5, %6 : vector<1x128xf32>
    %cst_4 = arith.constant 0.000000e+00 : f32
    %8 = vector.broadcast %cst_4 : f32 to vector<1x128xf32>
    %9 = arith.maximumf %7, %8 : vector<1x128xf32>
    %c0_5 = arith.constant 0 : index
    %c0_6 = arith.constant 0 : index
    %10 = vector.load %arg4[%c0_5, %c0_6] : memref<1x128xf32, #tpu.memory_space<vmem>>, vector<1x128xf32>
    %cst_7 = arith.constant 9.99999974E-6 : f32
    %11 = vector.broadcast %cst_7 : f32 to vector<1x128xf32>
    %12 = arith.addf %9, %11 : vector<1x128xf32>
    %13 = math.rsqrt %12 : vector<1x128xf32>
    %14 = arith.mulf %10, %13 : vector<1x128xf32>
    %c0_8 = arith.constant 0 : index
    %c0_9 = arith.constant 0 : index
    %15 = vector.load %arg5[%c0_8, %c0_9] : memref<1x128xf32, #tpu.memory_space<vmem>>, vector<1x128xf32>
    %16 = arith.mulf %2, %14 : vector<1x128xf32>
    %17 = arith.subf %15, %16 : vector<1x128xf32>
    %c0_10 = arith.constant 0 : index
    %c0_11 = arith.constant 0 : index
    %18 = vector.load %arg1[%c0_10, %c0_11] : memref<512x128xf32, #tpu.memory_space<vmem>>, vector<512x128xf32>
    %19 = vector.broadcast %14 : vector<1x128xf32> to vector<512x128xf32>
    %20 = arith.mulf %18, %19 : vector<512x128xf32>
    %21 = vector.broadcast %17 : vector<1x128xf32> to vector<512x128xf32>
    %22 = arith.addf %20, %21 : vector<512x128xf32>
    %cst_12 = arith.constant 0.000000e+00 : f32
    %23 = vector.broadcast %cst_12 : f32 to vector<512x128xf32>
    %24 = arith.maximumf %22, %23 : vector<512x128xf32>
    %c0_13 = arith.constant 0 : index
    %c0_14 = arith.constant 0 : index
    %25 = vector.load %arg6[%c0_13, %c0_14] : memref<512x128xf32, #tpu.memory_space<vmem>>, vector<512x128xf32>
    tpu.vector_store %arg6[%c0_13, %c0_14], %24 {strides = array<i32>} : memref<512x128xf32, #tpu.memory_space<vmem>>, vector<512x128xf32>,
    return
  }
  func.func @transform_0(%arg0: i32) -> (i32, i32) {
    %c0_i32 = arith.constant 0 : i32
    %c0_i32_0 = arith.constant 0 : i32
    return %arg0, %c0_i32 : i32, i32
  }
  func.func @transform_1(%arg0: i32) -> (i32, i32) {
    %c0_i32 = arith.constant 0 : i32
    %c0_i32_0 = arith.constant 0 : i32
    %c0_i32_1 = arith.constant 0 : i32
    return %c0_i32, %c0_i32_0 : i32, i32
  }
  func.func @transform_2(%arg0: i32) -> (i32, i32) {
    %c0_i32 = arith.constant 0 : i32
    %c0_i32_0 = arith.constant 0 : i32
    %c0_i32_1 = arith.constant 0 : i32
    return %c0_i32, %c0_i32_0 : i32, i32
  }
  func.func @transform_3(%arg0: i32) -> (i32, i32) {
    %c0_i32 = arith.constant 0 : i32
    %c0_i32_0 = arith.constant 0 : i32
    %c0_i32_1 = arith.constant 0 : i32
    return %c0_i32, %c0_i32_0 : i32, i32
  }
  func.func @transform_4(%arg0: i32) -> (i32, i32) {
    %c0_i32 = arith.constant 0 : i32
    %c0_i32_0 = arith.constant 0 : i32
    %c0_i32_1 = arith.constant 0 : i32
    return %c0_i32, %c0_i32_0 : i32, i32
  }
  func.func @transform_5(%arg0: i32) -> (i32, i32) {
    %c0_i32 = arith.constant 0 : i32
    %c0_i32_0 = arith.constant 0 : i32
    return %arg0, %c0_i32 : i32, i32
  }
}

</mosaic_0001>

<bundles_post_ra>
// kernel: up_conv_forward.3
= control target key start
LH: loop header
LB: loop body
LE: loop exit
PB: predicated region body
PF: predicated region fallthrough
CT: control target
= control target key end

     0   :  { %s689_s18 = smov 0   ;;  %s989_s0 = inlined_call_operand.vmem [shape: f32[2048,128], index: 0, kind: input, shape index: {}]   ;;  %s990_s1 = inlined_call_operand.vmem [shape: f32[1,128], index: 1, kind: input, shape index: {}]   ;;  %s991_s2 = inlined_call_operand.vmem [shape: f32[1,128], index: 2, kind: input, shape index: {}]   ;;  %s992_s3 = inlined_call_operand.vmem [shape: f32[1,128], index: 3, kind: input, shape index: {}]   ;;  %s993_s4 = inlined_call_operand.vmem [shape: f32[1,128], index: 4, kind: input, shape index: {}]   ;;  %s994_s5 = inlined_call_operand.vmem [shape: f32[2048,128], index: 5, kind: output, shape index: {}]  }
   0x1 LB: > { %s630_s19 = sadd.s32 4294967295, %s657_s18   ;;  %p634_p0 = scmp.ge.s32.totalorder %s657_s18, 1  ;;  %s657_s18 = sphi %s689_s18, %s15_s18  }
   0x2   : > { %p188_p1 = scmp.lt.s32.totalorder %s657_s18, 5 }
   0x4   : > { %p189_p2 = pnand %p634_p0, %p188_p1 }
   0x5   : > { %v228_v0 = vld [vmem:[%s990_s1] sm:$0x1] (!%p189_p2)  ;;  %s635_s24 = sshll.u32 (!%p189_p2), %s630_s19, 6  ;;  %v307_v8 = vlaneseq (!%p189_p2) }
   0x6   : > { %192 = sbr.rel (%p189_p2) target bundleno = 85 (0x55), region = 40  ;;  %v230_v1 = vld [vmem:[%s991_s2] sm:$0x1] (!%p189_p2)  ;;  %v229_v2 = vmul.f32 (!%p189_p2), 0.00048828125, %v228_v0  ;;  %p217_p3 = scmp.lt.s32.totalorder (!%p189_p2), %s635_s24, 255 }
   0x7   : > { %v231_v3 = vmul.f32 (!%p189_p2), 0.00048828125, %v230_v1  ;;  %v308_v9 = vshrl.u32 (!%p189_p2), %v307_v8, 7  ;;  %v235_v10 = vld [vmem:[%s992_s3] sm:$0x1] (!%p189_p2) }
   0x8   : > { %v232_v4 = vmul.f32 (!%p189_p2), %v229_v2, %v229_v2  ;;  %v239_v14 = vld [vmem:[%s993_s4] sm:$0x1] (!%p189_p2) }
   0x9   : > { %v309_v11 = vsub.s32 (!%p189_p2), 0, %v308_v9 }
   0xa   : > { %v233_v5 = vsub.f32 (!%p189_p2), %v231_v3, %v232_v4 }
   0xc   : > { %v234_v6 = vmax.f32 (!%p189_p2), %v233_v5, 0.0 }
   0xd   : > { %s996_s24 = smov (!%p217_p3, %s635_s24), 255 }
   0xe   : > { %v236_v7 = vadd.f32 1e-05, %v234_v6  ;;  %s636_s25 = sshll.u32 %s996_s24, 3 }
   0xf   : > { %s711_s28 = scalar_lea.vmem %s989_s0, %s636_s25  ;;  %s760_s10 = scalar_lea.vmem %s994_s5, %s636_s25 }
  0x10   : > { %649 = vrsqrt.f32 %v236_v7  ;;  %v242_v15 = vld [vmem:[%s711_s28] sm:$0xff]  ;;  %v243_v16 = vld [vmem:[%s711_s28 + $0x8] sm:$0xff]  ;;  %v244_v17 = vld [vmem:[%s711_s28 + $0x10] sm:$0xff] }
  0x11   : > { %v245_v18 = vld [vmem:[%s711_s28 + $0x18] sm:$0xff]  ;;  %v246_v19 = vld [vmem:[%s711_s28 + $0x20] sm:$0xff]  ;;  %v247_v22 = vld [vmem:[%s711_s28 + $0x28] sm:$0xff] }
  0x12   : > { %v248_v23 = vld [vmem:[%s711_s28 + $0x30] sm:$0xff]  ;;  %v249_v24 = vld [vmem:[%s711_s28 + $0x38] sm:$0xff]  ;;  %v250_v25 = vld [vmem:[%s711_s28 + $0x40] sm:$0xff] }
  0x13   : > { %v251_v26 = vld [vmem:[%s711_s28 + $0x48] sm:$0xff]  ;;  %v252_v27 = vld [vmem:[%s711_s28 + $0x50] sm:$0xff]  ;;  %v253_v32 = vld [vmem:[%s711_s28 + $0x58] sm:$0xff] }
  0x14   : > { %v254_v33 = vld [vmem:[%s711_s28 + $0x60] sm:$0xff]  ;;  %v255_v34 = vld [vmem:[%s711_s28 + $0x68] sm:$0xff]  ;;  %v256_v59 = vld [vmem:[%s711_s28 + $0x70] sm:$0xff] }
  0x15   : > { %v257_v60 = vld [vmem:[%s711_s28 + $0x78] sm:$0xff]  ;;  %v258_v5 = vld [vmem:[%s711_s28 + $0x80] sm:$0xff] }
  0x1a   : > { %v650_v12 = vpop.eup %649 }
  0x1b   : > { %v238_v13 = vmul.f32 %v650_v12, %v235_v10  ;;  %v259_v10 = vld [vmem:[%s711_s28 + $0x88] sm:$0xff]  ;;  %v261_v12 = vld [vmem:[%s711_s28 + $0x98] sm:$0xff] }
  0x1d   : > { %v240_v20 = vmul.f32 %v238_v13, %v229_v2  ;;  %v724_v21 = vrot.slane %v238_v13, %v309_v11 }
  0x1f   : > { %v241_v28 = vsub.f32 %v239_v14, %v240_v20  ;;  %v312_v29 = vmul.f32 %v724_v21, %v242_v15  ;;  %v313_v30 = vmul.f32 %v724_v21, %v243_v16  ;;  %v314_v31 = vmul.f32 %v724_v21, %v244_v17  ;;  %v262_v17 = vld [vmem:[%s711_s28 + $0xa0] sm:$0xff] }
  0x20   : > { %v315_v35 = vmul.f32 %v724_v21, %v245_v18  ;;  %v316_v36 = vmul.f32 %v724_v21, %v246_v19  ;;  %v317_v37 = vmul.f32 %v724_v21, %v247_v22  ;;  %v318_v38 = vmul.f32 %v724_v21, %v248_v23  ;;  %v263_v18 = vld [vmem:[%s711_s28 + $0xa8] sm:$0xff] }
  0x21   : > { %v742_v39 = vrot.slane %v241_v28, %v309_v11  ;;  %v319_v40 = vmul.f32 %v724_v21, %v249_v24  ;;  %v320_v41 = vmul.f32 %v724_v21, %v250_v25  ;;  %v321_v42 = vmul.f32 %v724_v21, %v251_v26  ;;  %v260_v11 = vld [vmem:[%s711_s28 + $0x90] sm:$0xff] }
  0x22   : > { %v322_v43 = vmul.f32 %v724_v21, %v252_v27  ;;  %v323_v44 = vmul.f32 %v724_v21, %v253_v32  ;;  %v324_v45 = vmul.f32 %v724_v21, %v254_v33  ;;  %v325_v46 = vmul.f32 %v724_v21, %v255_v34  ;;  %v264_v28 = vld [vmem:[%s711_s28 + $0xb0] sm:$0xff] }
  0x23   : > { %v382_v47 = vadd.f32 %v742_v39, %v312_v29  ;;  %v383_v48 = vadd.f32 %v742_v39, %v313_v30  ;;  %v384_v49 = vadd.f32 %v742_v39, %v314_v31  ;;  %v385_v50 = vadd.f32 %v742_v39, %v315_v35  ;;  %v265_v29 = vld [vmem:[%s711_s28 + $0xb8] sm:$0xff] }
  0x24   : > { %v386_v51 = vadd.f32 %v742_v39, %v316_v36  ;;  %v387_v52 = vadd.f32 %v742_v39, %v317_v37  ;;  %v388_v53 = vadd.f32 %v742_v39, %v318_v38  ;;  %v389_v54 = vadd.f32 %v742_v39, %v319_v40  ;;  %v266_v38 = vld [vmem:[%s711_s28 + $0xc0] sm:$0xff] }
  0x25   : > { %v446_v55 = vmax.f32 %v382_v47, 0.0  ;;  %v447_v56 = vmax.f32 %v383_v48, 0.0  ;;  %v448_v57 = vmax.f32 %v384_v49, 0.0  ;;  %v449_v58 = vmax.f32 %v385_v50, 0.0 }
  0x26   : > { %v450_v61 = vmax.f32 %v386_v51, 0.0  ;;  %v451_v62 = vmax.f32 %v387_v52, 0.0  ;;  %v452_v63 = vmax.f32 %v388_v53, 0.0  ;;  %v453_v0 = vmax.f32 %v389_v54, 0.0  ;;  %v270_v51 = vld [vmem:[%s711_s28 + $0xe0] sm:$0xff]  ;;  %v271_v52 = vld [vmem:[%s711_s28 + $0xe8] sm:$0xff] }
  0x27   : > { %510 = vst [vmem:[%s760_s10] sm:$0xff] %v446_v55  ;;  %511 = vst [vmem:[%s760_s10 + $0x8] sm:$0xff] %v447_v56  ;;  %v390_v1 = vadd.f32 %v742_v39, %v320_v41  ;;  %v391_v2 = vadd.f32 %v742_v39, %v321_v42  ;;  %v392_v3 = vadd.f32 %v742_v39, %v322_v43 }
  0x28   : > { %512 = vst [vmem:[%s760_s10 + $0x10] sm:$0xff] %v448_v57  ;;  %513 = vst [vmem:[%s760_s10 + $0x18] sm:$0xff] %v449_v58  ;;  %v393_v4 = vadd.f32 %v742_v39, %v323_v44  ;;  %v394_v6 = vadd.f32 %v742_v39, %v324_v45  ;;  %v395_v7 = vadd.f32 %v742_v39, %v325_v46  ;;  %v267_v44 = vld [vmem:[%s711_s28 + $0xc8] sm:$0xff]  ;;  %v268_v45 = vld [vmem:[%s711_s28 + $0xd0] sm:$0xff] }
  0x29   : > { %514 = vst [vmem:[%s760_s10 + $0x20] sm:$0xff] %v450_v61  ;;  %515 = vst [vmem:[%s760_s10 + $0x28] sm:$0xff] %v451_v62  ;;  %v326_v8 = vmul.f32 %v724_v21, %v256_v59  ;;  %v327_v9 = vmul.f32 %v724_v21, %v257_v60  ;;  %v454_v13 = vmax.f32 %v390_v1, 0.0  ;;  %v455_v14 = vmax.f32 %v391_v2, 0.0  ;;  %v269_v46 = vld [vmem:[%s711_s28 + $0xd8] sm:$0xff]  ;;  %v272_v61 = vld [vmem:[%s711_s28 + $0xf0] sm:$0xff] }
  0x2a   : > { %516 = vst [vmem:[%s760_s10 + $0x30] sm:$0xff] %v452_v63  ;;  %517 = vst [vmem:[%s760_s10 + $0x38] sm:$0xff] %v453_v0  ;;  %v456_v15 = vmax.f32 %v392_v3, 0.0  ;;  %v457_v16 = vmax.f32 %v393_v4, 0.0  ;;  %v458_v19 = vmax.f32 %v394_v6, 0.0  ;;  %v459_v20 = vmax.f32 %v395_v7, 0.0 }
  0x2b   : > { %v396_v22 = vadd.f32 %v742_v39, %v326_v8  ;;  %v397_v23 = vadd.f32 %v742_v39, %v327_v9  ;;  %518 = vst [vmem:[%s760_s10 + $0x40] sm:$0xff] %v454_v13  ;;  %519 = vst [vmem:[%s760_s10 + $0x48] sm:$0xff] %v455_v14  ;;  %v328_v24 = vmul.f32 %v724_v21, %v258_v5  ;;  %v273_v62 = vld [vmem:[%s711_s28 + $0xf8] sm:$0xff]  ;;  %v274_v7 = vld [vmem:[%s711_s28 + $0x100] sm:$0xff] }
  0x2c   : > { %520 = vst [vmem:[%s760_s10 + $0x50] sm:$0xff] %v456_v15  ;;  %521 = vst [vmem:[%s760_s10 + $0x58] sm:$0xff] %v457_v16  ;;  %v329_v25 = vmul.f32 %v724_v21, %v259_v10  ;;  %v330_v26 = vmul.f32 %v724_v21, %v260_v11  ;;  %v331_v27 = vmul.f32 %v724_v21, %v261_v12  ;;  %v275_v12 = vld [vmem:[%s711_s28 + $0x108] sm:$0xff]  ;;  %v276_v13 = vld [vmem:[%s711_s28 + $0x110] sm:$0xff] }
  0x2d   : > { %522 = vst [vmem:[%s760_s10 + $0x60] sm:$0xff] %v458_v19  ;;  %523 = vst [vmem:[%s760_s10 + $0x68] sm:$0xff] %v459_v20  ;;  %v460_v30 = vmax.f32 %v396_v22, 0.0  ;;  %v461_v31 = vmax.f32 %v397_v23, 0.0  ;;  %v332_v32 = vmul.f32 %v724_v21, %v262_v17  ;;  %v333_v33 = vmul.f32 %v724_v21, %v263_v18  ;;  %v277_v14 = vld [vmem:[%s711_s28 + $0x118] sm:$0xff]  ;;  %v278_v19 = vld [vmem:[%s711_s28 + $0x120] sm:$0xff] }
  0x2e   : > { %v398_v34 = vadd.f32 %v742_v39, %v328_v24  ;;  %v399_v35 = vadd.f32 %v742_v39, %v329_v25  ;;  %v400_v36 = vadd.f32 %v742_v39, %v330_v26  ;;  %v401_v37 = vadd.f32 %v742_v39, %v331_v27  ;;  %v279_v20 = vld [vmem:[%s711_s28 + $0x128] sm:$0xff] }
  0x2f   : > { %524 = vst [vmem:[%s760_s10 + $0x70] sm:$0xff] %v460_v30  ;;  %525 = vst [vmem:[%s760_s10 + $0x78] sm:$0xff] %v461_v31  ;;  %v402_v40 = vadd.f32 %v742_v39, %v332_v32  ;;  %v403_v41 = vadd.f32 %v742_v39, %v333_v33  ;;  %v334_v42 = vmul.f32 %v724_v21, %v264_v28  ;;  %v280_v30 = vld [vmem:[%s711_s28 + $0x130] sm:$0xff]  ;;  %v281_v31 = vld [vmem:[%s711_s28 + $0x138] sm:$0xff] }
  0x30   : > { %v335_v43 = vmul.f32 %v724_v21, %v265_v29  ;;  %v462_v47 = vmax.f32 %v398_v34, 0.0  ;;  %v463_v48 = vmax.f32 %v399_v35, 0.0  ;;  %v464_v49 = vmax.f32 %v400_v36, 0.0 }
  0x31   : > { %v465_v50 = vmax.f32 %v401_v37, 0.0  ;;  %v466_v53 = vmax.f32 %v402_v40, 0.0  ;;  %v467_v54 = vmax.f32 %v403_v41, 0.0  ;;  %v404_v55 = vadd.f32 %v742_v39, %v334_v42  ;;  %v282_v41 = vld [vmem:[%s711_s28 + $0x140] sm:$0xff] }
  0x32   : > { %v405_v56 = vadd.f32 %v742_v39, %v335_v43  ;;  %526 = vst [vmem:[%s760_s10 + $0x80] sm:$0xff] %v462_v47  ;;  %527 = vst [vmem:[%s760_s10 + $0x88] sm:$0xff] %v463_v48  ;;  %v336_v57 = vmul.f32 %v724_v21, %v266_v38  ;;  %v337_v58 = vmul.f32 %v724_v21, %v267_v44  ;;  %v284_v47 = vld [vmem:[%s711_s28 + $0x150] sm:$0xff]  ;;  %v285_v48 = vld [vmem:[%s711_s28 + $0x158] sm:$0xff] }
  0x33   : > { %528 = vst [vmem:[%s760_s10 + $0x90] sm:$0xff] %v464_v49  ;;  %529 = vst [vmem:[%s760_s10 + $0x98] sm:$0xff] %v465_v50  ;;  %v338_v59 = vmul.f32 %v724_v21, %v268_v45  ;;  %v339_v60 = vmul.f32 %v724_v21, %v269_v46  ;;  %v468_v63 = vmax.f32 %v404_v55, 0.0  ;;  %v340_v1 = vmul.f32 %v724_v21, %v270_v51  ;;  %v283_v46 = vld [vmem:[%s711_s28 + $0x148] sm:$0xff] }
  0x34   : > { %530 = vst [vmem:[%s760_s10 + $0xa0] sm:$0xff] %v466_v53  ;;  %531 = vst [vmem:[%s760_s10 + $0xa8] sm:$0xff] %v467_v54  ;;  %v469_v0 = vmax.f32 %v405_v56, 0.0  ;;  %v341_v2 = vmul.f32 %v724_v21, %v271_v52  ;;  %v406_v3 = vadd.f32 %v742_v39, %v336_v57  ;;  %v407_v4 = vadd.f32 %v742_v39, %v337_v58  ;;  %v286_v53 = vld [vmem:[%s711_s28 + $0x160] sm:$0xff]  ;;  %v287_v54 = vld [vmem:[%s711_s28 + $0x168] sm:$0xff] }
  0x35   : > { %v408_v5 = vadd.f32 %v742_v39, %v338_v59  ;;  %v409_v6 = vadd.f32 %v742_v39, %v339_v60  ;;  %532 = vst [vmem:[%s760_s10 + $0xb0] sm:$0xff] %v468_v63  ;;  %v410_v8 = vadd.f32 %v742_v39, %v340_v1  ;;  %v342_v10 = vmul.f32 %v724_v21, %v272_v61  ;;  %v288_v63 = vld [vmem:[%s711_s28 + $0x170] sm:$0xff] }
  0x36   : > { %533 = vst [vmem:[%s760_s10 + $0xb8] sm:$0xff] %v469_v0  ;;  %v411_v9 = vadd.f32 %v742_v39, %v341_v2  ;;  %v343_v11 = vmul.f32 %v724_v21, %v273_v62  ;;  %v470_v15 = vmax.f32 %v406_v3, 0.0  ;;  %v471_v16 = vmax.f32 %v407_v4, 0.0  ;;  %v289_v0 = vld [vmem:[%s711_s28 + $0x178] sm:$0xff] }
  0x37   : > { %v472_v17 = vmax.f32 %v408_v5, 0.0  ;;  %v473_v18 = vmax.f32 %v409_v6, 0.0  ;;  %v474_v22 = vmax.f32 %v410_v8, 0.0  ;;  %v412_v24 = vadd.f32 %v742_v39, %v342_v10 }
  0x38   : > { %v475_v23 = vmax.f32 %v411_v9, 0.0  ;;  %v413_v25 = vadd.f32 %v742_v39, %v343_v11  ;;  %534 = vst [vmem:[%s760_s10 + $0xc0] sm:$0xff] %v470_v15  ;;  %535 = vst [vmem:[%s760_s10 + $0xc8] sm:$0xff] %v471_v16  ;;  %v344_v26 = vmul.f32 %v724_v21, %v274_v7  ;;  %v345_v27 = vmul.f32 %v724_v21, %v275_v12  ;;  %v290_v9 = vld [vmem:[%s711_s28 + $0x180] sm:$0xff]  ;;  %v292_v15 = vld [vmem:[%s711_s28 + $0x190] sm:$0xff] }
  0x39   : > { %536 = vst [vmem:[%s760_s10 + $0xd0] sm:$0xff] %v472_v17  ;;  %537 = vst [vmem:[%s760_s10 + $0xd8] sm:$0xff] %v473_v18  ;;  %v346_v28 = vmul.f32 %v724_v21, %v276_v13  ;;  %v347_v29 = vmul.f32 %v724_v21, %v277_v14  ;;  %v476_v32 = vmax.f32 %v412_v24, 0.0  ;;  %v348_v34 = vmul.f32 %v724_v21, %v278_v19  ;;  %v291_v14 = vld [vmem:[%s711_s28 + $0x188] sm:$0xff]  ;;  %v293_v16 = vld [vmem:[%s711_s28 + $0x198] sm:$0xff] }
  0x3a   : > { %538 = vst [vmem:[%s760_s10 + $0xe0] sm:$0xff] %v474_v22  ;;  %539 = vst [vmem:[%s760_s10 + $0xe8] sm:$0xff] %v475_v23  ;;  %v477_v33 = vmax.f32 %v413_v25, 0.0  ;;  %v349_v35 = vmul.f32 %v724_v21, %v279_v20  ;;  %v414_v36 = vadd.f32 %v742_v39, %v344_v26  ;;  %v415_v37 = vadd.f32 %v742_v39, %v345_v27  ;;  %v294_v22 = vld [vmem:[%s711_s28 + $0x1a0] sm:$0xff]  ;;  %v295_v23 = vld [vmem:[%s711_s28 + $0x1a8] sm:$0xff] }
  0x3b   : > { %v416_v38 = vadd.f32 %v742_v39, %v346_v28  ;;  %v417_v40 = vadd.f32 %v742_v39, %v347_v29  ;;  %540 = vst [vmem:[%s760_s10 + $0xf0] sm:$0xff] %v476_v32  ;;  %v418_v42 = vadd.f32 %v742_v39, %v348_v34  ;;  %v350_v44 = vmul.f32 %v724_v21, %v280_v30  ;;  %v296_v32 = vld [vmem:[%s711_s28 + $0x1b0] sm:$0xff] }
  0x3c   : > { %541 = vst [vmem:[%s760_s10 + $0xf8] sm:$0xff] %v477_v33  ;;  %v419_v43 = vadd.f32 %v742_v39, %v349_v35  ;;  %v351_v45 = vmul.f32 %v724_v21, %v281_v31  ;;  %v478_v49 = vmax.f32 %v414_v36, 0.0  ;;  %v479_v50 = vmax.f32 %v415_v37, 0.0  ;;  %v297_v33 = vld [vmem:[%s711_s28 + $0x1b8] sm:$0xff] }
  0x3d   : > { %v480_v51 = vmax.f32 %v416_v38, 0.0  ;;  %v481_v52 = vmax.f32 %v417_v40, 0.0  ;;  %v482_v55 = vmax.f32 %v418_v42, 0.0  ;;  %v420_v57 = vadd.f32 %v742_v39, %v350_v44 }
  0x3e   : > { %v483_v56 = vmax.f32 %v419_v43, 0.0  ;;  %v421_v58 = vadd.f32 %v742_v39, %v351_v45  ;;  %542 = vst [vmem:[%s760_s10 + $0x100] sm:$0xff] %v478_v49  ;;  %543 = vst [vmem:[%s760_s10 + $0x108] sm:$0xff] %v479_v50  ;;  %v352_v59 = vmul.f32 %v724_v21, %v282_v41  ;;  %v353_v60 = vmul.f32 %v724_v21, %v283_v46  ;;  %v298_v43 = vld [vmem:[%s711_s28 + $0x1c0] sm:$0xff]  ;;  %v300_v49 = vld [vmem:[%s711_s28 + $0x1d0] sm:$0xff] }
  0x3f   : > { %544 = vst [vmem:[%s760_s10 + $0x110] sm:$0xff] %v480_v51  ;;  %545 = vst [vmem:[%s760_s10 + $0x118] sm:$0xff] %v481_v52  ;;  %v354_v61 = vmul.f32 %v724_v21, %v284_v47  ;;  %v355_v62 = vmul.f32 %v724_v21, %v285_v48  ;;  %v484_v1 = vmax.f32 %v420_v57, 0.0  ;;  %v356_v3 = vmul.f32 %v724_v21, %v286_v53  ;;  %v299_v48 = vld [vmem:[%s711_s28 + $0x1c8] sm:$0xff]  ;;  %v301_v50 = vld [vmem:[%s711_s28 + $0x1d8] sm:$0xff] }
  0x40   : > { %546 = vst [vmem:[%s760_s10 + $0x120] sm:$0xff] %v482_v55  ;;  %547 = vst [vmem:[%s760_s10 + $0x128] sm:$0xff] %v483_v56  ;;  %v485_v2 = vmax.f32 %v421_v58, 0.0  ;;  %v357_v4 = vmul.f32 %v724_v21, %v287_v54  ;;  %v422_v5 = vadd.f32 %v742_v39, %v352_v59  ;;  %v423_v6 = vadd.f32 %v742_v39, %v353_v60  ;;  %v302_v55 = vld [vmem:[%s711_s28 + $0x1e0] sm:$0xff]  ;;  %v303_v56 = vld [vmem:[%s711_s28 + $0x1e8] sm:$0xff] }
  0x41   : > { %v424_v7 = vadd.f32 %v742_v39, %v354_v61  ;;  %v425_v8 = vadd.f32 %v742_v39, %v355_v62  ;;  %548 = vst [vmem:[%s760_s10 + $0x130] sm:$0xff] %v484_v1  ;;  %v426_v10 = vadd.f32 %v742_v39, %v356_v3  ;;  %v358_v12 = vmul.f32 %v724_v21, %v288_v63  ;;  %v304_v1 = vld [vmem:[%s711_s28 + $0x1f0] sm:$0xff] }
  0x42   : > { %549 = vst [vmem:[%s760_s10 + $0x138] sm:$0xff] %v485_v2  ;;  %v427_v11 = vadd.f32 %v742_v39, %v357_v4  ;;  %v359_v13 = vmul.f32 %v724_v21, %v289_v0  ;;  %v486_v17 = vmax.f32 %v422_v5, 0.0  ;;  %v487_v18 = vmax.f32 %v423_v6, 0.0  ;;  %v305_v2 = vld [vmem:[%s711_s28 + $0x1f8] sm:$0xff] }
  0x43   : > { %v488_v19 = vmax.f32 %v424_v7, 0.0  ;;  %v489_v20 = vmax.f32 %v425_v8, 0.0  ;;  %v490_v24 = vmax.f32 %v426_v10, 0.0  ;;  %v428_v26 = vadd.f32 %v742_v39, %v358_v12 }
  0x44   : > { %v491_v25 = vmax.f32 %v427_v11, 0.0  ;;  %v429_v27 = vadd.f32 %v742_v39, %v359_v13  ;;  %550 = vst [vmem:[%s760_s10 + $0x140] sm:$0xff] %v486_v17  ;;  %551 = vst [vmem:[%s760_s10 + $0x148] sm:$0xff] %v487_v18  ;;  %v360_v28 = vmul.f32 %v724_v21, %v290_v9  ;;  %v361_v29 = vmul.f32 %v724_v21, %v291_v14 }
  0x45   : > { %552 = vst [vmem:[%s760_s10 + $0x150] sm:$0xff] %v488_v19  ;;  %553 = vst [vmem:[%s760_s10 + $0x158] sm:$0xff] %v489_v20  ;;  %v362_v30 = vmul.f32 %v724_v21, %v292_v15  ;;  %v363_v31 = vmul.f32 %v724_v21, %v293_v16  ;;  %v492_v34 = vmax.f32 %v428_v26, 0.0  ;;  %v364_v36 = vmul.f32 %v724_v21, %v294_v22 }
  0x46   : > { %554 = vst [vmem:[%s760_s10 + $0x160] sm:$0xff] %v490_v24  ;;  %555 = vst [vmem:[%s760_s10 + $0x168] sm:$0xff] %v491_v25  ;;  %v493_v35 = vmax.f32 %v429_v27, 0.0  ;;  %v365_v37 = vmul.f32 %v724_v21, %v295_v23  ;;  %v430_v38 = vadd.f32 %v742_v39, %v360_v28  ;;  %v431_v40 = vadd.f32 %v742_v39, %v361_v29 }
  0x47   : > { %v432_v41 = vadd.f32 %v742_v39, %v362_v30  ;;  %v433_v42 = vadd.f32 %v742_v39, %v363_v31  ;;  %556 = vst [vmem:[%s760_s10 + $0x170] sm:$0xff] %v492_v34  ;;  %v434_v44 = vadd.f32 %v742_v39, %v364_v36  ;;  %v366_v46 = vmul.f32 %v724_v21, %v296_v32 }
  0x48   : > { %557 = vst [vmem:[%s760_s10 + $0x178] sm:$0xff] %v493_v35  ;;  %v435_v45 = vadd.f32 %v742_v39, %v365_v37  ;;  %v367_v47 = vmul.f32 %v724_v21, %v297_v33  ;;  %v494_v51 = vmax.f32 %v430_v38, 0.0  ;;  %v495_v52 = vmax.f32 %v431_v40, 0.0 }
  0x49   : > { %v496_v53 = vmax.f32 %v432_v41, 0.0  ;;  %v497_v54 = vmax.f32 %v433_v42, 0.0  ;;  %v498_v57 = vmax.f32 %v434_v44, 0.0  ;;  %v436_v59 = vadd.f32 %v742_v39, %v366_v46 }
  0x4a   : > { %v499_v58 = vmax.f32 %v435_v45, 0.0  ;;  %v437_v60 = vadd.f32 %v742_v39, %v367_v47  ;;  %558 = vst [vmem:[%s760_s10 + $0x180] sm:$0xff] %v494_v51  ;;  %559 = vst [vmem:[%s760_s10 + $0x188] sm:$0xff] %v495_v52  ;;  %v368_v61 = vmul.f32 %v724_v21, %v298_v43  ;;  %v369_v62 = vmul.f32 %v724_v21, %v299_v48 }
  0x4b   : > { %560 = vst [vmem:[%s760_s10 + $0x190] sm:$0xff] %v496_v53  ;;  %561 = vst [vmem:[%s760_s10 + $0x198] sm:$0xff] %v497_v54  ;;  %v370_v63 = vmul.f32 %v724_v21, %v300_v49  ;;  %v371_v0 = vmul.f32 %v724_v21, %v301_v50  ;;  %v500_v3 = vmax.f32 %v436_v59, 0.0  ;;  %v372_v5 = vmul.f32 %v724_v21, %v302_v55 }
  0x4c   : > { %562 = vst [vmem:[%s760_s10 + $0x1a0] sm:$0xff] %v498_v57  ;;  %563 = vst [vmem:[%s760_s10 + $0x1a8] sm:$0xff] %v499_v58  ;;  %v501_v4 = vmax.f32 %v437_v60, 0.0  ;;  %v373_v6 = vmul.f32 %v724_v21, %v303_v56  ;;  %v438_v7 = vadd.f32 %v742_v39, %v368_v61  ;;  %v439_v8 = vadd.f32 %v742_v39, %v369_v62 }
  0x4d   : > { %v440_v9 = vadd.f32 %v742_v39, %v370_v63  ;;  %v441_v10 = vadd.f32 %v742_v39, %v371_v0  ;;  %564 = vst [vmem:[%s760_s10 + $0x1b0] sm:$0xff] %v500_v3  ;;  %v442_v11 = vadd.f32 %v742_v39, %v372_v5  ;;  %v374_v13 = vmul.f32 %v724_v21, %v304_v1 }
  0x4e   : > { %565 = vst [vmem:[%s760_s10 + $0x1b8] sm:$0xff] %v501_v4  ;;  %v443_v12 = vadd.f32 %v742_v39, %v373_v6  ;;  %v375_v14 = vmul.f32 %v724_v21, %v305_v2  ;;  %v502_v15 = vmax.f32 %v438_v7, 0.0  ;;  %v503_v16 = vmax.f32 %v439_v8, 0.0 }
  0x4f   : > { %v504_v17 = vmax.f32 %v440_v9, 0.0  ;;  %v505_v18 = vmax.f32 %v441_v10, 0.0  ;;  %v506_v19 = vmax.f32 %v442_v11, 0.0  ;;  %v444_v22 = vadd.f32 %v742_v39, %v374_v13 }
  0x50   : > { %v507_v20 = vmax.f32 %v443_v12, 0.0  ;;  %v445_v23 = vadd.f32 %v742_v39, %v375_v14  ;;  %566 = vst [vmem:[%s760_s10 + $0x1c0] sm:$0xff] %v502_v15  ;;  %567 = vst [vmem:[%s760_s10 + $0x1c8] sm:$0xff] %v503_v16 }
  0x51   : > { %568 = vst [vmem:[%s760_s10 + $0x1d0] sm:$0xff] %v504_v17  ;;  %569 = vst [vmem:[%s760_s10 + $0x1d8] sm:$0xff] %v505_v18  ;;  %v508_v24 = vmax.f32 %v444_v22, 0.0 }
  0x52   : > { %570 = vst [vmem:[%s760_s10 + $0x1e0] sm:$0xff] %v506_v19  ;;  %571 = vst [vmem:[%s760_s10 + $0x1e8] sm:$0xff] %v507_v20  ;;  %v509_v21 = vmax.f32 %v445_v23, 0.0 }
  0x53   : > { %572 = vst [vmem:[%s760_s10 + $0x1f0] sm:$0xff] %v508_v24 }
  0x54   : > { %573 = vst [vmem:[%s760_s10 + $0x1f8] sm:$0xff] %v509_v21 }
  0x55 PF: > { %s15_s18 = sadd.s32 1, %s657_s18  }
  0x56   : > { %p12_p4 = scmp.ge.s32.totalorder %s15_s18, 6  }
  0x58   :  { %14 = sbr.rel (!%p12_p4) target bundleno = 1 (0x1), region = 70 }

// kernel: up_conv_forward.2
= control target key start
LH: loop header
LB: loop body
LE: loop exit
PB: predicated region body
PF: predicated region fallthrough
CT: control target
= control target key end

     0   :  { %s9011_s15 = smov 0   ;;  %s9013_s16 = smov 0   ;;  %s10348_s0 = inlined_call_operand.vmem [shape: f32[2,34,34,4], index: 0, kind: input, shape index: {}]   ;;  %s10349_s1 = inlined_call_operand.vmem [shape: bf16[9,4,128], index: 1, kind: input, shape index: {}]   ;;  %s10350_s2 = inlined_call_operand.vmem [shape: f32[2048,128], index: 2, kind: output, shape index: {0}]   ;;  %s10351_s3 = inlined_call_operand.vmem [shape: f32[4,1,128], index: 3, kind: output, shape index: {1}]   ;;  %s10352_s4 = inlined_call_operand.vmem [shape: f32[4,1,128], index: 4, kind: output, shape index: {2}]  }
   0x1   :  { %s9015_s17 = smov 0   ;;  %s9017_s18 = smov 0  }
   0x2   :  { %s9019_s19 = smov 0  }
   0x3 LB: > { %s24_s20 = sadd.s32 1, %s8976_s17  ;;  %s27_s21 = sadd.s32 1, %s8980_s18  ;;  %s8984_s19 = sphi %s9019_s19, %s15_s19   ;;  %s8980_s18 = sphi %s9017_s18, %s10392_s18   ;;  %s8976_s17 = sphi %s9015_s17, %s10391_s17   ;;  %s8972_s16 = sphi %s9013_s16, %s10390_s16   ;;  %s8968_s15 = sphi %s9011_s15, %s10389_s15  }
   0x4   : > { %p25_p0 = scmp.ge.s32.totalorder %s24_s20, 2  ;;  %p6667_p1 = scmp.ge.s32.totalorder %s8984_s19, 1 }
   0x5   : > { %p191_p2 = scmp.lt.s32.totalorder %s8984_s19, 5 }
   0x6   : > { %s10394_s20 = smov (%p25_p0, %s24_s20), 0  ;;  %s10396_s21 = smov (!%p25_p0, %s27_s21), %s8980_s18 }
   0x7   : > { %p192_p3 = pnand %p6667_p1, %p191_p2  ;;  %p29_p4 = scmp.ge.s32.totalorder %s10396_s21, 2 }
   0x9   : > { %s10398_s21 = smov (%p29_p4, %s10396_s21), 0  ;;  %195 = sbr.rel (%p192_p3) target bundleno = 835 (0x343), region = 28 }
  0x10   : > { %v358_v0 = vld [vmem:[%s10349_s1] sm:$0x3]  ;;  %vm456_vm0 = vcmask 1041408   ;;  %v9051_v1 = vld [vmem:[%s10349_s1 + $0x8] sm:$0x3]  ;;  %p229_p5 = scmp.lt.s32.totalorder %s8972_s16, 1 }
  0x11   : > { %8895 = vmatprep.subr.msk.bf16.mxu1 %vm456_vm0, %v358_v0  ;;  %v458_v2 = vsel %vm456_vm0, %v358_v0, 0  ;;  %8899 = vmatprep.subr.msk.bf16.mxu0 %vm456_vm0, %v9051_v1  ;;  %v9060_v3 = vsel %vm456_vm0, %v9051_v1, 0  ;;  %v6708_v4 = vld [vmem:[%s10349_s1 + $0x2] sm:$0x3]  ;;  %v7034_v5 = vld [vmem:[%s10349_s1 + $0xa] sm:$0x3] }
  0x12   : > { %10365 = vst [vmem:[#allocation2_spill] sm:$0xff] %v9060_v3  ;;  %7660 = vmatpush3.bf16.msra.mxu1 %v458_v2  ;;  %7924 = vmatpush3.bf16.msra.mxu0 %v9060_v3  ;;  %s230_s28 = scalar_select %p229_p5, %s8972_s16, 1  ;;  %vm359_vm1 = vcmask 31744   ;;  %v1008_v15 = vsel %vm456_vm0, %v6708_v4, 0  ;;  %v3723_v25 = vsel %vm456_vm0, %v7034_v5, 0 }
  0x13   : > { %s6675_s5 = smul.u32 640, %s8968_s15  ;;  %8896 = vmatprep.subr.msk.bf16.mxu1 %vm456_vm0, %v6708_v4  ;;  %8901 = vmatprep.subr.msk.bf16.mxu0 %vm456_vm0, %v7034_v5  ;;  %v9105_v26 = vld [vmem:[%s10349_s1 + $0xc] sm:$0x3]  ;;  %v9110_v27 = vld [vmem:[%s10349_s1 + $0x4] sm:$0x3] }
  0x14   : > { %s8905_s6 = smul.u32 1360, %s230_s28  ;;  %s6669_s28 = sshll.u32 %s8972_s16, 1 }
  0x15   : > { %s10212_s29 = sadd.s32 %s8968_s15, %s6669_s28 }
  0x16   : > { %s233_s9 = scalar_lea.vmem %s10348_s0, %s8905_s6  ;;  %s6670_s30 = sshll.u32 %s10212_s29, 6 }
  0x17   : > { %s9076_s10 = scalar_lea.vmem %s233_s9, %s6675_s5  ;;  %p237_p6 = scmp.lt.s32.totalorder %s6670_s30, 255 }
  0x18   : > { %v262_v6 = vld [vmem:[%s9076_s10] sm:$0xff]  ;;  %v263_v7 = vld [vmem:[%s9076_s10 + $0x8] sm:$0xff]  ;;  %v6874_v10 = vld [vmem:[%s9076_s10 + $0x31] sm:$0xff]  ;;  %p246_p7 = scmp.lt.s32.totalorder %s10212_s29, 3 }
  0x19   : > { %v6873_v8 = vld [vmem:[%s9076_s10 + $0x29] sm:$0xff]  ;;  %v326_v9 = vpack.c.bf16 %v263_v7, %v262_v6  ;;  %v265_v12 = vld [vmem:[%s9076_s10 + $0x18] sm:$0xff]  ;;  %v6876_v17 = vld [vmem:[%s9076_s10 + $0x41] sm:$0xff]  ;;  %s10400_s30 = smov (!%p237_p6, %s6670_s30), 255 }
  0x1a   : > { %v264_v11 = vld [vmem:[%s9076_s10 + $0x10] sm:$0xff]  ;;  %v9084_v13 = vpack.c.bf16 %v6874_v10, %v6873_v8  ;;  %v6875_v16 = vld [vmem:[%s9076_s10 + $0x39] sm:$0xff]  ;;  %v266_v18 = vld [vmem:[%s9076_s10 + $0x28] sm:$0xff]  ;;  %s6671_s15 = sshll.u32 %s10400_s30, 3  ;;  %s10402_s29 = smov (!%p246_p7, %s10212_s29), 3 }
  0x1b   : > { %v327_v14 = vpack.c.bf16 %v265_v12, %v264_v11  ;;  %7661 = vmatprep.mubr.msk.bf16.mxu1 %vm359_vm1, %v326_v9  ;;  %v9091_v19 = vpack.c.bf16 %v6876_v17, %v6875_v16  ;;  %v267_v20 = vld [vmem:[%s9076_s10 + $0x30] sm:$0xff]  ;;  %v6878_v22 = vld [vmem:[%s9076_s10 + $0x59] sm:$0xff]  ;;  %v6879_v30 = vld [vmem:[%s9076_s10 + $0x61] sm:$0xff]  ;;  %s10234_s6 = scalar_lea.vmem %s10350_s2, %s6671_s15  ;;  %s248_s9 = scalar_lea.vmem %s10351_s3, %s10402_s29 }
  0x1c   : > { %v6877_v21 = vld [vmem:[%s9076_s10 + $0x51] sm:$0xff]  ;;  %7925 = vmatprep.mubr.msk.bf16.mxu0 %vm359_vm1, %v9084_v13  ;;  %v328_v23 = vpack.c.bf16 %v267_v20, %v266_v18  ;;  %v269_v29 = vld [vmem:[%s9076_s10 + $0x40] sm:$0xff]  ;;  %v6880_v31 = vld [vmem:[%s9076_s10 + $0x69] sm:$0xff]  ;;  %s255_s12 = scalar_lea.vmem %s10352_s4, %s10402_s29 }
  0x1d   : > { %7662 = vmatmul.mubr.msk.bf16.vlgmr.msra.gmra.mrb[0].mxu1 %vm359_vm1, %v327_v14  ;;  %v9099_v24 = vpack.c.bf16 %v6878_v22, %v6877_v21  ;;  %7926 = vmatmul.mubr.msk.bf16.vlgmr.msra.gmra.mrb[0].mxu0 %vm359_vm1, %v9091_v19  ;;  %v268_v28 = vld [vmem:[%s9076_s10 + $0x38] sm:$0xff]  ;;  %v270_v32 = vld [vmem:[%s9076_s10 + $0x50] sm:$0xff]  ;;  %v6882_v35 = vld [vmem:[%s9076_s10 + $0x81] sm:$0xff]  ;;  %v9129_v37 = vpack.c.bf16 %v6880_v31, %v6879_v30 }
  0x1e   : > { %7726 = vmatpush3.bf16.msra.mxu1 %v1008_v15  ;;  %7665 = vmatprep.mubr.msk.bf16.mxu1 %vm359_vm1, %v328_v23  ;;  %v271_v33 = vld [vmem:[%s9076_s10 + $0x58] sm:$0xff]  ;;  %v329_v36 = vpack.c.bf16 %v269_v29, %v268_v28  ;;  %v272_v40 = vld [vmem:[%s9076_s10 + $0x60] sm:$0xff]  ;;  %v273_v41 = vld [vmem:[%s9076_s10 + $0x68] sm:$0xff] }
  0x1f   : > { %7929 = vmatprep.mubr.msk.bf16.mxu0 %vm359_vm1, %v9099_v24  ;;  %7990 = vmatpush3.bf16.msra.mxu0 %v3723_v25  ;;  %v6881_v34 = vld [vmem:[%s9076_s10 + $0x79] sm:$0xff]  ;;  %v9131_v38 = vpack.c.bf16 %v271_v33, %v270_v32  ;;  %v6883_v42 = vld [vmem:[%s9076_s10 + $0x89] sm:$0xff]  ;;  %v6884_v43 = vld [vmem:[%s9076_s10 + $0x91] sm:$0xff]  ;;  %v9150_v48 = vpack.c.bf16 %v273_v41, %v272_v40 }
  0x20   : > { %8897 = vmatprep.subr.msk.bf16.mxu1 %vm456_vm0, %v9110_v27  ;;  %8902 = vmatprep.subr.msk.bf16.mxu0 %vm456_vm0, %v9105_v26  ;;  %v9133_v39 = vpack.c.bf16 %v6882_v35, %v6881_v34  ;;  %v274_v44 = vld [vmem:[%s9076_s10 + $0x78] sm:$0xff]  ;;  %v275_v45 = vld [vmem:[%s9076_s10 + $0x80] sm:$0xff]  ;;  %v6886_v47 = vld [vmem:[%s9076_s10 + $0xa9] sm:$0xff]  ;;  %v9152_v49 = vpack.c.bf16 %v6884_v43, %v6883_v42 }
  0x21   : > { %v6885_v46 = vld [vmem:[%s9076_s10 + $0xa1] sm:$0xff]  ;;  %v9154_v50 = vpack.c.bf16 %v275_v45, %v274_v44  ;;  %v277_v53 = vld [vmem:[%s9076_s10 + $0x90] sm:$0xff]  ;;  %v6888_v55 = vld [vmem:[%s9076_s10 + $0xb9] sm:$0xff] }
  0x22   : > { %v9156_v51 = vpack.c.bf16 %v6886_v47, %v6885_v46  ;;  %v276_v52 = vld [vmem:[%s9076_s10 + $0x88] sm:$0xff]  ;;  %v6887_v54 = vld [vmem:[%s9076_s10 + $0xb1] sm:$0xff]  ;;  %v278_v56 = vld [vmem:[%s9076_s10 + $0xa0] sm:$0xff] }
  0x23   : > { %v279_v57 = vld [vmem:[%s9076_s10 + $0xa8] sm:$0xff]  ;;  %v6890_v59 = vld [vmem:[%s9076_s10 + $0xd1] sm:$0xff]  ;;  %v9174_v60 = vpack.c.bf16 %v277_v53, %v276_v52  ;;  %v9176_v61 = vpack.c.bf16 %v6888_v55, %v6887_v54  ;;  %v6891_v4 = vld [vmem:[%s9076_s10 + $0xd9] sm:$0xff] }
  0x24   : > { %v6889_v58 = vld [vmem:[%s9076_s10 + $0xc9] sm:$0xff]  ;;  %v9178_v62 = vpack.c.bf16 %v279_v57, %v278_v56  ;;  %v281_v2 = vld [vmem:[%s9076_s10 + $0xb8] sm:$0xff]  ;;  %v6892_v5 = vld [vmem:[%s9076_s10 + $0xe1] sm:$0xff] }
  0x25   : > { %7666 = vmatmul.mubr.msk.bf16.gmra.mrb[4].mxu1 %vm359_vm1, %v329_v36  ;;  %7930 = vmatmul.mubr.msk.bf16.gmra.mrb[4].mxu0 %vm359_vm1, %v9129_v37  ;;  %v9180_v63 = vpack.c.bf16 %v6890_v59, %v6889_v58  ;;  %v280_v0 = vld [vmem:[%s9076_s10 + $0xb0] sm:$0xff]  ;;  %v282_v6 = vld [vmem:[%s9076_s10 + $0xc8] sm:$0xff]  ;;  %v6894_v9 = vld [vmem:[%s9076_s10 + $0xf9] sm:$0xff]  ;;  %v9200_v11 = vpack.c.bf16 %v6892_v5, %v6891_v4 }
  0x26   : > { %7669 = vmatprep.mubr.msk.bf16.mxu1 %vm359_vm1, %v9131_v38  ;;  %7933 = vmatprep.mubr.msk.bf16.mxu0 %vm359_vm1, %v9133_v39  ;;  %v283_v7 = vld [vmem:[%s9076_s10 + $0xd0] sm:$0xff]  ;;  %v9198_v10 = vpack.c.bf16 %v281_v2, %v280_v0  ;;  %v284_v15 = vld [vmem:[%s9076_s10 + $0xd8] sm:$0xff]  ;;  %v285_v16 = vld [vmem:[%s9076_s10 + $0xe0] sm:$0xff] }
  0x27   : > { %v6893_v8 = vld [vmem:[%s9076_s10 + $0xf1] sm:$0xff]  ;;  %v9202_v12 = vpack.c.bf16 %v283_v7, %v282_v6  ;;  %v6895_v17 = vld [vmem:[%s9076_s10 + $0x101] sm:$0xff]  ;;  %v6896_v18 = vld [vmem:[%s9076_s10 + $0x109] sm:$0xff]  ;;  %v9222_v25 = vpack.c.bf16 %v285_v16, %v284_v15 }
  0x28   : > { %v9204_v14 = vpack.c.bf16 %v6894_v9, %v6893_v8  ;;  %v286_v20 = vld [vmem:[%s9076_s10 + $0xf0] sm:$0xff]  ;;  %v287_v21 = vld [vmem:[%s9076_s10 + $0xf8] sm:$0xff]  ;;  %v6898_v23 = vld [vmem:[%s9076_s10 + $0x121] sm:$0xff]  ;;  %v9224_v28 = vpack.c.bf16 %v6896_v18, %v6895_v17 }
  0x29   : > { %v6897_v22 = vld [vmem:[%s9076_s10 + $0x119] sm:$0xff]  ;;  %v9226_v29 = vpack.c.bf16 %v287_v21, %v286_v20  ;;  %v289_v32 = vld [vmem:[%s9076_s10 + $0x108] sm:$0xff]  ;;  %v6900_v34 = vld [vmem:[%s9076_s10 + $0x131] sm:$0xff] }
  0x2a   : > { %v9228_v30 = vpack.c.bf16 %v6898_v23, %v6897_v22  ;;  %v288_v31 = vld [vmem:[%s9076_s10 + $0x100] sm:$0xff]  ;;  %v6899_v33 = vld [vmem:[%s9076_s10 + $0x129] sm:$0xff]  ;;  %v290_v35 = vld [vmem:[%s9076_s10 + $0x118] sm:$0xff]  ;;  %v4404_v22 = vsel %vm456_vm0, %v9105_v26, 0 }
  0x2b   : > { %v291_v36 = vld [vmem:[%s9076_s10 + $0x120] sm:$0xff]  ;;  %v6902_v41 = vld [vmem:[%s9076_s10 + $0x149] sm:$0xff]  ;;  %v9246_v42 = vpack.c.bf16 %v289_v32, %v288_v31  ;;  %v9248_v43 = vpack.c.bf16 %v6900_v34, %v6899_v33  ;;  %v6903_v52 = vld [vmem:[%s9076_s10 + $0x151] sm:$0xff] }
  0x2c   : > { %v6901_v40 = vld [vmem:[%s9076_s10 + $0x141] sm:$0xff]  ;;  %v9250_v44 = vpack.c.bf16 %v291_v36, %v290_v35  ;;  %v293_v47 = vld [vmem:[%s9076_s10 + $0x130] sm:$0xff]  ;;  %v6904_v53 = vld [vmem:[%s9076_s10 + $0x159] sm:$0xff] }
  0x2d   : > { %7670 = vmatmul.mubr.msk.bf16.gmra.mrb[8].mxu1 %vm359_vm1, %v9150_v48  ;;  %7934 = vmatmul.mubr.msk.bf16.gmra.mrb[8].mxu0 %vm359_vm1, %v9152_v49  ;;  %v9252_v45 = vpack.c.bf16 %v6902_v41, %v6901_v40  ;;  %v292_v46 = vld [vmem:[%s9076_s10 + $0x128] sm:$0xff]  ;;  %v294_v54 = vld [vmem:[%s9076_s10 + $0x140] sm:$0xff]  ;;  %v6971_v57 = vld [vmem:[%s9076_s10 + $0x32] sm:$0xff]  ;;  %v9272_v59 = vpack.c.bf16 %v6904_v53, %v6903_v52 }
  0x2e   : > { %7673 = vmatprep.mubr.msk.bf16.mxu1 %vm359_vm1, %v9154_v50  ;;  %7937 = vmatprep.mubr.msk.bf16.mxu0 %vm359_vm1, %v9156_v51  ;;  %v295_v55 = vld [vmem:[%s9076_s10 + $0x148] sm:$0xff]  ;;  %v9270_v58 = vpack.c.bf16 %v293_v47, %v292_v46  ;;  %v296_v4 = vld [vmem:[%s9076_s10 + $0x150] sm:$0xff]  ;;  %v297_v5 = vld [vmem:[%s9076_s10 + $0x158] sm:$0xff] }
  0x2f   : > { %v6970_v56 = vld [vmem:[%s9076_s10 + $0x2a] sm:$0xff]  ;;  %v9274_v0 = vpack.c.bf16 %v295_v55, %v294_v54  ;;  %v6972_v6 = vld [vmem:[%s9076_s10 + $0x3a] sm:$0xff]  ;;  %v6973_v7 = vld [vmem:[%s9076_s10 + $0x42] sm:$0xff]  ;;  %v9294_v17 = vpack.c.bf16 %v297_v5, %v296_v4 }
  0x30   : > { %v9276_v2 = vpack.c.bf16 %v6971_v57, %v6970_v56  ;;  %v298_v8 = vld [vmem:[%s9076_s10 + $0x168] sm:$0xff]  ;;  %v299_v9 = vld [vmem:[%s9076_s10 + $0x170] sm:$0xff]  ;;  %v6975_v16 = vld [vmem:[%s9076_s10 + $0x5a] sm:$0xff]  ;;  %v9296_v18 = vpack.c.bf16 %v6973_v7, %v6972_v6 }
  0x31   : > { %v6974_v15 = vld [vmem:[%s9076_s10 + $0x52] sm:$0xff]  ;;  %v9298_v20 = vpack.c.bf16 %v299_v9, %v298_v8  ;;  %v301_v31 = vld [vmem:[%s9076_s10 + $0x180] sm:$0xff]  ;;  %v6977_v33 = vld [vmem:[%s9076_s10 + $0x6a] sm:$0xff] }
  0x32   : > { %v9300_v21 = vpack.c.bf16 %v6975_v16, %v6974_v15  ;;  %v300_v23 = vld [vmem:[%s9076_s10 + $0x178] sm:$0xff]  ;;  %v6976_v32 = vld [vmem:[%s9076_s10 + $0x62] sm:$0xff]  ;;  %v302_v26 = vld [vmem:[%s9076_s10 + $0x190] sm:$0xff] }
  0x33   : > { %v303_v34 = vld [vmem:[%s9076_s10 + $0x198] sm:$0xff]  ;;  %v9321_v35 = vld [vmem:[%s10349_s1 + $0xe] sm:$0x3]  ;;  %v6979_v40 = vld [vmem:[%s9076_s10 + $0x82] sm:$0xff]  ;;  %v9327_v41 = vpack.c.bf16 %v301_v31, %v300_v23  ;;  %v9329_v46 = vpack.c.bf16 %v6977_v33, %v6976_v32 }
  0x34   : > { %v6978_v36 = vld [vmem:[%s9076_s10 + $0x7a] sm:$0xff]  ;;  %v9331_v47 = vpack.c.bf16 %v303_v34, %v302_v26  ;;  %v305_v54 = vld [vmem:[%s9076_s10 + $0x1a8] sm:$0xff]  ;;  %v6981_v56 = vld [vmem:[%s9076_s10 + $0x92] sm:$0xff] }
  0x35   : > { %7674 = vmatmul.mubr.msk.bf16.gmra.mrb[12].mxu1 %vm359_vm1, %v9174_v60  ;;  %7938 = vmatmul.mubr.msk.bf16.gmra.mrb[12].mxu0 %vm359_vm1, %v9176_v61  ;;  %v9333_v52 = vpack.c.bf16 %v6979_v40, %v6978_v36  ;;  %v304_v53 = vld [vmem:[%s9076_s10 + $0x1a0] sm:$0xff]  ;;  %v6980_v55 = vld [vmem:[%s9076_s10 + $0x8a] sm:$0xff]  ;;  %v306_v57 = vld [vmem:[%s9076_s10 + $0x1b8] sm:$0xff] }
  0x36   : > { %7677 = vmatprep.mubr.msk.bf16.mxu1 %vm359_vm1, %v9178_v62  ;;  %7941 = vmatprep.mubr.msk.bf16.mxu0 %vm359_vm1, %v9180_v63  ;;  %v307_v4 = vld [vmem:[%s9076_s10 + $0x1c0] sm:$0xff]  ;;  %v6983_v6 = vld [vmem:[%s9076_s10 + $0xaa] sm:$0xff]  ;;  %v9351_v7 = vpack.c.bf16 %v305_v54, %v304_v53  ;;  %v9353_v8 = vpack.c.bf16 %v6981_v56, %v6980_v55  ;;  %v6984_v23 = vld [vmem:[%s9076_s10 + $0xb2] sm:$0xff] }
  0x37   : > { %v6982_v5 = vld [vmem:[%s9076_s10 + $0xa2] sm:$0xff]  ;;  %v9355_v9 = vpack.c.bf16 %v307_v4, %v306_v57  ;;  %v6985_v31 = vld [vmem:[%s9076_s10 + $0xba] sm:$0xff]  ;;  %v6986_v26 = vld [vmem:[%s9076_s10 + $0xca] sm:$0xff] }
  0x38   : > { %v9357_v15 = vpack.c.bf16 %v6983_v6, %v6982_v5  ;;  %v308_v16 = vld [vmem:[%s9076_s10 + $0x1c8] sm:$0xff]  ;;  %v310_v32 = vld [vmem:[%s9076_s10 + $0x1e0] sm:$0xff]  ;;  %v6987_v34 = vld [vmem:[%s9076_s10 + $0xd2] sm:$0xff]  ;;  %v9377_v40 = vpack.c.bf16 %v6985_v31, %v6984_v23 }
  0x39   : > { %v311_v33 = vld [vmem:[%s9076_s10 + $0x1e8] sm:$0xff]  ;;  %v9381_v54 = vpack.c.bf16 %v6987_v34, %v6986_v26  ;;  %v312_v55 = vld [vmem:[%s9076_s10 + $0x1f0] sm:$0xff]  ;;  %v313_v56 = vld [vmem:[%s9076_s10 + $0x1f8] sm:$0xff] }
  0x3a   : > { %10366 = vst [vmem:[#allocation3_spill] sm:$0xff] %v9377_v40  ;;  %v9379_v53 = vpack.c.bf16 %v311_v33, %v310_v32  ;;  %v6988_v57 = vld [vmem:[%s9076_s10 + $0xda] sm:$0xff]  ;;  %v6989_v4 = vld [vmem:[%s9076_s10 + $0xe2] sm:$0xff]  ;;  %v315_v6 = vld [vmem:[%s9076_s10 + $0x210] sm:$0xff]  ;;  %v9399_v23 = vpack.c.bf16 %v313_v56, %v312_v55 }
  0x3b   : > { %10367 = vst [vmem:[#allocation4_spill] sm:$0xff] %v9381_v54  ;;  %v314_v5 = vld [vmem:[%s9076_s10 + $0x208] sm:$0xff]  ;;  %v9401_v31 = vpack.c.bf16 %v6989_v4, %v6988_v57  ;;  %v316_v26 = vld [vmem:[%s9076_s10 + $0x218] sm:$0xff]  ;;  %v317_v34 = vld [vmem:[%s9076_s10 + $0x220] sm:$0xff] }
  0x3c   : > { %v9403_v32 = vpack.c.bf16 %v315_v6, %v314_v5  ;;  %v6992_v55 = vld [vmem:[%s9076_s10 + $0x102] sm:$0xff]  ;;  %v6993_v56 = vld [vmem:[%s9076_s10 + $0x10a] sm:$0xff]  ;;  %v319_v4 = vld [vmem:[%s9076_s10 + $0x238] sm:$0xff] }
  0x3d   : > { %7678 = vmatmul.mubr.msk.bf16.gmra.mrb[16].mxu1 %vm359_vm1, %v9198_v10  ;;  %7942 = vmatmul.mubr.msk.bf16.gmra.mrb[16].mxu0 %vm359_vm1, %v9200_v11  ;;  %10368 = vst [vmem:[#allocation5_spill] sm:$0xff] %v9401_v31  ;;  %v318_v57 = vld [vmem:[%s9076_s10 + $0x230] sm:$0xff]  ;;  %v6994_v5 = vld [vmem:[%s9076_s10 + $0x11a] sm:$0xff]  ;;  %v6995_v6 = vld [vmem:[%s9076_s10 + $0x122] sm:$0xff] }
  0x3e   : > { %7681 = vmatprep.mubr.msk.bf16.mxu1 %vm359_vm1, %v9202_v12  ;;  %7945 = vmatprep.mubr.msk.bf16.mxu0 %vm359_vm1, %v9204_v14  ;;  %v9427_v3 = vpack.c.bf16 %v319_v4, %v318_v57  ;;  %v6998_v57 = vld [vmem:[%s9076_s10 + $0x142] sm:$0xff]  ;;  %v6999_v4 = vld [vmem:[%s9076_s10 + $0x14a] sm:$0xff] }
  0x40   : > { %10371 = vst [vmem:[#allocation8_spill] sm:$0xff] %v9427_v3 }
  0x45   : > { %7682 = vmatmul.mubr.msk.bf16.gmra.mrb[20].mxu1 %vm359_vm1, %v9222_v25  ;;  %7946 = vmatmul.mubr.msk.bf16.gmra.mrb[20].mxu0 %vm359_vm1, %v9224_v28 }
  0x46   : > { %7685 = vmatprep.mubr.msk.bf16.mxu1 %vm359_vm1, %v9226_v29  ;;  %7949 = vmatprep.mubr.msk.bf16.mxu0 %vm359_vm1, %v9228_v30 }
  0x4d   : > { %7686 = vmatmul.mubr.msk.bf16.gmra.mrb[24].mxu1 %vm359_vm1, %v9246_v42  ;;  %7950 = vmatmul.mubr.msk.bf16.gmra.mrb[24].mxu0 %vm359_vm1, %v9248_v43 }
  0x4e   : > { %7689 = vmatprep.mubr.msk.bf16.mxu1 %vm359_vm1, %v9250_v44  ;;  %7953 = vmatprep.mubr.msk.bf16.mxu0 %vm359_vm1, %v9252_v45 }
  0x55   : > { %7690 = vmatmul.mubr.msk.bf16.gmra.mrb[28].mxu1 %vm359_vm1, %v9270_v58  ;;  %7954 = vmatmul.mubr.msk.bf16.gmra.mrb[28].mxu0 %vm359_vm1, %v9272_v59 }
  0x56   : > { %7693 = vmatprep.mubr.msk.bf16.mxu1 %vm359_vm1, %v9274_v0  ;;  %7991 = vmatprep.mubr.msk.bf16.mxu0 %vm359_vm1, %v9276_v2 }
  0x5d   : > { %7694 = vmatmul.mubr.msk.bf16.gmra.mrb[32].mxu1 %vm359_vm1, %v9294_v17  ;;  %7992 = vmatmul.mubr.msk.bf16.vlgmr.msra.gmra.mrb[0].mxu0 %vm359_vm1, %v9296_v18 }
  0x5e   : > { %7697 = vmatprep.mubr.msk.bf16.mxu1 %vm359_vm1, %v9298_v20  ;;  %7995 = vmatprep.mubr.msk.bf16.mxu0 %vm359_vm1, %v9300_v21 }
  0x5f   : > { %8056 = vmatpush3.bf16.msra.mxu0 %v4404_v22  ;;  %v309_v22 = vld [vmem:[%s9076_s10 + $0x1d0] sm:$0xff] }
  0x60   : > { %8903 = vmatprep.subr.msk.bf16.mxu0 %vm456_vm0, %v9321_v35  ;;  %v9375_v36 = vpack.c.bf16 %v309_v22, %v308_v16  ;;  %v6990_v16 = vld [vmem:[%s9076_s10 + $0xf2] sm:$0xff]  ;;  %v6991_v22 = vld [vmem:[%s9076_s10 + $0xfa] sm:$0xff] }
  0x61   : > { %v9405_v33 = vpack.c.bf16 %v6991_v22, %v6990_v16  ;;  %v9423_v16 = vpack.c.bf16 %v317_v34, %v316_v26  ;;  %v9425_v22 = vpack.c.bf16 %v6993_v56, %v6992_v55  ;;  %v6996_v26 = vld [vmem:[%s9076_s10 + $0x12a] sm:$0xff]  ;;  %v6997_v34 = vld [vmem:[%s9076_s10 + $0x132] sm:$0xff]  ;;  %v323_v56 = vld [vmem:[%s9076_s10 + $0x260] sm:$0xff] }
  0x62   : > { %v322_v55 = vld [vmem:[%s9076_s10 + $0x258] sm:$0xff] }
  0x63   : > { %10369 = vst [vmem:[#allocation6_spill] sm:$0xff] %v9405_v33  ;;  %10370 = vst [vmem:[#allocation7_spill] sm:$0xff] %v9425_v22 }
  0x65   : > { %7698 = vmatmul.mubr.msk.bf16.gmra.mrb[36].mxu1 %vm359_vm1, %v9327_v41  ;;  %7996 = vmatmul.mubr.msk.bf16.gmra.mrb[4].mxu0 %vm359_vm1, %v9329_v46 }
  0x66   : > { %7701 = vmatprep.mubr.msk.bf16.mxu1 %vm359_vm1, %v9331_v47  ;;  %7999 = vmatprep.mubr.msk.bf16.mxu0 %vm359_vm1, %v9333_v52 }
  0x6d   : > { %7702 = vmatmul.mubr.msk.bf16.gmra.mrb[40].mxu1 %vm359_vm1, %v9351_v7  ;;  %8000 = vmatmul.mubr.msk.bf16.gmra.mrb[8].mxu0 %vm359_vm1, %v9353_v8 }
  0x6e   : > { %7705 = vmatprep.mubr.msk.bf16.mxu1 %vm359_vm1, %v9355_v9  ;;  %8003 = vmatprep.mubr.msk.bf16.mxu0 %vm359_vm1, %v9357_v15 }
  0x75   : > { %7706 = vmatmul.mubr.msk.bf16.gmra.mrb[44].mxu1 %vm359_vm1, %v9375_v36  ;;  %8004 = vmatmul.mubr.msk.bf16.gmra.mrb[12].mxu0 %vm359_vm1, %v9377_v40  ;;  %v9453_v40 = vpack.c.bf16 %v6999_v4, %v6998_v57 }
  0x76   : > { %7709 = vmatprep.mubr.msk.bf16.mxu1 %vm359_vm1, %v9379_v53  ;;  %8007 = vmatprep.mubr.msk.bf16.mxu0 %vm359_vm1, %v9381_v54  ;;  %v321_v54 = vld [vmem:[%s9076_s10 + $0x248] sm:$0xff] }
  0x77   : > { %10376 = vst [vmem:[#allocation13_spill] sm:$0xff] %v9453_v40 }
  0x7d   : > { %7710 = vmatmul.mubr.msk.bf16.gmra.mrb[48].mxu1 %vm359_vm1, %v9399_v23  ;;  %8008 = vmatmul.mubr.msk.bf16.gmra.mrb[16].mxu0 %vm359_vm1, %v9401_v31  ;;  %v9429_v31 = vpack.c.bf16 %v6995_v6, %v6994_v5  ;;  %v9449_v6 = vpack.c.bf16 %v6997_v34, %v6996_v26  ;;  %v813_v26 = vld [vmem:[%s9076_s10 + $0x1] sm:$0xff]  ;;  %v814_v34 = vld [vmem:[%s9076_s10 + $0x9] sm:$0xff] }
  0x7e   : > { %7713 = vmatprep.mubr.msk.bf16.mxu1 %vm359_vm1, %v9403_v32  ;;  %8011 = vmatprep.mubr.msk.bf16.mxu0 %vm359_vm1, %v9405_v33  ;;  %v320_v33 = vld [vmem:[%s9076_s10 + $0x240] sm:$0xff] }
  0x7f   : > { %10372 = vst [vmem:[#allocation9_spill] sm:$0xff] %v9429_v31  ;;  %v9447_v5 = vpack.c.bf16 %v321_v54, %v320_v33  ;;  %10374 = vst [vmem:[#allocation11_spill] sm:$0xff] %v9449_v6  ;;  %v7000_v54 = vld [vmem:[%s9076_s10 + $0x152] sm:$0xff]  ;;  %v7001_v33 = vld [vmem:[%s9076_s10 + $0x15a] sm:$0xff] }
  0x80   : > { %v9473_v4 = vpack.c.bf16 %v7001_v33, %v7000_v54  ;;  %v7006_v54 = vld [vmem:[%s9076_s10 + $0x192] sm:$0xff]  ;;  %v7007_v33 = vld [vmem:[%s9076_s10 + $0x19a] sm:$0xff] }
  0x81   : > { %10373 = vst [vmem:[#allocation10_spill] sm:$0xff] %v9447_v5 }
  0x85   : > { %7714 = vmatmul.mubr.msk.bf16.gmra.mrb[52].mxu1 %vm359_vm1, %v9423_v16  ;;  %8012 = vmatmul.mubr.msk.bf16.gmra.mrb[20].mxu0 %vm359_vm1, %v9425_v22  ;;  %v9451_v22 = vpack.c.bf16 %v323_v56, %v322_v55  ;;  %v7002_v55 = vld [vmem:[%s9076_s10 + $0x16a] sm:$0xff]  ;;  %v7003_v56 = vld [vmem:[%s9076_s10 + $0x172] sm:$0xff] }
  0x86   : > { %7717 = vmatprep.mubr.msk.bf16.mxu1 %vm359_vm1, %v9427_v3  ;;  %8015 = vmatprep.mubr.msk.bf16.mxu0 %vm359_vm1, %v9429_v31  ;;  %v324_v31 = vld [vmem:[%s9076_s10 + $0x268] sm:$0xff]  ;;  %v325_v3 = vld [vmem:[%s9076_s10 + $0x270] sm:$0xff] }
  0x87   : > { %10375 = vst [vmem:[#allocation12_spill] sm:$0xff] %v9451_v22  ;;  %v9471_v57 = vpack.c.bf16 %v325_v3, %v324_v31  ;;  %v7004_v3 = vld [vmem:[%s9076_s10 + $0x17a] sm:$0xff]  ;;  %v7005_v31 = vld [vmem:[%s9076_s10 + $0x182] sm:$0xff] }
  0x8d   : > { %7718 = vmatmul.mubr.msk.bf16.gmra.mrb[56].mxu1 %vm359_vm1, %v9447_v5  ;;  %8016 = vmatmul.mubr.msk.bf16.gmra.mrb[24].mxu0 %vm359_vm1, %v9449_v6  ;;  %v877_v6 = vpack.c.bf16 %v814_v34, %v813_v26  ;;  %v816_v5 = vld [vmem:[%s9076_s10 + $0x19] sm:$0xff]  ;;  %v9490_v34 = vpack.c.bf16 %v7005_v31, %v7004_v3  ;;  %v7011_v3 = vld [vmem:[%s9076_s10 + $0x1c2] sm:$0xff] }
  0x8e   : > { %7721 = vmatprep.mubr.msk.bf16.mxu1 %vm359_vm1, %v9451_v22  ;;  %8019 = vmatprep.mubr.msk.bf16.mxu0 %vm359_vm1, %v9453_v40  ;;  %v9475_v22 = vpack.c.bf16 %v7003_v56, %v7002_v55  ;;  %v815_v40 = vld [vmem:[%s9076_s10 + $0x11] sm:$0xff]  ;;  %v1686_v55 = vsel %vm456_vm0, %v9110_v27, 0  ;;  %v9500_v56 = vld [vmem:[%s10349_s1 + $0x6] sm:$0x3] }
  0x8f   : > { %v878_v26 = vpack.c.bf16 %v816_v5, %v815_v40  ;;  %v7008_v27 = vld [vmem:[%s9076_s10 + $0x1a2] sm:$0xff]  ;;  %v7009_v40 = vld [vmem:[%s9076_s10 + $0x1aa] sm:$0xff]  ;;  %v7010_v5 = vld [vmem:[%s9076_s10 + $0x1ba] sm:$0xff] }
  0x90   : > { %v9514_v31 = vpack.c.bf16 %v7009_v40, %v7008_v27 }
  0x95   : > { %7722 = vmatmul.mubr.msk.bf16.gmra.mrb[60].mxu1 %vm359_vm1, %v9471_v57  ;;  %8020 = vmatmul.mubr.msk.bf16.gmra.mrb[28].mxu0 %vm359_vm1, %v9473_v4 }
  0x96   : > { %7727 = vmatprep.mubr.msk.bf16.mxu1 %vm359_vm1, %v877_v6  ;;  %8023 = vmatprep.mubr.msk.bf16.mxu0 %vm359_vm1, %v9475_v22  ;;  %v9494_v6 = vpack.c.bf16 %v7007_v33, %v7006_v54  ;;  %v9516_v54 = vpack.c.bf16 %v7011_v3, %v7010_v5  ;;  %v7013_v33 = vld [vmem:[%s9076_s10 + $0x1d2] sm:$0xff]  ;;  %v7018_v5 = vld [vmem:[%s9076_s10 + $0x20a] sm:$0xff] }
  0x97   : > { %v7019_v3 = vld [vmem:[%s9076_s10 + $0x212] sm:$0xff] }
  0x9d   : > { %7728 = vmatmul.mubr.msk.bf16.vlgmr.msra.gmra.mrb[0].mxu1 %vm359_vm1, %v878_v26  ;;  %8024 = vmatmul.mubr.msk.bf16.gmra.mrb[32].mxu0 %vm359_vm1, %v9490_v34  ;;  %v7014_v26 = vld [vmem:[%s9076_s10 + $0x1e2] sm:$0xff] }
  0x9e   : > { %7792 = vmatpush3.bf16.msra.mxu1 %v1686_v55  ;;  %7731 = vmatprep.mubr.msk.bf16.mxu1 %vm359_vm1, %v9084_v13  ;;  %v7012_v13 = vld [vmem:[%s9076_s10 + $0x1ca] sm:$0xff] }
  0x9f   : > { %8027 = vmatprep.mubr.msk.bf16.mxu0 %vm359_vm1, %v9494_v6  ;;  %8898 = vmatprep.subr.msk.bf16.mxu1 %vm456_vm0, %v9500_v56  ;;  %v7015_v55 = vld [vmem:[%s9076_s10 + $0x1ea] sm:$0xff]  ;;  %v9530_v27 = vpack.c.bf16 %v7013_v33, %v7012_v13  ;;  %v9548_v33 = vpack.c.bf16 %v7019_v3, %v7018_v5  ;;  %v7026_v5 = vld [vmem:[%s9076_s10 + $0x25a] sm:$0xff]  ;;  %v7027_v3 = vld [vmem:[%s9076_s10 + $0x262] sm:$0xff] }
  0xa0   : > { %v9532_v40 = vpack.c.bf16 %v7015_v55, %v7014_v26  ;;  %v7022_v26 = vld [vmem:[%s9076_s10 + $0x232] sm:$0xff]  ;;  %v7023_v55 = vld [vmem:[%s9076_s10 + $0x23a] sm:$0xff] }
  0xa5   : > { %7732 = vmatmul.mubr.msk.bf16.gmra.mrb[4].mxu1 %vm359_vm1, %v9091_v19  ;;  %8028 = vmatmul.mubr.msk.bf16.gmra.mrb[36].mxu0 %vm359_vm1, %v9514_v31  ;;  %v7016_v19 = vld [vmem:[%s9076_s10 + $0x1f2] sm:$0xff] }
  0xa6   : > { %7735 = vmatprep.mubr.msk.bf16.mxu1 %vm359_vm1, %v9099_v24  ;;  %8031 = vmatprep.mubr.msk.bf16.mxu0 %vm359_vm1, %v9516_v54  ;;  %v7017_v24 = vld [vmem:[%s9076_s10 + $0x1fa] sm:$0xff] }
  0xa7   : > { %v9546_v13 = vpack.c.bf16 %v7017_v24, %v7016_v19  ;;  %v9564_v24 = vpack.c.bf16 %v7023_v55, %v7022_v26  ;;  %v7030_v26 = vld [vmem:[%s9076_s10 + $0x282] sm:$0xff]  ;;  %v7031_v55 = vld [vmem:[%s9076_s10 + $0x28a] sm:$0xff] }
  0xad   : > { %7736 = vmatmul.mubr.msk.bf16.gmra.mrb[8].mxu1 %vm359_vm1, %v9129_v37  ;;  %8032 = vmatmul.mubr.msk.bf16.gmra.mrb[40].mxu0 %vm359_vm1, %v9530_v27  ;;  %v7020_v37 = vld [vmem:[%s9076_s10 + $0x21a] sm:$0xff] }
  0xae   : > { %7739 = vmatprep.mubr.msk.bf16.mxu1 %vm359_vm1, %v9133_v39  ;;  %8035 = vmatprep.mubr.msk.bf16.mxu0 %vm359_vm1, %v9532_v40  ;;  %v7021_v39 = vld [vmem:[%s9076_s10 + $0x222] sm:$0xff] }
  0xaf   : > { %v9562_v19 = vpack.c.bf16 %v7021_v39, %v7020_v37  ;;  %v9580_v39 = vpack.c.bf16 %v7027_v3, %v7026_v5 }
  0xb5   : > { %7740 = vmatmul.mubr.msk.bf16.gmra.mrb[12].mxu1 %vm359_vm1, %v9152_v49  ;;  %8036 = vmatmul.mubr.msk.bf16.gmra.mrb[44].mxu0 %vm359_vm1, %v9546_v13  ;;  %v7024_v49 = vld [vmem:[%s9076_s10 + $0x242] sm:$0xff] }
  0xb6   : > { %7743 = vmatprep.mubr.msk.bf16.mxu1 %vm359_vm1, %v9156_v51  ;;  %8039 = vmatprep.mubr.msk.bf16.mxu0 %vm359_vm1, %v9548_v33  ;;  %v7025_v51 = vld [vmem:[%s9076_s10 + $0x24a] sm:$0xff] }
  0xb7   : > { %v9578_v37 = vpack.c.bf16 %v7025_v51, %v7024_v49  ;;  %v3622_v51 = vpack.c.bf16 %v7031_v55, %v7030_v26  ;;  %v856_v26 = vld [vmem:[%s9076_s10 + $0x1a9] sm:$0xff]  ;;  %v857_v55 = vld [vmem:[%s9076_s10 + $0x1b9] sm:$0xff] }
  0xbd   : > { %7744 = vmatmul.mubr.msk.bf16.gmra.mrb[16].mxu1 %vm359_vm1, %v9176_v61  ;;  %8040 = vmatmul.mubr.msk.bf16.gmra.mrb[48].mxu0 %vm359_vm1, %v9562_v19  ;;  %v7028_v61 = vld [vmem:[%s9076_s10 + $0x26a] sm:$0xff] }
  0xbe   : > { %7747 = vmatprep.mubr.msk.bf16.mxu1 %vm359_vm1, %v9180_v63  ;;  %8043 = vmatprep.mubr.msk.bf16.mxu0 %vm359_vm1, %v9564_v24  ;;  %v7029_v63 = vld [vmem:[%s9076_s10 + $0x272] sm:$0xff] }
  0xbf   : > { %v9594_v49 = vpack.c.bf16 %v7029_v63, %v7028_v61  ;;  %v5082_v61 = vsel %vm456_vm0, %v9321_v35, 0  ;;  %v854_v35 = vld [vmem:[%s9076_s10 + $0x199] sm:$0xff] }
  0xc5   : > { %7748 = vmatmul.mubr.msk.bf16.gmra.mrb[20].mxu1 %vm359_vm1, %v9200_v11  ;;  %8044 = vmatmul.mubr.msk.bf16.gmra.mrb[52].mxu0 %vm359_vm1, %v9578_v37  ;;  %v7032_v11 = vld [vmem:[%s9076_s10 + $0x292] sm:$0xff] }
  0xc6   : > { %7751 = vmatprep.mubr.msk.bf16.mxu1 %vm359_vm1, %v9204_v14  ;;  %8047 = vmatprep.mubr.msk.bf16.mxu0 %vm359_vm1, %v9580_v39  ;;  %v7033_v14 = vld [vmem:[%s9076_s10 + $0x29a] sm:$0xff] }
  0xc7   : > { %v3623_v5 = vpack.c.bf16 %v7033_v14, %v7032_v11 }
  0xcd   : > { %7752 = vmatmul.mubr.msk.bf16.gmra.mrb[24].mxu1 %vm359_vm1, %v9224_v28  ;;  %8048 = vmatmul.mubr.msk.bf16.gmra.mrb[56].mxu0 %vm359_vm1, %v9594_v49  ;;  %v849_v28 = vld [vmem:[%s9076_s10 + $0x169] sm:$0xff] }
  0xce   : > { %7755 = vmatprep.mubr.msk.bf16.mxu1 %vm359_vm1, %v9228_v30  ;;  %8051 = vmatprep.mubr.msk.bf16.mxu0 %vm359_vm1, %v3622_v51  ;;  %v850_v30 = vld [vmem:[%s9076_s10 + $0x171] sm:$0xff]  ;;  %v858_v51 = vld [vmem:[%s9076_s10 + $0x1c1] sm:$0xff] }
  0xcf   : > { %v9614_v3 = vpack.c.bf16 %v850_v30, %v849_v28  ;;  %v9655_v14 = vpack.c.bf16 %v858_v51, %v857_v55  ;;  %v862_v28 = vld [vmem:[%s9076_s10 + $0x1e9] sm:$0xff] }
  0xd5   : > { %7756 = vmatmul.mubr.msk.bf16.gmra.mrb[28].mxu1 %vm359_vm1, %v9248_v43  ;;  %8052 = vmatmul.mubr.msk.bf16.gmra.mrb[60].mxu0 %vm359_vm1, %v3623_v5  ;;  %v851_v43 = vld [vmem:[%s9076_s10 + $0x179] sm:$0xff]  ;;  %v861_v5 = vld [vmem:[%s9076_s10 + $0x1e1] sm:$0xff] }
  0xd6   : > { %7759 = vmatprep.mubr.msk.bf16.mxu1 %vm359_vm1, %v9252_v45  ;;  %8057 = vmatprep.mubr.msk.bf16.mxu0 %vm359_vm1, %v9131_v38  ;;  %v852_v38 = vld [vmem:[%s9076_s10 + $0x181] sm:$0xff]  ;;  %v853_v45 = vld [vmem:[%s9076_s10 + $0x191] sm:$0xff] }
  0xd7   : > { %v9639_v63 = vpack.c.bf16 %v854_v35, %v853_v45 }
  0xdd   : > { %7760 = vmatmul.mubr.msk.bf16.gmra.mrb[32].mxu1 %vm359_vm1, %v9272_v59  ;;  %8058 = vmatmul.mubr.msk.bf16.vlgmr.msra.gmra.mrb[0].mxu0 %vm359_vm1, %v9150_v48  ;;  %v9633_v59 = vld [vmem:[%s10349_s1 + $0x10] sm:$0x3]  ;;  %v9637_v48 = vpack.c.bf16 %v852_v38, %v851_v43 }
  0xde   : > { %7763 = vmatprep.mubr.msk.bf16.mxu1 %vm359_vm1, %v9614_v3  ;;  %8061 = vmatprep.mubr.msk.bf16.mxu0 %vm359_vm1, %v9154_v50  ;;  %v855_v50 = vld [vmem:[%s9076_s10 + $0x1a1] sm:$0xff]  ;;  %v865_v43 = vld [vmem:[%s9076_s10 + $0x209] sm:$0xff]  ;;  %v866_v38 = vld [vmem:[%s9076_s10 + $0x211] sm:$0xff] }
  0xdf   : > { %8122 = vmatpush3.bf16.msra.mxu0 %v5082_v61  ;;  %v9653_v11 = vpack.c.bf16 %v856_v26, %v855_v50  ;;  %v9671_v61 = vpack.c.bf16 %v862_v28, %v861_v5  ;;  %v9687_v35 = vpack.c.bf16 %v866_v38, %v865_v43  ;;  %v869_v50 = vld [vmem:[%s9076_s10 + $0x231] sm:$0xff]  ;;  %v870_v26 = vld [vmem:[%s9076_s10 + $0x239] sm:$0xff] }
  0xe0   : > { %8904 = vmatprep.subr.msk.bf16.mxu0 %vm456_vm0, %v9633_v59  ;;  %v9703_v51 = vpack.c.bf16 %v870_v26, %v869_v50  ;;  %v7132_v50 = vld [vmem:[%s9076_s10 + $0x2c0] sm:$0xff]  ;;  %v7166_v26 = vld [vmem:[%s9076_s10 + $0x51] sm:$0xff] }
  0xe5   : > { %7764 = vmatmul.mubr.msk.bf16.gmra.mrb[36].mxu1 %vm359_vm1, %v9637_v48  ;;  %8062 = vmatmul.mubr.msk.bf16.gmra.mrb[4].mxu0 %vm359_vm1, %v9174_v60  ;;  %v859_v60 = vld [vmem:[%s9076_s10 + $0x1c9] sm:$0xff] }
  0xe6   : > { %7767 = vmatprep.mubr.msk.bf16.mxu1 %vm359_vm1, %v9639_v63  ;;  %8065 = vmatprep.mubr.msk.bf16.mxu0 %vm359_vm1, %v9178_v62  ;;  %v860_v62 = vld [vmem:[%s9076_s10 + $0x1d1] sm:$0xff] }
  0xe7   : > { %v9669_v30 = vpack.c.bf16 %v860_v62, %v859_v60  ;;  %v873_v60 = vld [vmem:[%s9076_s10 + $0x259] sm:$0xff]  ;;  %v874_v62 = vld [vmem:[%s9076_s10 + $0x261] sm:$0xff] }
  0xe8   : > { %v9719_v28 = vpack.c.bf16 %v874_v62, %v873_v60  ;;  %v10386_v62 = vld [vmem:[#allocation11_spill] sm:$0xff] }
  0xed   : > { %7768 = vmatmul.mubr.msk.bf16.gmra.mrb[40].mxu1 %vm359_vm1, %v9653_v11  ;;  %8066 = vmatmul.mubr.msk.bf16.gmra.mrb[8].mxu0 %vm359_vm1, %v9198_v10  ;;  %v863_v10 = vld [vmem:[%s9076_s10 + $0x1f1] sm:$0xff] }
  0xee   : > { %7771 = vmatprep.mubr.msk.bf16.mxu1 %vm359_vm1, %v9655_v14  ;;  %8069 = vmatprep.mubr.msk.bf16.mxu0 %vm359_vm1, %v9202_v12  ;;  %v864_v12 = vld [vmem:[%s9076_s10 + $0x1f9] sm:$0xff] }
  0xef   : > { %v9685_v45 = vpack.c.bf16 %v864_v12, %v863_v10  ;;  %v876_v10 = vld [vmem:[%s9076_s10 + $0x271] sm:$0xff] }
  0xf0   : > { %v1492_v12 = vld [vmem:[%s9076_s10 + $0xa] sm:$0xff] }
  0xf5   : > { %7772 = vmatmul.mubr.msk.bf16.gmra.mrb[44].mxu1 %vm359_vm1, %v9669_v30  ;;  %8070 = vmatmul.mubr.msk.bf16.gmra.mrb[12].mxu0 %vm359_vm1, %v9222_v25  ;;  %v867_v25 = vld [vmem:[%s9076_s10 + $0x219] sm:$0xff] }
  0xf6   : > { %7775 = vmatprep.mubr.msk.bf16.mxu1 %vm359_vm1, %v9671_v61  ;;  %8073 = vmatprep.mubr.msk.bf16.mxu0 %vm359_vm1, %v9226_v29  ;;  %v868_v29 = vld [vmem:[%s9076_s10 + $0x221] sm:$0xff] }
  0xf7   : > { %v9701_v55 = vpack.c.bf16 %v868_v29, %v867_v25  ;;  %v1494_v25 = vld [vmem:[%s9076_s10 + $0x1a] sm:$0xff] }
  0xfd   : > { %7776 = vmatmul.mubr.msk.bf16.gmra.mrb[48].mxu1 %vm359_vm1, %v9685_v45  ;;  %8074 = vmatmul.mubr.msk.bf16.gmra.mrb[16].mxu0 %vm359_vm1, %v9246_v42  ;;  %v871_v42 = vld [vmem:[%s9076_s10 + $0x241] sm:$0xff] }
  0xfe   : > { %7779 = vmatprep.mubr.msk.bf16.mxu1 %vm359_vm1, %v9687_v35  ;;  %8077 = vmatprep.mubr.msk.bf16.mxu0 %vm359_vm1, %v9250_v44  ;;  %v872_v44 = vld [vmem:[%s9076_s10 + $0x249] sm:$0xff] }
  0xff   : > { %v9717_v5 = vpack.c.bf16 %v872_v44, %v871_v42  ;;  %v7167_v42 = vld [vmem:[%s9076_s10 + $0x59] sm:$0xff] }
 0x100   : > { %v4951_v60 = vpack.c.bf16 %v7167_v42, %v7166_v26 }
 0x105   : > { %7780 = vmatmul.mubr.msk.bf16.gmra.mrb[52].mxu1 %vm359_vm1, %v9701_v55  ;;  %8078 = vmatmul.mubr.msk.bf16.gmra.mrb[20].mxu0 %vm359_vm1, %v9270_v58  ;;  %v875_v58 = vld [vmem:[%s9076_s10 + $0x269] sm:$0xff] }
 0x106   : > { %7783 = vmatprep.mubr.msk.bf16.mxu1 %vm359_vm1, %v9703_v51  ;;  %8081 = vmatprep.mubr.msk.bf16.mxu0 %vm359_vm1, %v9274_v0  ;;  %v1491_v0 = vld [vmem:[%s9076_s10 + $0x2] sm:$0xff]  ;;  %v9733_v43 = vpack.c.bf16 %v876_v10, %v875_v58  ;;  %v10387_v58 = vld [vmem:[#allocation13_spill] sm:$0xff] }
 0x107   : > { %v1555_v38 = vpack.c.bf16 %v1492_v12, %v1491_v0  ;;  %v7168_v10 = vld [vmem:[%s9076_s10 + $0x61] sm:$0xff]  ;;  %v7169_v0 = vld [vmem:[%s9076_s10 + $0x69] sm:$0xff]  ;;  %v7170_v12 = vld [vmem:[%s9076_s10 + $0x79] sm:$0xff] }
 0x10d   : > { %7784 = vmatmul.mubr.msk.bf16.gmra.mrb[56].mxu1 %vm359_vm1, %v9717_v5  ;;  %8082 = vmatmul.mubr.msk.bf16.gmra.mrb[24].mxu0 %vm359_vm1, %v9294_v17  ;;  %v1493_v17 = vld [vmem:[%s9076_s10 + $0x12] sm:$0xff] }
 0x10e   : > { %7787 = vmatprep.mubr.msk.bf16.mxu1 %vm359_vm1, %v9719_v28  ;;  %8085 = vmatprep.mubr.msk.bf16.mxu0 %vm359_vm1, %v9298_v20  ;;  %v1556_v29 = vpack.c.bf16 %v1494_v25, %v1493_v17  ;;  %v2367_v20 = vsel %vm456_vm0, %v9500_v56, 0  ;;  %v7131_v56 = vld [vmem:[%s9076_s10 + $0x2b8] sm:$0xff]  ;;  %v4952_v17 = vpack.c.bf16 %v7169_v0, %v7168_v10  ;;  %v6783_v0 = vld [vmem:[%s9076_s10 + $0x68] sm:$0xff] }
 0x10f   : > { %v4304_v44 = vpack.c.bf16 %v7132_v50, %v7131_v56  ;;  %v7190_v56 = vld [vmem:[%s9076_s10 + $0x141] sm:$0xff]  ;;  %v7191_v50 = vld [vmem:[%s9076_s10 + $0x149] sm:$0xff] }
 0x110   : > { %v4963_v42 = vpack.c.bf16 %v7191_v50, %v7190_v56  ;;  %v6806_v56 = vld [vmem:[%s9076_s10 + $0x150] sm:$0xff]  ;;  %v6807_v50 = vld [vmem:[%s9076_s10 + $0x158] sm:$0xff] }
 0x115   : > { %7788 = vmatmul.mubr.msk.bf16.gmra.mrb[60].mxu1 %vm359_vm1, %v9733_v43  ;;  %8086 = vmatmul.mubr.msk.bf16.gmra.mrb[28].mxu0 %vm359_vm1, %v9327_v41  ;;  %v10381_v41 = vld [vmem:[#allocation12_spill] sm:$0xff] }
 0x116   : > { %7793 = vmatprep.mubr.msk.bf16.mxu1 %vm359_vm1, %v1555_v38  ;;  %8089 = vmatprep.mubr.msk.bf16.mxu0 %vm359_vm1, %v9331_v47  ;;  %v7126_v47 = vld [vmem:[%s9076_s10 + $0x288] sm:$0xff] }
 0x117   : > { %v7171_v38 = vld [vmem:[%s9076_s10 + $0x81] sm:$0xff] }
 0x118   : > { %v4953_v25 = vpack.c.bf16 %v7171_v38, %v7170_v12  ;;  %v6785_v12 = vld [vmem:[%s9076_s10 + $0x80] sm:$0xff] }
 0x11d   : > { %7794 = vmatmul.mubr.msk.bf16.vlgmr.msra.gmra.mrb[0].mxu1 %vm359_vm1, %v1556_v29  ;;  %8090 = vmatmul.mubr.msk.bf16.gmra.mrb[32].mxu0 %vm359_vm1, %v9351_v7  ;;  %v10382_v7 = vld [vmem:[#allocation5_spill] sm:$0xff]  ;;  %v5760_v29 = vsel %vm456_vm0, %v9633_v59, 0 }
 0x11e   : > { %7858 = vmatpush3.bf16.msra.mxu1 %v2367_v20  ;;  %7797 = vmatprep.mubr.msk.bf16.mxu1 %vm359_vm1, %v9276_v2  ;;  %v10378_v2 = vld [vmem:[#allocation3_spill] sm:$0xff] }
 0x11f   : > { %8093 = vmatprep.mubr.msk.bf16.mxu0 %vm359_vm1, %v9355_v9  ;;  %8900 = vmatprep.subr.msk.bf16.mxu1 %vm456_vm0, %v9051_v1  ;;  %v10377_v1 = vld [vmem:[#allocation8_spill] sm:$0xff] }
 0x120   : > { %v7127_v9 = vld [vmem:[%s9076_s10 + $0x290] sm:$0xff] }
 0x121   : > { %v7172_v20 = vld [vmem:[%s9076_s10 + $0x89] sm:$0xff] }
 0x125   : > { %7798 = vmatmul.mubr.msk.bf16.gmra.mrb[4].mxu1 %vm359_vm1, %v9296_v18  ;;  %8094 = vmatmul.mubr.msk.bf16.gmra.mrb[36].mxu0 %vm359_vm1, %v9375_v36  ;;  %v10379_v18 = vld [vmem:[#allocation10_spill] sm:$0xff]  ;;  %v7129_v36 = vld [vmem:[%s9076_s10 + $0x2a8] sm:$0xff] }
 0x126   : > { %7801 = vmatprep.mubr.msk.bf16.mxu1 %vm359_vm1, %v9300_v21  ;;  %8097 = vmatprep.mubr.msk.bf16.mxu0 %vm359_vm1, %v9379_v53  ;;  %v10380_v21 = vld [vmem:[#allocation4_spill] sm:$0xff] }
 0x127   : > { %v7130_v53 = vld [vmem:[%s9076_s10 + $0x2b0] sm:$0xff] }
 0x12d   : > { %7802 = vmatmul.mubr.msk.bf16.gmra.mrb[8].mxu1 %vm359_vm1, %v9329_v46  ;;  %8098 = vmatmul.mubr.msk.bf16.gmra.mrb[40].mxu0 %vm359_vm1, %v9399_v23  ;;  %v7125_v46 = vld [vmem:[%s9076_s10 + $0x280] sm:$0xff] }
 0x12e   : > { %7805 = vmatprep.mubr.msk.bf16.mxu1 %vm359_vm1, %v9333_v52  ;;  %8101 = vmatprep.mubr.msk.bf16.mxu0 %vm359_vm1, %v9403_v32  ;;  %v9789_v52 = vpack.c.bf16 %v7126_v47, %v7125_v46  ;;  %v4303_v32 = vpack.c.bf16 %v7130_v53, %v7129_v36  ;;  %v7179_v46 = vld [vmem:[%s9076_s10 + $0xd1] sm:$0xff]  ;;  %v7186_v53 = vld [vmem:[%s9076_s10 + $0x119] sm:$0xff] }
 0x135   : > { %7806 = vmatmul.mubr.msk.bf16.gmra.mrb[12].mxu1 %vm359_vm1, %v9353_v8  ;;  %8102 = vmatmul.mubr.msk.bf16.gmra.mrb[44].mxu0 %vm359_vm1, %v9423_v16  ;;  %v10383_v8 = vld [vmem:[#allocation6_spill] sm:$0xff]  ;;  %v10384_v16 = vld [vmem:[#allocation7_spill] sm:$0xff] }
 0x136   : > { %7809 = vmatprep.mubr.msk.bf16.mxu1 %vm359_vm1, %v9357_v15  ;;  %8105 = vmatprep.mubr.msk.bf16.mxu0 %vm359_vm1, %v10377_v1  ;;  %v7128_v15 = vld [vmem:[%s9076_s10 + $0x298] sm:$0xff] }
 0x137   : > { %v9803_v23 = vpack.c.bf16 %v7128_v15, %v7127_v9  ;;  %v7173_v1 = vld [vmem:[%s9076_s10 + $0x91] sm:$0xff]  ;;  %v7183_v9 = vld [vmem:[%s9076_s10 + $0xf9] sm:$0xff] }
 0x138   : > { %v4954_v59 = vpack.c.bf16 %v7173_v1, %v7172_v20 }
 0x13d   : > { %7810 = vmatmul.mubr.msk.bf16.gmra.mrb[16].mxu1 %vm359_vm1, %v10378_v2  ;;  %8106 = vmatmul.mubr.msk.bf16.gmra.mrb[48].mxu0 %vm359_vm1, %v10379_v18  ;;  %v7174_v2 = vld [vmem:[%s9076_s10 + $0xa1] sm:$0xff]  ;;  %v7175_v18 = vld [vmem:[%s9076_s10 + $0xa9] sm:$0xff] }
 0x13e   : > { %7813 = vmatprep.mubr.msk.bf16.mxu1 %vm359_vm1, %v10380_v21  ;;  %8109 = vmatprep.mubr.msk.bf16.mxu0 %vm359_vm1, %v10381_v41  ;;  %v4955_v21 = vpack.c.bf16 %v7175_v18, %v7174_v2  ;;  %v7178_v41 = vld [vmem:[%s9076_s10 + $0xc9] sm:$0xff]  ;;  %v6791_v2 = vld [vmem:[%s9076_s10 + $0xb8] sm:$0xff] }
 0x13f   : > { %v6793_v18 = vld [vmem:[%s9076_s10 + $0xd0] sm:$0xff] }
 0x145   : > { %7814 = vmatmul.mubr.msk.bf16.gmra.mrb[20].mxu1 %vm359_vm1, %v10382_v7  ;;  %8110 = vmatmul.mubr.msk.bf16.gmra.mrb[52].mxu0 %vm359_vm1, %v9471_v57  ;;  %v10385_v57 = vld [vmem:[#allocation9_spill] sm:$0xff]  ;;  %v4957_v7 = vpack.c.bf16 %v7179_v46, %v7178_v41 }
 0x146   : > { %7817 = vmatprep.mubr.msk.bf16.mxu1 %vm359_vm1, %v10383_v8  ;;  %8113 = vmatprep.mubr.msk.bf16.mxu0 %vm359_vm1, %v9789_v52  ;;  %v7182_v8 = vld [vmem:[%s9076_s10 + $0xf1] sm:$0xff] }
 0x147   : > { %v4959_v36 = vpack.c.bf16 %v7183_v9, %v7182_v8 }
 0x14d   : > { %7818 = vmatmul.mubr.msk.bf16.gmra.mrb[24].mxu1 %vm359_vm1, %v10384_v16  ;;  %8114 = vmatmul.mubr.msk.bf16.gmra.mrb[56].mxu0 %vm359_vm1, %v9803_v23 }
 0x14e   : > { %7821 = vmatprep.mubr.msk.bf16.mxu1 %vm359_vm1, %v10385_v57  ;;  %8117 = vmatprep.mubr.msk.bf16.mxu0 %vm359_vm1, %v4303_v32  ;;  %v7187_v32 = vld [vmem:[%s9076_s10 + $0x121] sm:$0xff] }
 0x14f   : > { %v4961_v57 = vpack.c.bf16 %v7187_v32, %v7186_v53  ;;  %v6805_v53 = vld [vmem:[%s9076_s10 + $0x148] sm:$0xff] }
 0x150   : > { %v7226_v32 = vld [vmem:[%s9076_s10 + $0x2a9] sm:$0xff] }
 0x155   : > { %7822 = vmatmul.mubr.msk.bf16.gmra.mrb[28].mxu1 %vm359_vm1, %v10386_v62  ;;  %8118 = vmatmul.mubr.msk.bf16.gmra.mrb[60].mxu0 %vm359_vm1, %v4304_v44  ;;  %v6781_v62 = vld [vmem:[%s9076_s10 + $0x58] sm:$0xff] }
 0x156   : > { %7825 = vmatprep.mubr.msk.bf16.mxu1 %vm359_vm1, %v10387_v58  ;;  %8123 = vmatprep.mubr.msk.bf16.mxu0 %vm359_vm1, %v4951_v60 }
 0x15d   : > { %7826 = vmatmul.mubr.msk.bf16.gmra.mrb[32].mxu1 %vm359_vm1, %v9473_v4  ;;  %8124 = vmatmul.mubr.msk.bf16.vlgmr.msra.gmra.mrb[0].mxu0 %vm359_vm1, %v4952_v17  ;;  %v7177_v4 = vld [vmem:[%s9076_s10 + $0xb9] sm:$0xff] }
 0x15e   : > { %7829 = vmatprep.mubr.msk.bf16.mxu1 %vm359_vm1, %v9475_v22  ;;  %8127 = vmatprep.mubr.msk.bf16.mxu0 %vm359_vm1, %v4953_v25  ;;  %v7176_v22 = vld [vmem:[%s9076_s10 + $0xb1] sm:$0xff] }
 0x15f   : > { %8188 = vmatpush3.bf16.msra.mxu0 %v5760_v29  ;;  %v4956_v47 = vpack.c.bf16 %v7177_v4, %v7176_v22  ;;  %v6787_v25 = vld [vmem:[%s9076_s10 + $0x90] sm:$0xff]  ;;  %v6789_v29 = vld [vmem:[%s9076_s10 + $0xa8] sm:$0xff]  ;;  %v6795_v22 = vld [vmem:[%s9076_s10 + $0xe0] sm:$0xff] }
 0x160   : > { %v6797_v4 = vld [vmem:[%s9076_s10 + $0xf8] sm:$0xff] }
 0x165   : > { %7830 = vmatmul.mubr.msk.bf16.gmra.mrb[36].mxu1 %vm359_vm1, %v9490_v34  ;;  %8128 = vmatmul.mubr.msk.bf16.gmra.mrb[4].mxu0 %vm359_vm1, %v4954_v59  ;;  %v7180_v34 = vld [vmem:[%s9076_s10 + $0xd9] sm:$0xff] }
 0x166   : > { %7833 = vmatprep.mubr.msk.bf16.mxu1 %vm359_vm1, %v9494_v6  ;;  %8131 = vmatprep.mubr.msk.bf16.mxu0 %vm359_vm1, %v4955_v21  ;;  %v7181_v6 = vld [vmem:[%s9076_s10 + $0xe1] sm:$0xff] }
 0x167   : > { %v4958_v15 = vpack.c.bf16 %v7181_v6, %v7180_v34  ;;  %v7222_v34 = vld [vmem:[%s9076_s10 + $0x281] sm:$0xff]  ;;  %v7223_v6 = vld [vmem:[%s9076_s10 + $0x289] sm:$0xff] }
 0x168   : > { %v9959_v9 = vpack.c.bf16 %v7223_v6, %v7222_v34 }
 0x16d   : > { %7834 = vmatmul.mubr.msk.bf16.gmra.mrb[40].mxu1 %vm359_vm1, %v9514_v31  ;;  %8132 = vmatmul.mubr.msk.bf16.gmra.mrb[8].mxu0 %vm359_vm1, %v4956_v47  ;;  %v7184_v31 = vld [vmem:[%s9076_s10 + $0x101] sm:$0xff] }
 0x16e   : > { %7837 = vmatprep.mubr.msk.bf16.mxu1 %vm359_vm1, %v9516_v54  ;;  %8135 = vmatprep.mubr.msk.bf16.mxu0 %vm359_vm1, %v4957_v7  ;;  %v7185_v54 = vld [vmem:[%s9076_s10 + $0x109] sm:$0xff]  ;;  %v6801_v7 = vld [vmem:[%s9076_s10 + $0x120] sm:$0xff] }
 0x16f   : > { %v4960_v16 = vpack.c.bf16 %v7185_v54, %v7184_v31  ;;  %v6799_v47 = vld [vmem:[%s9076_s10 + $0x108] sm:$0xff]  ;;  %v7225_v31 = vld [vmem:[%s9076_s10 + $0x299] sm:$0xff] }
 0x170   : > { %v6804_v54 = vld [vmem:[%s9076_s10 + $0x140] sm:$0xff] }
 0x175   : > { %7838 = vmatmul.mubr.msk.bf16.gmra.mrb[44].mxu1 %vm359_vm1, %v9530_v27  ;;  %8136 = vmatmul.mubr.msk.bf16.gmra.mrb[12].mxu0 %vm359_vm1, %v4958_v15  ;;  %v7188_v27 = vld [vmem:[%s9076_s10 + $0x129] sm:$0xff] }
 0x176   : > { %7841 = vmatprep.mubr.msk.bf16.mxu1 %vm359_vm1, %v9532_v40  ;;  %8139 = vmatprep.mubr.msk.bf16.mxu0 %vm359_vm1, %v4959_v36  ;;  %v7189_v40 = vld [vmem:[%s9076_s10 + $0x131] sm:$0xff] }
 0x177   : > { %v4962_v26 = vpack.c.bf16 %v7189_v40, %v7188_v27  ;;  %v6803_v15 = vld [vmem:[%s9076_s10 + $0x130] sm:$0xff]  ;;  %v2250_v27 = vpack.c.bf16 %v6805_v53, %v6804_v54 }
 0x178   : > { %v7224_v36 = vld [vmem:[%s9076_s10 + $0x291] sm:$0xff] }
 0x179   : > { %v6825_v54 = vld [vmem:[%s9076_s10 + $0x210] sm:$0xff] }
 0x17a   : > { %v7279_v53 = vld [vmem:[%s9076_s10 + $0xf2] sm:$0xff] }
 0x17d   : > { %7842 = vmatmul.mubr.msk.bf16.gmra.mrb[48].mxu1 %vm359_vm1, %v9546_v13  ;;  %8140 = vmatmul.mubr.msk.bf16.gmra.mrb[16].mxu0 %vm359_vm1, %v4960_v16  ;;  %v7192_v13 = vld [vmem:[%s9076_s10 + $0x151] sm:$0xff] }
 0x17e   : > { %7845 = vmatprep.mubr.msk.bf16.mxu1 %vm359_vm1, %v9548_v33  ;;  %8143 = vmatprep.mubr.msk.bf16.mxu0 %vm359_vm1, %v4961_v57  ;;  %v7193_v33 = vld [vmem:[%s9076_s10 + $0x159] sm:$0xff]  ;;  %v9975_v57 = vpack.c.bf16 %v7225_v31, %v7224_v36  ;;  %v7278_v36 = vld [vmem:[%s9076_s10 + $0xe2] sm:$0xff] }
 0x17f   : > { %v4964_v44 = vpack.c.bf16 %v7193_v33, %v7192_v13  ;;  %v6808_v13 = vld [vmem:[%s9076_s10 + $0x168] sm:$0xff]  ;;  %v6809_v33 = vld [vmem:[%s9076_s10 + $0x170] sm:$0xff] }
 0x180   : > { %v6824_v31 = vld [vmem:[%s9076_s10 + $0x208] sm:$0xff] }
 0x185   : > { %7846 = vmatmul.mubr.msk.bf16.gmra.mrb[52].mxu1 %vm359_vm1, %v9562_v19  ;;  %8144 = vmatmul.mubr.msk.bf16.gmra.mrb[20].mxu0 %vm359_vm1, %v4962_v26  ;;  %v6776_v19 = vld [vmem:[%s9076_s10 + $0x28] sm:$0xff]  ;;  %v7228_v26 = vld [vmem:[%s9076_s10 + $0x2b9] sm:$0xff] }
 0x186   : > { %7849 = vmatprep.mubr.msk.bf16.mxu1 %vm359_vm1, %v9564_v24  ;;  %8147 = vmatprep.mubr.msk.bf16.mxu0 %vm359_vm1, %v4963_v42  ;;  %v6777_v24 = vld [vmem:[%s9076_s10 + $0x30] sm:$0xff]  ;;  %v7229_v42 = vld [vmem:[%s9076_s10 + $0x2c1] sm:$0xff] }
 0x187   : > { %v2236_v60 = vpack.c.bf16 %v6777_v24, %v6776_v19  ;;  %v7264_v19 = vld [vmem:[%s9076_s10 + $0x5a] sm:$0xff]  ;;  %v2251_v24 = vpack.c.bf16 %v6807_v50, %v6806_v56 }
 0x188   : > { %v6826_v56 = vld [vmem:[%s9076_s10 + $0x218] sm:$0xff]  ;;  %v6827_v50 = vld [vmem:[%s9076_s10 + $0x220] sm:$0xff] }
 0x18d   : > { %7850 = vmatmul.mubr.msk.bf16.gmra.mrb[56].mxu1 %vm359_vm1, %v9578_v37  ;;  %8148 = vmatmul.mubr.msk.bf16.gmra.mrb[24].mxu0 %vm359_vm1, %v4964_v44  ;;  %v6778_v37 = vld [vmem:[%s9076_s10 + $0x38] sm:$0xff] }
 0x18e   : > { %7853 = vmatprep.mubr.msk.bf16.mxu1 %vm359_vm1, %v9580_v39  ;;  %8151 = vmatprep.mubr.msk.bf16.mxu0 %vm359_vm1, %v9614_v3  ;;  %v6779_v39 = vld [vmem:[%s9076_s10 + $0x40] sm:$0xff]  ;;  %v6780_v3 = vld [vmem:[%s9076_s10 + $0x50] sm:$0xff] }
 0x18f   : > { %v2237_v58 = vpack.c.bf16 %v6779_v39, %v6778_v37  ;;  %v2238_v10 = vpack.c.bf16 %v6781_v62, %v6780_v3  ;;  %v7263_v44 = vld [vmem:[%s9076_s10 + $0x52] sm:$0xff]  ;;  %v2252_v37 = vpack.c.bf16 %v6809_v33, %v6808_v13  ;;  %v6811_v62 = vld [vmem:[%s9076_s10 + $0x180] sm:$0xff] }
 0x190   : > { %v5629_v39 = vpack.c.bf16 %v7264_v19, %v7263_v44  ;;  %v6810_v3 = vld [vmem:[%s9076_s10 + $0x178] sm:$0xff]  ;;  %v6828_v13 = vld [vmem:[%s9076_s10 + $0x230] sm:$0xff]  ;;  %v7284_v19 = vld [vmem:[%s9076_s10 + $0x122] sm:$0xff] }
 0x191   : > { %v6829_v33 = vld [vmem:[%s9076_s10 + $0x238] sm:$0xff] }
 0x192   : > { %v7283_v44 = vld [vmem:[%s9076_s10 + $0x11a] sm:$0xff] }
 0x195   : > { %7854 = vmatmul.mubr.msk.bf16.gmra.mrb[60].mxu1 %vm359_vm1, %v9594_v49  ;;  %8152 = vmatmul.mubr.msk.bf16.gmra.mrb[28].mxu0 %vm359_vm1, %v9637_v48  ;;  %v10388_v49 = vld [vmem:[#allocation2_spill] sm:$0xff] }
 0x196   : > { %7859 = vmatprep.mubr.msk.bf16.mxu1 %vm359_vm1, %v2236_v60  ;;  %8155 = vmatprep.mubr.msk.bf16.mxu0 %vm359_vm1, %v9639_v63  ;;  %v6782_v48 = vld [vmem:[%s9076_s10 + $0x60] sm:$0xff]  ;;  %v6784_v63 = vld [vmem:[%s9076_s10 + $0x78] sm:$0xff]  ;;  %v4982_v60 = vpack.c.bf16 %v7229_v42, %v7228_v26  ;;  %v7282_v42 = vld [vmem:[%s9076_s10 + $0x10a] sm:$0xff] }
 0x197   : > { %v2239_v38 = vpack.c.bf16 %v6783_v0, %v6782_v48  ;;  %v2240_v17 = vpack.c.bf16 %v6785_v12, %v6784_v63  ;;  %v6813_v48 = vld [vmem:[%s9076_s10 + $0x198] sm:$0xff]  ;;  %v7268_v63 = vld [vmem:[%s9076_s10 + $0x82] sm:$0xff]  ;;  %v2253_v12 = vpack.c.bf16 %v6811_v62, %v6810_v3 }
 0x198   : > { %v7267_v0 = vld [vmem:[%s9076_s10 + $0x7a] sm:$0xff]  ;;  %v7281_v26 = vld [vmem:[%s9076_s10 + $0x102] sm:$0xff] }
 0x199   : > { %v6830_v3 = vld [vmem:[%s9076_s10 + $0x240] sm:$0xff]  ;;  %v6831_v62 = vld [vmem:[%s9076_s10 + $0x248] sm:$0xff] }
 0x19d   : > { %7860 = vmatmul.mubr.msk.bf16.vlgmr.msra.gmra.mrb[0].mxu1 %vm359_vm1, %v2237_v58  ;;  %8156 = vmatmul.mubr.msk.bf16.gmra.mrb[32].mxu0 %vm359_vm1, %v9653_v11  ;;  %v6786_v11 = vld [vmem:[%s9076_s10 + $0x88] sm:$0xff] }
 0x19e   : > { %8254 = vmatpush3.bf16.msra.mxu1 %v10388_v49  ;;  %7863 = vmatprep.mubr.msk.bf16.mxu1 %vm359_vm1, %v2238_v10  ;;  %v2241_v20 = vpack.c.bf16 %v6787_v25, %v6786_v11  ;;  %v7265_v58 = vld [vmem:[%s9076_s10 + $0x62] sm:$0xff]  ;;  %v7266_v10 = vld [vmem:[%s9076_s10 + $0x6a] sm:$0xff]  ;;  %v5631_v11 = vpack.c.bf16 %v7268_v63, %v7267_v0 }
 0x19f   : > { %8159 = vmatprep.mubr.msk.bf16.mxu0 %vm359_vm1, %v9655_v14  ;;  %v6788_v14 = vld [vmem:[%s9076_s10 + $0xa0] sm:$0xff]  ;;  %v6812_v49 = vld [vmem:[%s9076_s10 + $0x190] sm:$0xff] }
 0x1a0   : > { %v2242_v1 = vpack.c.bf16 %v6789_v29, %v6788_v14  ;;  %v6814_v25 = vld [vmem:[%s9076_s10 + $0x1a0] sm:$0xff]  ;;  %v6815_v14 = vld [vmem:[%s9076_s10 + $0x1a8] sm:$0xff] }
 0x1a1   : > { %v7269_v29 = vld [vmem:[%s9076_s10 + $0x8a] sm:$0xff]  ;;  %v7287_v0 = vld [vmem:[%s9076_s10 + $0x142] sm:$0xff] }
 0x1a2   : > { %v7288_v63 = vld [vmem:[%s9076_s10 + $0x14a] sm:$0xff] }
 0x1a5   : > { %7864 = vmatmul.mubr.msk.bf16.gmra.mrb[4].mxu1 %vm359_vm1, %v2239_v38  ;;  %8160 = vmatmul.mubr.msk.bf16.gmra.mrb[36].mxu0 %vm359_vm1, %v9669_v30  ;;  %v6790_v30 = vld [vmem:[%s9076_s10 + $0xb0] sm:$0xff]  ;;  %v5630_v38 = vpack.c.bf16 %v7266_v10, %v7265_v58 }
 0x1a6   : > { %7867 = vmatprep.mubr.msk.bf16.mxu1 %vm359_vm1, %v2240_v17  ;;  %8163 = vmatprep.mubr.msk.bf16.mxu0 %vm359_vm1, %v9671_v61  ;;  %v6792_v61 = vld [vmem:[%s9076_s10 + $0xc8] sm:$0xff]  ;;  %v2243_v59 = vpack.c.bf16 %v6791_v2, %v6790_v30  ;;  %v2254_v17 = vpack.c.bf16 %v6813_v48, %v6812_v49  ;;  %v6817_v30 = vld [vmem:[%s9076_s10 + $0x1c0] sm:$0xff]  ;;  %v7286_v10 = vld [vmem:[%s9076_s10 + $0x132] sm:$0xff] }
 0x1a7   : > { %v2244_v21 = vpack.c.bf16 %v6793_v18, %v6792_v61  ;;  %v7271_v2 = vld [vmem:[%s9076_s10 + $0xa2] sm:$0xff]  ;;  %v7272_v61 = vld [vmem:[%s9076_s10 + $0xaa] sm:$0xff]  ;;  %v2255_v18 = vpack.c.bf16 %v6815_v14, %v6814_v25  ;;  %v6832_v49 = vld [vmem:[%s9076_s10 + $0x258] sm:$0xff] }
 0x1a8   : > { %v7285_v58 = vld [vmem:[%s9076_s10 + $0x12a] sm:$0xff]  ;;  %v6833_v48 = vld [vmem:[%s9076_s10 + $0x260] sm:$0xff] }
 0x1a9   : > { %v6834_v25 = vld [vmem:[%s9076_s10 + $0x268] sm:$0xff]  ;;  %v6835_v14 = vld [vmem:[%s9076_s10 + $0x270] sm:$0xff] }
 0x1ad   : > { %7868 = vmatmul.mubr.msk.bf16.gmra.mrb[8].mxu1 %vm359_vm1, %v2241_v20  ;;  %8164 = vmatmul.mubr.msk.bf16.gmra.mrb[40].mxu0 %vm359_vm1, %v9685_v45  ;;  %v6794_v45 = vld [vmem:[%s9076_s10 + $0xd8] sm:$0xff] }
 0x1ae   : > { %7871 = vmatprep.mubr.msk.bf16.mxu1 %vm359_vm1, %v2242_v1  ;;  %8167 = vmatprep.mubr.msk.bf16.mxu0 %vm359_vm1, %v9687_v35  ;;  %v6796_v35 = vld [vmem:[%s9076_s10 + $0xf0] sm:$0xff]  ;;  %v2245_v41 = vpack.c.bf16 %v6795_v22, %v6794_v45  ;;  %v6816_v1 = vld [vmem:[%s9076_s10 + $0x1b8] sm:$0xff]  ;;  %v5633_v45 = vpack.c.bf16 %v7272_v61, %v7271_v2  ;;  %v6818_v22 = vld [vmem:[%s9076_s10 + $0x1c8] sm:$0xff]  ;;  %v2265_v2 = vpack.c.bf16 %v6835_v14, %v6834_v25 }
 0x1af   : > { %v2246_v46 = vpack.c.bf16 %v6797_v4, %v6796_v35  ;;  %v7270_v20 = vld [vmem:[%s9076_s10 + $0x92] sm:$0xff] }
 0x1b0   : > { %v6819_v35 = vld [vmem:[%s9076_s10 + $0x1d0] sm:$0xff] }
 0x1b1   : > { %v7273_v4 = vld [vmem:[%s9076_s10 + $0xb2] sm:$0xff] }
 0x1b5   : > { %7872 = vmatmul.mubr.msk.bf16.gmra.mrb[12].mxu1 %vm359_vm1, %v2243_v59  ;;  %8168 = vmatmul.mubr.msk.bf16.gmra.mrb[44].mxu0 %vm359_vm1, %v9701_v55  ;;  %v6798_v55 = vld [vmem:[%s9076_s10 + $0x100] sm:$0xff]  ;;  %v5632_v59 = vpack.c.bf16 %v7270_v20, %v7269_v29  ;;  %v7289_v29 = vld [vmem:[%s9076_s10 + $0x152] sm:$0xff] }
 0x1b6   : > { %7875 = vmatprep.mubr.msk.bf16.mxu1 %vm359_vm1, %v2244_v21  ;;  %8171 = vmatprep.mubr.msk.bf16.mxu0 %vm359_vm1, %v9703_v51  ;;  %v6800_v51 = vld [vmem:[%s9076_s10 + $0x118] sm:$0xff]  ;;  %v2247_v8 = vpack.c.bf16 %v6799_v47, %v6798_v55  ;;  %v2256_v21 = vpack.c.bf16 %v6817_v30, %v6816_v1  ;;  %v6821_v55 = vld [vmem:[%s9076_s10 + $0x1e8] sm:$0xff] }
 0x1b7   : > { %v7275_v47 = vld [vmem:[%s9076_s10 + $0xca] sm:$0xff]  ;;  %v7290_v20 = vld [vmem:[%s9076_s10 + $0x15a] sm:$0xff]  ;;  %v7292_v30 = vld [vmem:[%s9076_s10 + $0x172] sm:$0xff] }
 0x1b8   : > { %v7291_v1 = vld [vmem:[%s9076_s10 + $0x16a] sm:$0xff]  ;;  %v5642_v61 = vpack.c.bf16 %v7290_v20, %v7289_v29 }
 0x1bd   : > { %7876 = vmatmul.mubr.msk.bf16.gmra.mrb[16].mxu1 %vm359_vm1, %v2245_v41  ;;  %8172 = vmatmul.mubr.msk.bf16.gmra.mrb[48].mxu0 %vm359_vm1, %v9717_v5  ;;  %v2248_v5 = vpack.c.bf16 %v6801_v7, %v6800_v51  ;;  %v7274_v41 = vld [vmem:[%s9076_s10 + $0xba] sm:$0xff]  ;;  %v7276_v51 = vld [vmem:[%s9076_s10 + $0xd2] sm:$0xff]  ;;  %v2257_v7 = vpack.c.bf16 %v6819_v35, %v6818_v22 }
 0x1be   : > { %7879 = vmatprep.mubr.msk.bf16.mxu1 %vm359_vm1, %v2246_v46  ;;  %8175 = vmatprep.mubr.msk.bf16.mxu0 %vm359_vm1, %v9719_v28  ;;  %v6802_v28 = vld [vmem:[%s9076_s10 + $0x128] sm:$0xff]  ;;  %v6820_v46 = vld [vmem:[%s9076_s10 + $0x1e0] sm:$0xff]  ;;  %v5634_v34 = vpack.c.bf16 %v7274_v41, %v7273_v4  ;;  %v6906_v22 = vld [vmem:[%s9076_s10 + $0x171] sm:$0xff] }
 0x1bf   : > { %v2249_v16 = vpack.c.bf16 %v6803_v15, %v6802_v28  ;;  %v2258_v6 = vpack.c.bf16 %v6821_v55, %v6820_v46  ;;  %v6823_v28 = vld [vmem:[%s9076_s10 + $0x1f8] sm:$0xff] }
 0x1c0   : > { %v7277_v15 = vld [vmem:[%s9076_s10 + $0xda] sm:$0xff]  ;;  %v7295_v35 = vld [vmem:[%s9076_s10 + $0x192] sm:$0xff] }
 0x1c1   : > { %v7296_v4 = vld [vmem:[%s9076_s10 + $0x19a] sm:$0xff] }
 0x1c2   : > { %v5645_v55 = vpack.c.bf16 %v7296_v4, %v7295_v35 }
 0x1c5   : > { %7880 = vmatmul.mubr.msk.bf16.gmra.mrb[20].mxu1 %vm359_vm1, %v2247_v8  ;;  %8176 = vmatmul.mubr.msk.bf16.gmra.mrb[52].mxu0 %vm359_vm1, %v9733_v43  ;;  %v7227_v43 = vld [vmem:[%s9076_s10 + $0x2b1] sm:$0xff]  ;;  %v5635_v8 = vpack.c.bf16 %v7276_v51, %v7275_v47  ;;  %v6908_v47 = vld [vmem:[%s9076_s10 + $0x181] sm:$0xff] }
 0x1c6   : > { %7883 = vmatprep.mubr.msk.bf16.mxu1 %vm359_vm1, %v2248_v5  ;;  %8179 = vmatprep.mubr.msk.bf16.mxu0 %vm359_vm1, %v9959_v9  ;;  %v4981_v40 = vpack.c.bf16 %v7227_v43, %v7226_v32  ;;  %v6822_v5 = vld [vmem:[%s9076_s10 + $0x1f0] sm:$0xff]  ;;  %v7280_v32 = vld [vmem:[%s9076_s10 + $0xfa] sm:$0xff]  ;;  %v7297_v51 = vld [vmem:[%s9076_s10 + $0x1a2] sm:$0xff] }
 0x1c7   : > { %v2259_v43 = vpack.c.bf16 %v6823_v28, %v6822_v5 }
 0x1cd   : > { %7884 = vmatmul.mubr.msk.bf16.gmra.mrb[24].mxu1 %vm359_vm1, %v2249_v16  ;;  %8180 = vmatmul.mubr.msk.bf16.gmra.mrb[56].mxu0 %vm359_vm1, %v9975_v57  ;;  %v5636_v16 = vpack.c.bf16 %v7278_v36, %v7277_v15 }
 0x1ce   : > { %7887 = vmatprep.mubr.msk.bf16.mxu1 %vm359_vm1, %v2250_v27  ;;  %8183 = vmatprep.mubr.msk.bf16.mxu0 %vm359_vm1, %v4981_v40  ;;  %v2260_v27 = vpack.c.bf16 %v6825_v54, %v6824_v31  ;;  %v5637_v40 = vpack.c.bf16 %v7280_v32, %v7279_v53  ;;  %v6911_v31 = vld [vmem:[%s9076_s10 + $0x1a1] sm:$0xff]  ;;  %v6912_v54 = vld [vmem:[%s9076_s10 + $0x1a9] sm:$0xff]  ;;  %v7302_v32 = vld [vmem:[%s9076_s10 + $0x1d2] sm:$0xff] }
 0x1cf   : > { %v7301_v53 = vld [vmem:[%s9076_s10 + $0x1ca] sm:$0xff] }
 0x1d5   : > { %7888 = vmatmul.mubr.msk.bf16.gmra.mrb[28].mxu1 %vm359_vm1, %v2251_v24  ;;  %8184 = vmatmul.mubr.msk.bf16.gmra.mrb[60].mxu0 %vm359_vm1, %v4982_v60  ;;  %v2261_v24 = vpack.c.bf16 %v6827_v50, %v6826_v56  ;;  %v5638_v60 = vpack.c.bf16 %v7282_v42, %v7281_v26  ;;  %v2933_v56 = vpack.c.bf16 %v6912_v54, %v6911_v31  ;;  %v7321_v31 = vld [vmem:[%s9076_s10 + $0x292] sm:$0xff]  ;;  %v7322_v54 = vld [vmem:[%s9076_s10 + $0x29a] sm:$0xff] }
 0x1d6   : > { %7891 = vmatprep.mubr.msk.bf16.mxu1 %vm359_vm1, %v2252_v37  ;;  %8189 = vmatprep.mubr.msk.bf16.mxu0 %vm359_vm1, %v5629_v39  ;;  %v2262_v37 = vpack.c.bf16 %v6829_v33, %v6828_v13  ;;  %v5639_v39 = vpack.c.bf16 %v7284_v19, %v7283_v44  ;;  %v5648_v50 = vpack.c.bf16 %v7302_v32, %v7301_v53  ;;  %v6915_v13 = vld [vmem:[%s9076_s10 + $0x1c9] sm:$0xff]  ;;  %v6916_v33 = vld [vmem:[%s9076_s10 + $0x1d1] sm:$0xff]  ;;  %v7306_v19 = vld [vmem:[%s9076_s10 + $0x1fa] sm:$0xff] }
 0x1d7   : > { %v7305_v44 = vld [vmem:[%s9076_s10 + $0x1f2] sm:$0xff]  ;;  %v7323_v53 = vld [vmem:[%s9076_s10 + $0x2aa] sm:$0xff] }
 0x1d8   : > { %v7324_v32 = vld [vmem:[%s9076_s10 + $0x2b2] sm:$0xff] }
 0x1dd   : > { %7892 = vmatmul.mubr.msk.bf16.gmra.mrb[32].mxu1 %vm359_vm1, %v2253_v12  ;;  %8190 = vmatmul.mubr.msk.bf16.vlgmr.msra.gmra.mrb[0].mxu0 %vm359_vm1, %v5630_v38  ;;  %v2263_v12 = vpack.c.bf16 %v6831_v62, %v6830_v3  ;;  %v5640_v38 = vpack.c.bf16 %v7286_v10, %v7285_v58  ;;  %v2935_v3 = vpack.c.bf16 %v6916_v33, %v6915_v13 }
 0x1de   : > { %7895 = vmatprep.mubr.msk.bf16.mxu1 %vm359_vm1, %v2254_v17  ;;  %8193 = vmatprep.mubr.msk.bf16.mxu0 %vm359_vm1, %v5631_v11  ;;  %v2264_v17 = vpack.c.bf16 %v6833_v48, %v6832_v49  ;;  %v5641_v11 = vpack.c.bf16 %v7288_v63, %v7287_v0  ;;  %v5650_v62 = vpack.c.bf16 %v7306_v19, %v7305_v44  ;;  %v6919_v49 = vld [vmem:[%s9076_s10 + $0x1f1] sm:$0xff]  ;;  %v6920_v48 = vld [vmem:[%s9076_s10 + $0x1f9] sm:$0xff]  ;;  %v7310_v63 = vld [vmem:[%s9076_s10 + $0x222] sm:$0xff] }
 0x1df   : > { %v7309_v0 = vld [vmem:[%s9076_s10 + $0x21a] sm:$0xff]  ;;  %v2937_v25 = vpack.c.bf16 %v6920_v48, %v6919_v49 }
 0x1e0   : > { %v5652_v14 = vpack.c.bf16 %v7310_v63, %v7309_v0 }
 0x1e5   : > { %7896 = vmatmul.mubr.msk.bf16.gmra.mrb[36].mxu1 %vm359_vm1, %v2255_v18  ;;  %8194 = vmatmul.mubr.msk.bf16.gmra.mrb[4].mxu0 %vm359_vm1, %v5632_v59  ;;  %v5643_v18 = vpack.c.bf16 %v7292_v30, %v7291_v1  ;;  %v7293_v59 = vld [vmem:[%s9076_s10 + $0x17a] sm:$0xff] }
 0x1e6   : > { %7899 = vmatprep.mubr.msk.bf16.mxu1 %vm359_vm1, %v2256_v21  ;;  %8197 = vmatprep.mubr.msk.bf16.mxu0 %vm359_vm1, %v5633_v45  ;;  %v7294_v21 = vld [vmem:[%s9076_s10 + $0x182] sm:$0xff]  ;;  %v6923_v1 = vld [vmem:[%s9076_s10 + $0x219] sm:$0xff] }
 0x1e7   : > { %v6905_v45 = vld [vmem:[%s9076_s10 + $0x169] sm:$0xff]  ;;  %v5644_v41 = vpack.c.bf16 %v7294_v21, %v7293_v59  ;;  %v6924_v30 = vld [vmem:[%s9076_s10 + $0x221] sm:$0xff]  ;;  %v6926_v59 = vld [vmem:[%s9076_s10 + $0x239] sm:$0xff] }
 0x1e8   : > { %v2930_v46 = vpack.c.bf16 %v6906_v22, %v6905_v45  ;;  %v7315_v21 = vld [vmem:[%s9076_s10 + $0x25a] sm:$0xff]  ;;  %v7316_v45 = vld [vmem:[%s9076_s10 + $0x262] sm:$0xff]  ;;  %v2939_v22 = vpack.c.bf16 %v6924_v30, %v6923_v1 }
 0x1ed   : > { %7900 = vmatmul.mubr.msk.bf16.gmra.mrb[40].mxu1 %vm359_vm1, %v2257_v7  ;;  %8198 = vmatmul.mubr.msk.bf16.gmra.mrb[8].mxu0 %vm359_vm1, %v5634_v34  ;;  %v7298_v7 = vld [vmem:[%s9076_s10 + $0x1aa] sm:$0xff] }
 0x1ee   : > { %7903 = vmatprep.mubr.msk.bf16.mxu1 %vm359_vm1, %v2258_v6  ;;  %8201 = vmatprep.mubr.msk.bf16.mxu0 %vm359_vm1, %v5635_v8  ;;  %v6909_v34 = vld [vmem:[%s9076_s10 + $0x191] sm:$0xff]  ;;  %v6910_v6 = vld [vmem:[%s9076_s10 + $0x199] sm:$0xff]  ;;  %v5646_v28 = vpack.c.bf16 %v7298_v7, %v7297_v51  ;;  %v6930_v7 = vld [vmem:[%s9076_s10 + $0x261] sm:$0xff] }
 0x1ef   : > { %v7299_v8 = vld [vmem:[%s9076_s10 + $0x1ba] sm:$0xff]  ;;  %v2932_v15 = vpack.c.bf16 %v6910_v6, %v6909_v34  ;;  %v7319_v34 = vld [vmem:[%s9076_s10 + $0x282] sm:$0xff]  ;;  %v7320_v6 = vld [vmem:[%s9076_s10 + $0x28a] sm:$0xff] }
 0x1f0   : > { %v6929_v51 = vld [vmem:[%s9076_s10 + $0x259] sm:$0xff] }
 0x1f5   : > { %7904 = vmatmul.mubr.msk.bf16.gmra.mrb[44].mxu1 %vm359_vm1, %v2259_v43  ;;  %8202 = vmatmul.mubr.msk.bf16.gmra.mrb[12].mxu0 %vm359_vm1, %v5636_v16  ;;  %v6913_v43 = vld [vmem:[%s9076_s10 + $0x1b9] sm:$0xff]  ;;  %v6914_v16 = vld [vmem:[%s9076_s10 + $0x1c1] sm:$0xff] }
 0x1f6   : > { %7907 = vmatprep.mubr.msk.bf16.mxu1 %vm359_vm1, %v2260_v27  ;;  %8205 = vmatprep.mubr.msk.bf16.mxu0 %vm359_vm1, %v5637_v40  ;;  %v7303_v27 = vld [vmem:[%s9076_s10 + $0x1e2] sm:$0xff]  ;;  %v7304_v40 = vld [vmem:[%s9076_s10 + $0x1ea] sm:$0xff]  ;;  %v2934_v26 = vpack.c.bf16 %v6914_v16, %v6913_v43  ;;  %v5658_v16 = vpack.c.bf16 %v7322_v54, %v7321_v31 }
 0x1f7   : > { %v5649_v42 = vpack.c.bf16 %v7304_v40, %v7303_v27  ;;  %v5659_v27 = vpack.c.bf16 %v7324_v32, %v7323_v53  ;;  %v7325_v40 = vld [vmem:[%s9076_s10 + $0x2ba] sm:$0xff] }
 0x1fd   : > { %7908 = vmatmul.mubr.msk.bf16.gmra.mrb[48].mxu1 %vm359_vm1, %v2261_v24  ;;  %8206 = vmatmul.mubr.msk.bf16.gmra.mrb[16].mxu0 %vm359_vm1, %v5638_v60  ;;  %v6917_v24 = vld [vmem:[%s9076_s10 + $0x1e1] sm:$0xff]  ;;  %v6918_v60 = vld [vmem:[%s9076_s10 + $0x1e9] sm:$0xff] }
 0x1fe   : > { %7911 = vmatprep.mubr.msk.bf16.mxu1 %vm359_vm1, %v2262_v37  ;;  %8209 = vmatprep.mubr.msk.bf16.mxu0 %vm359_vm1, %v5639_v39  ;;  %v7307_v37 = vld [vmem:[%s9076_s10 + $0x20a] sm:$0xff]  ;;  %v7308_v39 = vld [vmem:[%s9076_s10 + $0x212] sm:$0xff]  ;;  %v2936_v58 = vpack.c.bf16 %v6918_v60, %v6917_v24 }
 0x1ff   : > { %v5651_v10 = vpack.c.bf16 %v7308_v39, %v7307_v37 }
 0x205   : > { %7912 = vmatmul.mubr.msk.bf16.gmra.mrb[52].mxu1 %vm359_vm1, %v2263_v12  ;;  %8210 = vmatmul.mubr.msk.bf16.gmra.mrb[20].mxu0 %vm359_vm1, %v5640_v38  ;;  %v6921_v12 = vld [vmem:[%s9076_s10 + $0x209] sm:$0xff]  ;;  %v6922_v38 = vld [vmem:[%s9076_s10 + $0x211] sm:$0xff] }
 0x206   : > { %7915 = vmatprep.mubr.msk.bf16.mxu1 %vm359_vm1, %v2264_v17  ;;  %8213 = vmatprep.mubr.msk.bf16.mxu0 %vm359_vm1, %v5641_v11  ;;  %v7311_v17 = vld [vmem:[%s9076_s10 + $0x232] sm:$0xff]  ;;  %v7312_v11 = vld [vmem:[%s9076_s10 + $0x23a] sm:$0xff]  ;;  %v2938_v29 = vpack.c.bf16 %v6922_v38, %v6921_v12 }
 0x207   : > { %v5653_v20 = vpack.c.bf16 %v7312_v11, %v7311_v17 }
 0x20d   : > { %7916 = vmatmul.mubr.msk.bf16.gmra.mrb[56].mxu1 %vm359_vm1, %v2265_v2  ;;  %8214 = vmatmul.mubr.msk.bf16.gmra.mrb[24].mxu0 %vm359_vm1, %v5642_v61  ;;  %v7313_v2 = vld [vmem:[%s9076_s10 + $0x242] sm:$0xff]  ;;  %v7314_v61 = vld [vmem:[%s9076_s10 + $0x24a] sm:$0xff] }
 0x20e   : > { %7919 = vmatprep.mubr.msk.bf16.mxu1 %vm359_vm1, %v9789_v52  ;;  %8217 = vmatprep.mubr.msk.bf16.mxu0 %vm359_vm1, %v5643_v18  ;;  %v6907_v52 = vld [vmem:[%s9076_s10 + $0x179] sm:$0xff]  ;;  %v6925_v18 = vld [vmem:[%s9076_s10 + $0x231] sm:$0xff]  ;;  %v5654_v35 = vpack.c.bf16 %v7314_v61, %v7313_v2 }
 0x20f   : > { %v2931_v5 = vpack.c.bf16 %v6908_v47, %v6907_v52  ;;  %v2940_v4 = vpack.c.bf16 %v6926_v59, %v6925_v18  ;;  %v7317_v52 = vld [vmem:[%s9076_s10 + $0x26a] sm:$0xff]  ;;  %v7318_v47 = vld [vmem:[%s9076_s10 + $0x272] sm:$0xff] }
 0x215   : > { %7920 = vmatmul.mubr.msk.bf16.gmra.mrb[60].mxu1 %vm359_vm1, %v9803_v23  ;;  %8218 = vmatmul.mubr.msk.bf16.gmra.mrb[28].mxu0 %vm359_vm1, %v5644_v41  ;;  %v7300_v23 = vld [vmem:[%s9076_s10 + $0x1c2] sm:$0xff]  ;;  %v5655_v41 = vpack.c.bf16 %v7316_v45, %v7315_v21 }
 0x216   : > { %7957 = vmatprep.mubr.msk.bf16.mxu1 %vm359_vm1, %v2930_v46  ;;  %8221 = vmatprep.mubr.msk.bf16.mxu0 %vm359_vm1, %v5645_v55  ;;  %v5647_v36 = vpack.c.bf16 %v7300_v23, %v7299_v8  ;;  %v6927_v46 = vld [vmem:[%s9076_s10 + $0x241] sm:$0xff]  ;;  %v6928_v55 = vld [vmem:[%s9076_s10 + $0x249] sm:$0xff]  ;;  %v5656_v23 = vpack.c.bf16 %v7318_v47, %v7317_v52 }
 0x217   : > { %v2941_v8 = vpack.c.bf16 %v6928_v55, %v6927_v46 }
 0x21d   : > { %7958 = vmatmul.mubr.msk.bf16.vlgmr.msra.gmra.mrb[32].mxu1 %vm359_vm1, %v2931_v5  ;;  %8222 = vmatmul.mubr.msk.bf16.gmra.mrb[32].mxu0 %vm359_vm1, %v5646_v28  ;;  %v2942_v5 = vpack.c.bf16 %v6930_v7, %v6929_v51  ;;  %v5657_v28 = vpack.c.bf16 %v7320_v6, %v7319_v34 }
 0x21e   : > { %7961 = vmatprep.mubr.msk.bf16.mxu1 %vm359_vm1, %v2932_v15  ;;  %8225 = vmatprep.mubr.msk.bf16.mxu0 %vm359_vm1, %v5647_v36  ;;  %v6931_v15 = vld [vmem:[%s9076_s10 + $0x269] sm:$0xff]  ;;  %v6932_v36 = vld [vmem:[%s9076_s10 + $0x271] sm:$0xff] }
 0x21f   : > { %v2943_v43 = vpack.c.bf16 %v6932_v36, %v6931_v15 }
 0x225   : > { %7962 = vmatmul.mubr.msk.bf16.gmra.mrb[36].mxu1 %vm359_vm1, %v2933_v56  ;;  %8226 = vmatmul.mubr.msk.bf16.gmra.mrb[36].mxu0 %vm359_vm1, %v5648_v50  ;;  %v7326_v56 = vld [vmem:[%s9076_s10 + $0x2c2] sm:$0xff] }
 0x226   : > { %7965 = vmatprep.mubr.msk.bf16.mxu1 %vm359_vm1, %v2934_v26  ;;  %8229 = vmatprep.mubr.msk.bf16.mxu0 %vm359_vm1, %v5649_v42  ;;  %v5660_v50 = vpack.c.bf16 %v7326_v56, %v7325_v40 }
 0x22d   : > { %7966 = vmatmul.mubr.msk.bf16.gmra.mrb[40].mxu1 %vm359_vm1, %v2935_v3  ;;  %8230 = vmatmul.mubr.msk.bf16.gmra.mrb[40].mxu0 %vm359_vm1, %v5650_v62 }
 0x22e   : > { %7969 = vmatprep.mubr.msk.bf16.mxu1 %vm359_vm1, %v2936_v58  ;;  %8233 = vmatprep.mubr.msk.bf16.mxu0 %vm359_vm1, %v5651_v10 }
 0x235   : > { %7970 = vmatmul.mubr.msk.bf16.gmra.mrb[44].mxu1 %vm359_vm1, %v2937_v25  ;;  %8234 = vmatmul.mubr.msk.bf16.gmra.mrb[44].mxu0 %vm359_vm1, %v5652_v14 }
 0x236   : > { %7973 = vmatprep.mubr.msk.bf16.mxu1 %vm359_vm1, %v2938_v29  ;;  %8237 = vmatprep.mubr.msk.bf16.mxu0 %vm359_vm1, %v5653_v20 }
 0x23d   : > { %7974 = vmatmul.mubr.msk.bf16.gmra.mrb[48].mxu1 %vm359_vm1, %v2939_v22  ;;  %8238 = vmatmul.mubr.msk.bf16.gmra.mrb[48].mxu0 %vm359_vm1, %v5654_v35 }
 0x23e   : > { %7977 = vmatprep.mubr.msk.bf16.mxu1 %vm359_vm1, %v2940_v4  ;;  %8241 = vmatprep.mubr.msk.bf16.mxu0 %vm359_vm1, %v5655_v41 }
 0x245   : > { %7978 = vmatmul.mubr.msk.bf16.gmra.mrb[52].mxu1 %vm359_vm1, %v2941_v8  ;;  %8242 = vmatmul.mubr.msk.bf16.gmra.mrb[52].mxu0 %vm359_vm1, %v5656_v23 }
 0x246   : > { %7981 = vmatprep.mubr.msk.bf16.mxu1 %vm359_vm1, %v2942_v5  ;;  %8245 = vmatprep.mubr.msk.bf16.mxu0 %vm359_vm1, %v5657_v28 }
 0x24d   : > { %7982 = vmatmul.mubr.msk.bf16.gmra.mrb[56].mxu1 %vm359_vm1, %v2943_v43  ;;  %8246 = vmatmul.mubr.msk.bf16.gmra.mrb[56].mxu0 %vm359_vm1, %v5658_v16 }
 0x24e   : > { %7985 = vmatprep.mubr.msk.bf16.mxu1 %vm359_vm1, %v9959_v9  ;;  %8249 = vmatprep.mubr.msk.bf16.mxu0 %vm359_vm1, %v5659_v27 }
 0x255   : > { %7986 = vmatmul.mubr.msk.bf16.gmra.mrb[60].mxu1 %vm359_vm1, %v9975_v57  ;;  %8250 = vmatmul.mubr.msk.bf16.gmra.mrb[60].mxu0 %vm359_vm1, %v5660_v50 }
 0x270   : > { %v7861_v26 = vpop.f32.mrb[0].mxu1 }
 0x271   : > { %v2403_v42 = vpop.f32.mrb[1].mxu1 }
 0x272   : > { %v7862_v13 = vpop.f32.mrb[2].mxu1 }
 0x273   : > { %v2406_v33 = vpop.f32.mrb[3].mxu1 }
 0x278   : > { %v7865_v44 = vpop.f32.mrb[4].mxu1 }
 0x279   : > { %v2419_v19 = vpop.f32.mrb[5].mxu1 }
 0x27a   : > { %v7866_v24 = vpop.f32.mrb[6].mxu1 }
 0x27b   : > { %v10176_v60 = vpop.f32.mrb[7].mxu1 }
 0x280   : > { %v10178_v9 = vpop.f32.mrb[8].mxu1 }
 0x281   : > { %v10180_v37 = vpop.f32.mrb[9].mxu1 }
 0x282   : > { %v10182_v39 = vpop.f32.mrb[10].mxu1 }
 0x283   : > { %v10184_v57 = vpop.f32.mrb[11].mxu1 }
 0x288   : > { %v10186_v3 = vpop.f32.mrb[12].mxu1 }
 0x289   : > { %v10188_v62 = vpop.f32.mrb[13].mxu1 }
 0x28a   : > { %v10190_v58 = vpop.f32.mrb[14].mxu1 }
 0x28b   : > { %v10192_v10 = vpop.f32.mrb[15].mxu1 }
 0x290   : > { %v10194_v49 = vpop.f32.mrb[16].mxu1 }
 0x291   : > { %v10196_v48 = vpop.f32.mrb[17].mxu1 }
 0x292   : > { %v10198_v0 = vpop.f32.mrb[18].mxu1 }
 0x293   : > { %v10200_v63 = vpop.f32.mrb[19].mxu1 }
 0x298   : > { %v10202_v12 = vpop.f32.mrb[20].mxu1 }
 0x299   : > { %v10204_v38 = vpop.f32.mrb[21].mxu1 }
 0x29a   : > { %v10206_v17 = vpop.f32.mrb[22].mxu1 }
 0x29b   : > { %v10208_v11 = vpop.f32.mrb[23].mxu1 }
 0x2a0   : > { %v10214_v25 = vpop.f32.mrb[24].mxu1 }
 0x2a1   : > { %v10216_v14 = vpop.f32.mrb[25].mxu1 }
 0x2a2   : > { %v10218_v29 = vpop.f32.mrb[26].mxu1 }
 0x2a3   : > { %v10221_v20 = vpop.f32.mrb[27].mxu1 }
 0x2a8   : > { %v10223_v1 = vpop.f32.mrb[28].mxu1 }
 0x2a9   : > { %v10225_v30 = vpop.f32.mrb[29].mxu1 }
 0x2aa   : > { %v10227_v2 = vpop.f32.mrb[30].mxu1 }
 0x2ab   : > { %v10229_v61 = vpop.f32.mrb[31].mxu1 }
 0x2b0   : > { %v8191_v18 = vpop.f32.mrb[0].mxu0 }
 0x2b1   : > { %v8257_v59 = vadd.f32 %v8191_v18, %v7861_v26  ;;  %v5796_v21 = vpop.f32.mrb[1].mxu0 }
 0x2b2   : > { %v8260_v45 = vadd.f32 %v5796_v21, %v2403_v42  ;;  %v8192_v22 = vpop.f32.mrb[2].mxu0 }
 0x2b3   : > { %6181 = vst [vmem:[%s10234_s6 + $0x10] sm:$0xff] %v8257_v59  ;;  %v8263_v35 = vadd.f32 %v8192_v22, %v7862_v13  ;;  %v5799_v4 = vpop.f32.mrb[3].mxu0  ;;  %v6379_v47 = vmul.f32 %v8257_v59, %v8257_v59 }
 0x2b4   : > { %6179 = vst [vmem:[%s10234_s6] sm:$0xff] %v8260_v45  ;;  %v8266_v41 = vadd.f32 %v5799_v4, %v2406_v33  ;;  %v6377_v46 = vmul.f32 %v8260_v45, %v8260_v45 }
 0x2b5   : > { %6182 = vst [vmem:[%s10234_s6 + $0x18] sm:$0xff] %v8263_v35  ;;  %v6380_v23 = vmul.f32 %v8263_v35, %v8263_v35 }
 0x2b6   : > { %6180 = vst [vmem:[%s10234_s6 + $0x8] sm:$0xff] %v8266_v41  ;;  %v6307_v55 = vadd.f32 %v8266_v41, %v8260_v45  ;;  %v6378_v52 = vmul.f32 %v8266_v41, %v8266_v41 }
 0x2b8   : > { %v6308_v51 = vadd.f32 %v8257_v59, %v6307_v55  ;;  %v6441_v7 = vadd.f32 %v6378_v52, %v6377_v46  ;;  %v8195_v34 = vpop.f32.mrb[4].mxu0 }
 0x2b9   : > { %v8269_v6 = vadd.f32 %v8195_v34, %v7865_v44  ;;  %v5812_v8 = vpop.f32.mrb[5].mxu0 }
 0x2ba   : > { %v6309_v5 = vadd.f32 %v8263_v35, %v6308_v51  ;;  %v6442_v28 = vadd.f32 %v6441_v7, %v6379_v47  ;;  %v8272_v15 = vadd.f32 %v5812_v8, %v2419_v19  ;;  %v8196_v36 = vpop.f32.mrb[6].mxu0 }
 0x2bb   : > { %6185 = vst [vmem:[%s10234_s6 + $0x30] sm:$0xff] %v8269_v6  ;;  %v8275_v31 = vadd.f32 %v8196_v36, %v7866_v24  ;;  %v5815_v54 = vpop.f32.mrb[7].mxu0  ;;  %v6383_v50 = vmul.f32 %v8269_v6, %v8269_v6 }
 0x2bc   : > { %v6443_v53 = vadd.f32 %v6442_v28, %v6380_v23  ;;  %6183 = vst [vmem:[%s10234_s6 + $0x20] sm:$0xff] %v8272_v15  ;;  %v6310_v32 = vadd.f32 %v8272_v15, %v6309_v5  ;;  %v6381_v43 = vmul.f32 %v8272_v15, %v8272_v15  ;;  %v8278_v16 = vadd.f32 %v5815_v54, %v10176_v60 }
 0x2bd   : > { %6186 = vst [vmem:[%s10234_s6 + $0x38] sm:$0xff] %v8275_v31  ;;  %v6384_v19 = vmul.f32 %v8275_v31, %v8275_v31 }
 0x2be   : > { %v6444_v27 = vadd.f32 %v6443_v53, %v6381_v43  ;;  %6184 = vst [vmem:[%s10234_s6 + $0x28] sm:$0xff] %v8278_v16  ;;  %v6311_v40 = vadd.f32 %v8278_v16, %v6310_v32  ;;  %v6382_v56 = vmul.f32 %v8278_v16, %v8278_v16 }
 0x2c0   : > { %v6312_v26 = vadd.f32 %v8269_v6, %v6311_v40  ;;  %v6445_v42 = vadd.f32 %v6444_v27, %v6382_v56  ;;  %v8199_v13 = vpop.f32.mrb[8].mxu0 }
 0x2c1   : > { %v8281_v33 = vadd.f32 %v8199_v13, %v10178_v9  ;;  %v5828_v44 = vpop.f32.mrb[9].mxu0 }
 0x2c2   : > { %v6446_v24 = vadd.f32 %v6445_v42, %v6383_v50  ;;  %v8284_v60 = vadd.f32 %v5828_v44, %v10180_v37  ;;  %v6313_v18 = vadd.f32 %v8275_v31, %v6312_v26  ;;  %v8200_v59 = vpop.f32.mrb[10].mxu0 }
 0x2c3   : > { %6189 = vst [vmem:[%s10234_s6 + $0x50] sm:$0xff] %v8281_v33  ;;  %v8287_v21 = vadd.f32 %v8200_v59, %v10182_v39  ;;  %v5831_v45 = vpop.f32.mrb[11].mxu0  ;;  %v6387_v37 = vmul.f32 %v8281_v33, %v8281_v33 }
 0x2c4   : > { %6187 = vst [vmem:[%s10234_s6 + $0x40] sm:$0xff] %v8284_v60  ;;  %v6314_v22 = vadd.f32 %v8284_v60, %v6313_v18  ;;  %v6385_v35 = vmul.f32 %v8284_v60, %v8284_v60  ;;  %v6447_v4 = vadd.f32 %v6446_v24, %v6384_v19  ;;  %v8290_v41 = vadd.f32 %v5831_v45, %v10184_v57 }
 0x2c5   : > { %6190 = vst [vmem:[%s10234_s6 + $0x58] sm:$0xff] %v8287_v21  ;;  %v6388_v34 = vmul.f32 %v8287_v21, %v8287_v21 }
 0x2c6   : > { %v6448_v9 = vadd.f32 %v6447_v4, %v6385_v35  ;;  %6188 = vst [vmem:[%s10234_s6 + $0x48] sm:$0xff] %v8290_v41  ;;  %v6315_v46 = vadd.f32 %v8290_v41, %v6314_v22  ;;  %v6386_v55 = vmul.f32 %v8290_v41, %v8290_v41 }
 0x2c8   : > { %v6316_v52 = vadd.f32 %v8281_v33, %v6315_v46  ;;  %v6449_v47 = vadd.f32 %v6448_v9, %v6386_v55  ;;  %v8203_v51 = vpop.f32.mrb[12].mxu0 }
 0x2c9   : > { %v8293_v39 = vadd.f32 %v8203_v51, %v10186_v3  ;;  %v5844_v7 = vpop.f32.mrb[13].mxu0 }
 0x2ca   : > { %v6450_v6 = vadd.f32 %v6449_v47, %v6387_v37  ;;  %v8296_v57 = vadd.f32 %v5844_v7, %v10188_v62  ;;  %v6317_v8 = vadd.f32 %v8287_v21, %v6316_v52  ;;  %v8204_v23 = vpop.f32.mrb[14].mxu0 }
 0x2cb   : > { %6193 = vst [vmem:[%s10234_s6 + $0x70] sm:$0xff] %v8293_v39  ;;  %v8299_v5 = vadd.f32 %v8204_v23, %v10190_v58  ;;  %v5847_v28 = vpop.f32.mrb[15].mxu0  ;;  %v6391_v62 = vmul.f32 %v8293_v39, %v8293_v39 }
 0x2cc   : > { %6191 = vst [vmem:[%s10234_s6 + $0x60] sm:$0xff] %v8296_v57  ;;  %v6318_v15 = vadd.f32 %v8296_v57, %v6317_v8  ;;  %v6389_v36 = vmul.f32 %v8296_v57, %v8296_v57  ;;  %v6451_v31 = vadd.f32 %v6450_v6, %v6388_v34  ;;  %v8302_v54 = vadd.f32 %v5847_v28, %v10192_v10 }
 0x2cd   : > { %6194 = vst [vmem:[%s10234_s6 + $0x78] sm:$0xff] %v8299_v5  ;;  %v6392_v56 = vmul.f32 %v8299_v5, %v8299_v5 }
 0x2ce   : > { %v6452_v3 = vadd.f32 %v6451_v31, %v6389_v36  ;;  %6192 = vst [vmem:[%s10234_s6 + $0x68] sm:$0xff] %v8302_v54  ;;  %v6319_v53 = vadd.f32 %v8302_v54, %v6318_v15  ;;  %v6390_v32 = vmul.f32 %v8302_v54, %v8302_v54 }
 0x2d0   : > { %v6320_v43 = vadd.f32 %v8293_v39, %v6319_v53  ;;  %v6453_v16 = vadd.f32 %v6452_v3, %v6390_v32  ;;  %v8207_v27 = vpop.f32.mrb[16].mxu0 }
 0x2d1   : > { %v8305_v58 = vadd.f32 %v8207_v27, %v10194_v49  ;;  %v5860_v40 = vpop.f32.mrb[17].mxu0 }
 0x2d2   : > { %v6454_v50 = vadd.f32 %v6453_v16, %v6391_v62  ;;  %v8308_v10 = vadd.f32 %v5860_v40, %v10196_v48  ;;  %v6321_v26 = vadd.f32 %v8299_v5, %v6320_v43  ;;  %v8208_v42 = vpop.f32.mrb[18].mxu0 }
 0x2d3   : > { %6197 = vst [vmem:[%s10234_s6 + $0x90] sm:$0xff] %v8305_v58  ;;  %v8311_v13 = vadd.f32 %v8208_v42, %v10198_v0  ;;  %v5863_v33 = vpop.f32.mrb[19].mxu0  ;;  %v6395_v48 = vmul.f32 %v8305_v58, %v8305_v58 }
 0x2d4   : > { %6195 = vst [vmem:[%s10234_s6 + $0x80] sm:$0xff] %v8308_v10  ;;  %v6322_v44 = vadd.f32 %v8308_v10, %v6321_v26  ;;  %v6393_v19 = vmul.f32 %v8308_v10, %v8308_v10  ;;  %v6455_v24 = vadd.f32 %v6454_v50, %v6392_v56  ;;  %v8314_v60 = vadd.f32 %v5863_v33, %v10200_v63 }
 0x2d5   : > { %6198 = vst [vmem:[%s10234_s6 + $0x98] sm:$0xff] %v8311_v13  ;;  %v6396_v4 = vmul.f32 %v8311_v13, %v8311_v13 }
 0x2d6   : > { %v6456_v49 = vadd.f32 %v6455_v24, %v6393_v19  ;;  %6196 = vst [vmem:[%s10234_s6 + $0x88] sm:$0xff] %v8314_v60  ;;  %v6323_v18 = vadd.f32 %v8314_v60, %v6322_v44  ;;  %v6394_v59 = vmul.f32 %v8314_v60, %v8314_v60 }
 0x2d8   : > { %v6324_v21 = vadd.f32 %v8305_v58, %v6323_v18  ;;  %v6457_v45 = vadd.f32 %v6456_v49, %v6394_v59  ;;  %v8211_v22 = vpop.f32.mrb[20].mxu0 }
 0x2d9   : > { %v8317_v0 = vadd.f32 %v8211_v22, %v10202_v12  ;;  %v5876_v35 = vpop.f32.mrb[21].mxu0 }
 0x2da   : > { %v6458_v41 = vadd.f32 %v6457_v45, %v6395_v48  ;;  %v8320_v63 = vadd.f32 %v5876_v35, %v10204_v38  ;;  %v6325_v9 = vadd.f32 %v8311_v13, %v6324_v21  ;;  %v8212_v46 = vpop.f32.mrb[22].mxu0 }
 0x2db   : > { %6201 = vst [vmem:[%s10234_s6 + $0xb0] sm:$0xff] %v8317_v0  ;;  %v8323_v55 = vadd.f32 %v8212_v46, %v10206_v17  ;;  %v5879_v37 = vpop.f32.mrb[23].mxu0  ;;  %v6399_v38 = vmul.f32 %v8317_v0, %v8317_v0 }
 0x2dc   : > { %6199 = vst [vmem:[%s10234_s6 + $0xa0] sm:$0xff] %v8320_v63  ;;  %v6326_v52 = vadd.f32 %v8320_v63, %v6325_v9  ;;  %v6397_v47 = vmul.f32 %v8320_v63, %v8320_v63  ;;  %v6459_v51 = vadd.f32 %v6458_v41, %v6396_v4  ;;  %v8326_v39 = vadd.f32 %v5879_v37, %v10208_v11 }
 0x2dd   : > { %6202 = vst [vmem:[%s10234_s6 + $0xb8] sm:$0xff] %v8323_v55  ;;  %v6400_v5 = vmul.f32 %v8323_v55, %v8323_v55 }
 0x2de   : > { %v6460_v12 = vadd.f32 %v6459_v51, %v6397_v47  ;;  %6200 = vst [vmem:[%s10234_s6 + $0xa8] sm:$0xff] %v8326_v39  ;;  %v6327_v7 = vadd.f32 %v8326_v39, %v6326_v52  ;;  %v6398_v34 = vmul.f32 %v8326_v39, %v8326_v39 }
 0x2e0   : > { %v6328_v6 = vadd.f32 %v8317_v0, %v6327_v7  ;;  %v6461_v57 = vadd.f32 %v6460_v12, %v6398_v34  ;;  %v8215_v8 = vpop.f32.mrb[24].mxu0 }
 0x2e1   : > { %v8329_v17 = vadd.f32 %v8215_v8, %v10214_v25  ;;  %v5892_v23 = vpop.f32.mrb[25].mxu0 }
 0x2e2   : > { %v6462_v28 = vadd.f32 %v6461_v57, %v6399_v38  ;;  %v8332_v11 = vadd.f32 %v5892_v23, %v10216_v14  ;;  %v6329_v15 = vadd.f32 %v8323_v55, %v6328_v6  ;;  %v8216_v36 = vpop.f32.mrb[26].mxu0 }
 0x2e3   : > { %6205 = vst [vmem:[%s10234_s6 + $0xd0] sm:$0xff] %v8329_v17  ;;  %v8335_v31 = vadd.f32 %v8216_v36, %v10218_v29  ;;  %v5895_v54 = vpop.f32.mrb[27].mxu0  ;;  %v6403_v14 = vmul.f32 %v8329_v17, %v8329_v17 }
 0x2e4   : > { %6203 = vst [vmem:[%s10234_s6 + $0xc0] sm:$0xff] %v8332_v11  ;;  %v6330_v3 = vadd.f32 %v8332_v11, %v6329_v15  ;;  %v6401_v53 = vmul.f32 %v8332_v11, %v8332_v11  ;;  %v6463_v32 = vadd.f32 %v6462_v28, %v6400_v5  ;;  %v8338_v62 = vadd.f32 %v5895_v54, %v10221_v20 }
 0x2e5   : > { %6206 = vst [vmem:[%s10234_s6 + $0xd8] sm:$0xff] %v8335_v31  ;;  %v6404_v50 = vmul.f32 %v8335_v31, %v8335_v31 }
 0x2e6   : > { %v6464_v25 = vadd.f32 %v6463_v32, %v6401_v53  ;;  %6204 = vst [vmem:[%s10234_s6 + $0xc8] sm:$0xff] %v8338_v62  ;;  %v6331_v43 = vadd.f32 %v8338_v62, %v6330_v3  ;;  %v6402_v16 = vmul.f32 %v8338_v62, %v8338_v62 }
 0x2e8   : > { %v6332_v27 = vadd.f32 %v8329_v17, %v6331_v43  ;;  %v6465_v58 = vadd.f32 %v6464_v25, %v6402_v16  ;;  %v8219_v40 = vpop.f32.mrb[28].mxu0 }
 0x2e9   : > { %v8341_v29 = vadd.f32 %v8219_v40, %v10223_v1  ;;  %v5908_v56 = vpop.f32.mrb[29].mxu0 }
 0x2ea   : > { %v6466_v10 = vadd.f32 %v6465_v58, %v6403_v14  ;;  %v8344_v20 = vadd.f32 %v5908_v56, %v10225_v30  ;;  %v6333_v26 = vadd.f32 %v8335_v31, %v6332_v27  ;;  %v8220_v42 = vpop.f32.mrb[30].mxu0 }
 0x2eb   : > { %6209 = vst [vmem:[%s10234_s6 + $0xf0] sm:$0xff] %v8341_v29  ;;  %v8347_v13 = vadd.f32 %v8220_v42, %v10227_v2  ;;  %v5911_v33 = vpop.f32.mrb[31].mxu0  ;;  %v6407_v30 = vmul.f32 %v8341_v29, %v8341_v29 }
 0x2ec   : > { %6207 = vst [vmem:[%s10234_s6 + $0xe0] sm:$0xff] %v8344_v20  ;;  %v6334_v44 = vadd.f32 %v8344_v20, %v6333_v26  ;;  %v6405_v19 = vmul.f32 %v8344_v20, %v8344_v20  ;;  %v6467_v24 = vadd.f32 %v6466_v10, %v6404_v50  ;;  %v8350_v60 = vadd.f32 %v5911_v33, %v10229_v61 }
 0x2ed   : > { %6210 = vst [vmem:[%s10234_s6 + $0xf8] sm:$0xff] %v8347_v13  ;;  %v6408_v4 = vmul.f32 %v8347_v13, %v8347_v13 }
 0x2ee   : > { %v6468_v1 = vadd.f32 %v6467_v24, %v6405_v19  ;;  %6208 = vst [vmem:[%s10234_s6 + $0xe8] sm:$0xff] %v8350_v60  ;;  %v6335_v49 = vadd.f32 %v8350_v60, %v6334_v44  ;;  %v6406_v18 = vmul.f32 %v8350_v60, %v8350_v60 }
 0x2f0   : > { %v7959_v59 = vpop.f32.mrb[32].mxu1  ;;  %v6336_v48 = vadd.f32 %v8341_v29, %v6335_v49  ;;  %v6469_v21 = vadd.f32 %v6468_v1, %v6406_v18  ;;  %v8223_v45 = vpop.f32.mrb[32].mxu0 }
 0x2f1   : > { %v3209_v2 = vpop.f32.mrb[33].mxu1  ;;  %v8353_v22 = vadd.f32 %v8223_v45, %v7959_v59  ;;  %v5924_v0 = vpop.f32.mrb[33].mxu0 }
 0x2f2   : > { %v7960_v35 = vpop.f32.mrb[34].mxu1  ;;  %v6470_v61 = vadd.f32 %v6469_v21, %v6407_v30  ;;  %v8356_v41 = vadd.f32 %v5924_v0, %v3209_v2  ;;  %v6337_v63 = vadd.f32 %v8347_v13, %v6336_v48  ;;  %v8224_v9 = vpop.f32.mrb[34].mxu0 }
 0x2f3   : > { %v3212_v46 = vpop.f32.mrb[35].mxu1  ;;  %6213 = vst [vmem:[%s10234_s6 + $0x110] sm:$0xff] %v8353_v22  ;;  %v8359_v55 = vadd.f32 %v8224_v9, %v7960_v35  ;;  %v5927_v37 = vpop.f32.mrb[35].mxu0  ;;  %v6411_v6 = vmul.f32 %v8353_v22, %v8353_v22 }
 0x2f4   : > { %6211 = vst [vmem:[%s10234_s6 + $0x100] sm:$0xff] %v8356_v41  ;;  %v6338_v52 = vadd.f32 %v8356_v41, %v6337_v63  ;;  %v6409_v47 = vmul.f32 %v8356_v41, %v8356_v41  ;;  %v6471_v51 = vadd.f32 %v6470_v61, %v6408_v4  ;;  %v8362_v39 = vadd.f32 %v5927_v37, %v3212_v46 }
 0x2f5   : > { %6214 = vst [vmem:[%s10234_s6 + $0x118] sm:$0xff] %v8359_v55  ;;  %v6412_v15 = vmul.f32 %v8359_v55, %v8359_v55 }
 0x2f6   : > { %v6472_v12 = vadd.f32 %v6471_v51, %v6409_v47  ;;  %6212 = vst [vmem:[%s10234_s6 + $0x108] sm:$0xff] %v8362_v39  ;;  %v6339_v7 = vadd.f32 %v8362_v39, %v6338_v52  ;;  %v6410_v34 = vmul.f32 %v8362_v39, %v8362_v39 }
 0x2f8   : > { %v7963_v38 = vpop.f32.mrb[36].mxu1  ;;  %v6340_v57 = vadd.f32 %v8353_v22, %v6339_v7  ;;  %v6473_v8 = vadd.f32 %v6472_v12, %v6410_v34  ;;  %v8227_v17 = vpop.f32.mrb[36].mxu0 }
 0x2f9   : > { %v3225_v23 = vpop.f32.mrb[37].mxu1  ;;  %v8365_v5 = vadd.f32 %v8227_v17, %v7963_v38  ;;  %v5940_v28 = vpop.f32.mrb[37].mxu0 }
 0x2fa   : > { %v7964_v11 = vpop.f32.mrb[38].mxu1  ;;  %v6474_v36 = vadd.f32 %v6473_v8, %v6411_v6  ;;  %v8368_v31 = vadd.f32 %v5940_v28, %v3225_v23  ;;  %v6341_v54 = vadd.f32 %v8359_v55, %v6340_v57  ;;  %v8228_v3 = vpop.f32.mrb[38].mxu0 }
 0x2fb   : > { %v3228_v53 = vpop.f32.mrb[39].mxu1  ;;  %6217 = vst [vmem:[%s10234_s6 + $0x130] sm:$0xff] %v8365_v5  ;;  %v8371_v32 = vadd.f32 %v8228_v3, %v7964_v11  ;;  %v5943_v62 = vpop.f32.mrb[39].mxu0  ;;  %v6415_v56 = vmul.f32 %v8365_v5, %v8365_v5 }
 0x2fc   : > { %6215 = vst [vmem:[%s10234_s6 + $0x120] sm:$0xff] %v8368_v31  ;;  %v6342_v25 = vadd.f32 %v8368_v31, %v6341_v54  ;;  %v6413_v43 = vmul.f32 %v8368_v31, %v8368_v31  ;;  %v6475_v16 = vadd.f32 %v6474_v36, %v6412_v15  ;;  %v8374_v14 = vadd.f32 %v5943_v62, %v3228_v53 }
 0x2fd   : > { %6218 = vst [vmem:[%s10234_s6 + $0x138] sm:$0xff] %v8371_v32  ;;  %v6416_v44 = vmul.f32 %v8371_v32, %v8371_v32 }
 0x2fe   : > { %v6476_v27 = vadd.f32 %v6475_v16, %v6413_v43  ;;  %6216 = vst [vmem:[%s10234_s6 + $0x128] sm:$0xff] %v8374_v14  ;;  %v6343_v58 = vadd.f32 %v8374_v14, %v6342_v25  ;;  %v6414_v40 = vmul.f32 %v8374_v14, %v8374_v14 }
 0x300   : > { %v7967_v29 = vpop.f32.mrb[40].mxu1  ;;  %v6344_v50 = vadd.f32 %v8365_v5, %v6343_v58  ;;  %v6477_v10 = vadd.f32 %v6476_v27, %v6414_v40  ;;  %v8231_v20 = vpop.f32.mrb[40].mxu0 }
 0x301   : > { %v3241_v26 = vpop.f32.mrb[41].mxu1  ;;  %v8377_v42 = vadd.f32 %v8231_v20, %v7967_v29  ;;  %v5956_v13 = vpop.f32.mrb[41].mxu0 }
 0x302   : > { %v7968_v33 = vpop.f32.mrb[42].mxu1  ;;  %v6478_v19 = vadd.f32 %v6477_v10, %v6415_v56  ;;  %v8380_v24 = vadd.f32 %v5956_v13, %v3241_v26  ;;  %v6345_v60 = vadd.f32 %v8371_v32, %v6344_v50  ;;  %v8232_v1 = vpop.f32.mrb[42].mxu0 }
 0x303   : > { %v3244_v49 = vpop.f32.mrb[43].mxu1  ;;  %6221 = vst [vmem:[%s10234_s6 + $0x150] sm:$0xff] %v8377_v42  ;;  %v8383_v18 = vadd.f32 %v8232_v1, %v7968_v33  ;;  %v5959_v59 = vpop.f32.mrb[43].mxu0  ;;  %v6419_v4 = vmul.f32 %v8377_v42, %v8377_v42 }
 0x304   : > { %6219 = vst [vmem:[%s10234_s6 + $0x140] sm:$0xff] %v8380_v24  ;;  %v6346_v30 = vadd.f32 %v8380_v24, %v6345_v60  ;;  %v6417_v48 = vmul.f32 %v8380_v24, %v8380_v24  ;;  %v6479_v21 = vadd.f32 %v6478_v19, %v6416_v44  ;;  %v8386_v45 = vadd.f32 %v5959_v59, %v3244_v49 }
 0x305   : > { %6222 = vst [vmem:[%s10234_s6 + $0x158] sm:$0xff] %v8383_v18  ;;  %v6420_v52 = vmul.f32 %v8383_v18, %v8383_v18 }
 0x306   : > { %v6480_v2 = vadd.f32 %v6479_v21, %v6417_v48  ;;  %6220 = vst [vmem:[%s10234_s6 + $0x148] sm:$0xff] %v8386_v45  ;;  %v6347_v22 = vadd.f32 %v8386_v45, %v6346_v30  ;;  %v6418_v0 = vmul.f32 %v8386_v45, %v8386_v45 }
 0x308   : > { %v7971_v35 = vpop.f32.mrb[44].mxu1  ;;  %v6348_v61 = vadd.f32 %v8377_v42, %v6347_v22  ;;  %v6481_v41 = vadd.f32 %v6480_v2, %v6418_v0  ;;  %v8235_v63 = vpop.f32.mrb[44].mxu0 }
 0x309   : > { %v3257_v9 = vpop.f32.mrb[45].mxu1  ;;  %v8389_v46 = vadd.f32 %v8235_v63, %v7971_v35  ;;  %v5972_v55 = vpop.f32.mrb[45].mxu0 }
 0x30a   : > { %v7972_v37 = vpop.f32.mrb[46].mxu1  ;;  %v6482_v47 = vadd.f32 %v6481_v41, %v6419_v4  ;;  %v8392_v51 = vadd.f32 %v5972_v55, %v3257_v9  ;;  %v6349_v39 = vadd.f32 %v8383_v18, %v6348_v61  ;;  %v8236_v12 = vpop.f32.mrb[46].mxu0 }
 0x30b   : > { %v3260_v7 = vpop.f32.mrb[47].mxu1  ;;  %6225 = vst [vmem:[%s10234_s6 + $0x170] sm:$0xff] %v8389_v46  ;;  %v8395_v34 = vadd.f32 %v8236_v12, %v7972_v37  ;;  %v5975_v38 = vpop.f32.mrb[47].mxu0  ;;  %v6423_v15 = vmul.f32 %v8389_v46, %v8389_v46 }
 0x30c   : > { %6223 = vst [vmem:[%s10234_s6 + $0x160] sm:$0xff] %v8392_v51  ;;  %v6350_v6 = vadd.f32 %v8392_v51, %v6349_v39  ;;  %v6421_v57 = vmul.f32 %v8392_v51, %v8392_v51  ;;  %v6483_v8 = vadd.f32 %v6482_v47, %v6420_v52  ;;  %v8398_v17 = vadd.f32 %v5975_v38, %v3260_v7 }
 0x30d   : > { %6226 = vst [vmem:[%s10234_s6 + $0x178] sm:$0xff] %v8395_v34  ;;  %v6424_v25 = vmul.f32 %v8395_v34, %v8395_v34 }
 0x30e   : > { %v6484_v23 = vadd.f32 %v6483_v8, %v6421_v57  ;;  %6224 = vst [vmem:[%s10234_s6 + $0x168] sm:$0xff] %v8398_v17  ;;  %v6351_v5 = vadd.f32 %v8398_v17, %v6350_v6  ;;  %v6422_v28 = vmul.f32 %v8398_v17, %v8398_v17 }
 0x310   : > { %v7975_v11 = vpop.f32.mrb[48].mxu1  ;;  %v6352_v36 = vadd.f32 %v8389_v46, %v6351_v5  ;;  %v6485_v31 = vadd.f32 %v6484_v23, %v6422_v28  ;;  %v8239_v54 = vpop.f32.mrb[48].mxu0 }
 0x311   : > { %v3273_v3 = vpop.f32.mrb[49].mxu1  ;;  %v8401_v53 = vadd.f32 %v8239_v54, %v7975_v11  ;;  %v5988_v32 = vpop.f32.mrb[49].mxu0 }
 0x312   : > { %v7976_v62 = vpop.f32.mrb[50].mxu1  ;;  %v6486_v43 = vadd.f32 %v6485_v31, %v6423_v15  ;;  %v8404_v16 = vadd.f32 %v5988_v32, %v3273_v3  ;;  %v6353_v14 = vadd.f32 %v8395_v34, %v6352_v36  ;;  %v8240_v27 = vpop.f32.mrb[50].mxu0 }
 0x313   : > { %v3276_v58 = vpop.f32.mrb[51].mxu1  ;;  %6229 = vst [vmem:[%s10234_s6 + $0x190] sm:$0xff] %v8401_v53  ;;  %v8407_v40 = vadd.f32 %v8240_v27, %v7976_v62  ;;  %v5991_v29 = vpop.f32.mrb[51].mxu0  ;;  %v6427_v44 = vmul.f32 %v8401_v53, %v8401_v53 }
 0x314   : > { %6227 = vst [vmem:[%s10234_s6 + $0x180] sm:$0xff] %v8404_v16  ;;  %v6354_v56 = vadd.f32 %v8404_v16, %v6353_v14  ;;  %v6425_v50 = vmul.f32 %v8404_v16, %v8404_v16  ;;  %v6487_v10 = vadd.f32 %v6486_v43, %v6424_v25  ;;  %v8410_v20 = vadd.f32 %v5991_v29, %v3276_v58 }
 0x315   : > { %6230 = vst [vmem:[%s10234_s6 + $0x198] sm:$0xff] %v8407_v40  ;;  %v6428_v30 = vmul.f32 %v8407_v40, %v8407_v40 }
 0x316   : > { %v6488_v26 = vadd.f32 %v6487_v10, %v6425_v50  ;;  %6228 = vst [vmem:[%s10234_s6 + $0x188] sm:$0xff] %v8410_v20  ;;  %v6355_v42 = vadd.f32 %v8410_v20, %v6354_v56  ;;  %v6426_v13 = vmul.f32 %v8410_v20, %v8410_v20 }
 0x318   : > { %v7979_v33 = vpop.f32.mrb[52].mxu1  ;;  %v6356_v19 = vadd.f32 %v8401_v53, %v6355_v42  ;;  %v6489_v24 = vadd.f32 %v6488_v26, %v6426_v13  ;;  %v8243_v60 = vpop.f32.mrb[52].mxu0 }
 0x319   : > { %v3289_v1 = vpop.f32.mrb[53].mxu1  ;;  %v8413_v49 = vadd.f32 %v8243_v60, %v7979_v33  ;;  %v6004_v18 = vpop.f32.mrb[53].mxu0 }
 0x31a   : > { %v7980_v59 = vpop.f32.mrb[54].mxu1  ;;  %v6490_v48 = vadd.f32 %v6489_v24, %v6427_v44  ;;  %v8416_v21 = vadd.f32 %v6004_v18, %v3289_v1  ;;  %v6357_v45 = vadd.f32 %v8407_v40, %v6356_v19  ;;  %v8244_v2 = vpop.f32.mrb[54].mxu0 }
 0x31b   : > { %v3292_v22 = vpop.f32.mrb[55].mxu1  ;;  %6233 = vst [vmem:[%s10234_s6 + $0x1b0] sm:$0xff] %v8413_v49  ;;  %v8419_v0 = vadd.f32 %v8244_v2, %v7980_v59  ;;  %v6007_v35 = vpop.f32.mrb[55].mxu0  ;;  %v6431_v52 = vmul.f32 %v8413_v49, %v8413_v49 }
 0x31c   : > { %6231 = vst [vmem:[%s10234_s6 + $0x1a0] sm:$0xff] %v8416_v21  ;;  %v6358_v4 = vadd.f32 %v8416_v21, %v6357_v45  ;;  %v6429_v61 = vmul.f32 %v8416_v21, %v8416_v21  ;;  %v6491_v41 = vadd.f32 %v6490_v48, %v6428_v30  ;;  %v8422_v63 = vadd.f32 %v6007_v35, %v3292_v22 }
 0x31d   : > { %6234 = vst [vmem:[%s10234_s6 + $0x1b8] sm:$0xff] %v8419_v0  ;;  %v6432_v6 = vmul.f32 %v8419_v0, %v8419_v0 }
 0x31e   : > { %v6492_v9 = vadd.f32 %v6491_v41, %v6429_v61  ;;  %6232 = vst [vmem:[%s10234_s6 + $0x1a8] sm:$0xff] %v8422_v63  ;;  %v6359_v46 = vadd.f32 %v8422_v63, %v6358_v4  ;;  %v6430_v55 = vmul.f32 %v8422_v63, %v8422_v63 }
 0x320   : > { %v7983_v37 = vpop.f32.mrb[56].mxu1  ;;  %v6360_v47 = vadd.f32 %v8413_v49, %v6359_v46  ;;  %v6493_v51 = vadd.f32 %v6492_v9, %v6430_v55  ;;  %v8247_v39 = vpop.f32.mrb[56].mxu0 }
 0x321   : > { %v3305_v12 = vpop.f32.mrb[57].mxu1  ;;  %v8425_v7 = vadd.f32 %v8247_v39, %v7983_v37  ;;  %v6020_v34 = vpop.f32.mrb[57].mxu0 }
 0x322   : > { %v7984_v38 = vpop.f32.mrb[58].mxu1  ;;  %v6494_v57 = vadd.f32 %v6493_v51, %v6431_v52  ;;  %v8428_v8 = vadd.f32 %v6020_v34, %v3305_v12  ;;  %v6361_v17 = vadd.f32 %v8419_v0, %v6360_v47  ;;  %v8248_v23 = vpop.f32.mrb[58].mxu0 }
 0x323   : > { %v3308_v5 = vpop.f32.mrb[59].mxu1  ;;  %6237 = vst [vmem:[%s10234_s6 + $0x1d0] sm:$0xff] %v8425_v7  ;;  %v8431_v28 = vadd.f32 %v8248_v23, %v7984_v38  ;;  %v6023_v11 = vpop.f32.mrb[59].mxu0  ;;  %v6435_v25 = vmul.f32 %v8425_v7, %v8425_v7 }
 0x324   : > { %6235 = vst [vmem:[%s10234_s6 + $0x1c0] sm:$0xff] %v8428_v8  ;;  %v6362_v15 = vadd.f32 %v8428_v8, %v6361_v17  ;;  %v6433_v36 = vmul.f32 %v8428_v8, %v8428_v8  ;;  %v6495_v31 = vadd.f32 %v6494_v57, %v6432_v6  ;;  %v8434_v54 = vadd.f32 %v6023_v11, %v3308_v5 }
 0x325   : > { %6238 = vst [vmem:[%s10234_s6 + $0x1d8] sm:$0xff] %v8431_v28  ;;  %v6436_v56 = vmul.f32 %v8431_v28, %v8431_v28 }
 0x326   : > { %v6496_v3 = vadd.f32 %v6495_v31, %v6433_v36  ;;  %6236 = vst [vmem:[%s10234_s6 + $0x1c8] sm:$0xff] %v8434_v54  ;;  %v6363_v53 = vadd.f32 %v8434_v54, %v6362_v15  ;;  %v6434_v32 = vmul.f32 %v8434_v54, %v8434_v54 }
 0x328   : > { %v7987_v62 = vpop.f32.mrb[60].mxu1  ;;  %v6364_v43 = vadd.f32 %v8425_v7, %v6363_v53  ;;  %v6497_v16 = vadd.f32 %v6496_v3, %v6434_v32  ;;  %v8251_v14 = vpop.f32.mrb[60].mxu0 }
 0x329   : > { %v3321_v27 = vpop.f32.mrb[61].mxu1  ;;  %v8437_v58 = vadd.f32 %v8251_v14, %v7987_v62  ;;  %v6036_v40 = vpop.f32.mrb[61].mxu0 }
 0x32a   : > { %v7988_v29 = vpop.f32.mrb[62].mxu1  ;;  %v6498_v50 = vadd.f32 %v6497_v16, %v6435_v25  ;;  %v8440_v10 = vadd.f32 %v6036_v40, %v3321_v27  ;;  %v6365_v20 = vadd.f32 %v8431_v28, %v6364_v43  ;;  %v8252_v26 = vpop.f32.mrb[62].mxu0 }
 0x32b   : > { %v3324_v42 = vpop.f32.mrb[63].mxu1  ;;  %6241 = vst [vmem:[%s10234_s6 + $0x1f0] sm:$0xff] %v8437_v58  ;;  %v8443_v13 = vadd.f32 %v8252_v26, %v7988_v29  ;;  %v6039_v33 = vpop.f32.mrb[63].mxu0  ;;  %v6439_v59 = vmul.f32 %v8437_v58, %v8437_v58 }
 0x32c   : > { %6239 = vst [vmem:[%s10234_s6 + $0x1e0] sm:$0xff] %v8440_v10  ;;  %v6366_v44 = vadd.f32 %v8440_v10, %v6365_v20  ;;  %v6437_v19 = vmul.f32 %v8440_v10, %v8440_v10  ;;  %v6499_v24 = vadd.f32 %v6498_v50, %v6436_v56  ;;  %v8446_v60 = vadd.f32 %v6039_v33, %v3324_v42 }
 0x32d   : > { %6242 = vst [vmem:[%s10234_s6 + $0x1f8] sm:$0xff] %v8443_v13  ;;  %v6440_v21 = vmul.f32 %v8443_v13, %v8443_v13 }
 0x32e   : > { %v6500_v1 = vadd.f32 %v6499_v24, %v6437_v19  ;;  %6240 = vst [vmem:[%s10234_s6 + $0x1e8] sm:$0xff] %v8446_v60  ;;  %v6367_v49 = vadd.f32 %v8446_v60, %v6366_v44  ;;  %v6438_v18 = vmul.f32 %v8446_v60, %v8446_v60 }
 0x330   : > { %v6368_v30 = vadd.f32 %v8437_v58, %v6367_v49  ;;  %v6501_v48 = vadd.f32 %v6500_v1, %v6438_v18 }
 0x332   : > { %v6369_v45 = vadd.f32 %v8443_v13, %v6368_v30  ;;  %v6502_v2 = vadd.f32 %v6501_v48, %v6439_v59 }
 0x334   : > { %v6370_v22 = vrot.slane %v6369_v45, 4  ;;  %v6503_v0 = vadd.f32 %v6502_v2, %v6440_v21 }
 0x336   : > { %v6371_v35 = vadd.f32 %v6370_v22, %v6369_v45  ;;  %v6504_v4 = vrot.slane %v6503_v0, 4 }
 0x338   : > { %v6372_v61 = vrot.slane %v6371_v35, 2  ;;  %v6505_v41 = vadd.f32 %v6504_v4, %v6503_v0 }
 0x33a   : > { %v6373_v63 = vadd.f32 %v6372_v61, %v6371_v35  ;;  %v6506_v9 = vrot.slane %v6505_v41, 2 }
 0x33c   : > { %v6374_v46 = vrot.slane %v6373_v63, 1  ;;  %v6507_v55 = vadd.f32 %v6506_v9, %v6505_v41 }
 0x33e   : > { %v6375_v37 = vadd.f32 %v6374_v46, %v6373_v63  ;;  %v6508_v52 = vrot.slane %v6507_v55, 1 }
 0x340   : > { %6376 = vst [vmem:[%s248_s9] sm:$0x1] %v6375_v37  ;;  %v6509_v47 = vadd.f32 %v6508_v52, %v6507_v55 }
 0x342   : > { %6510 = vst [vmem:[%s255_s12] sm:$0x1] %v6509_v47 }
 0x343 PF: > { %s15_s19 = sadd.s32 1, %s8984_s19   ;;  %s10389_s15 = smov %s8976_s17 }
 0x344   : > { %p12_p8 = scmp.ge.s32.totalorder %s15_s19, 6   ;;  %s10390_s16 = smov %s8980_s18 }
 0x345   : > { %s10391_s17 = smov %s10394_s20  ;;  %s10392_s18 = smov %s10398_s21 }
 0x346   :  { %14 = sbr.rel (!%p12_p8) target bundleno = 3 (0x3), region = 93 }

</bundles_post_ra>
